<compile_context>
chip_gen: v7x
topology: tpu7x:2x2x1
jax: 0.10.0
libtpu: 0.0.40
codegen_flags: <defaults>
</compile_context>

<pallas_src>
import numpy as np
import jax
import jax.numpy as jnp
from jax import lax
from jax.experimental import pallas as pl
from jax.experimental.pallas import tpu as pltpu


# ----------------------------------------------------------------------------
# Pallas kernel 1: per-frequency complex channel mixing (half-spectrum,
# lane-dense flattened frequencies)
#   y[o, f] = sum_i x[i, f] * w[i, o, f]        (complex, carried as r/i planes)
# ----------------------------------------------------------------------------
def spectral_mix_kernel(xr_ref, xi_ref, wr_ref, wi_ref, yr_ref, yi_ref):
    # xr/xi: (Cin, 1, F)   wr/wi: (Cin, Cout, F)   yr/yi: (Cout, F)
    cin = wr_ref.shape[0]

    def body(i, acc):
        accr, acci = acc
        xr = xr_ref[i]          # (1, F) — leading-axis dynamic load
        xi = xi_ref[i]
        wr = wr_ref[i]          # (Cout, F)
        wi = wi_ref[i]
        accr = accr + xr * wr - xi * wi
        acci = acci + xr * wi + xi * wr
        return accr, acci

    zero = jnp.zeros(yr_ref.shape, jnp.float32)
    accr, acci = lax.fori_loop(0, cin, body, (zero, zero))
    yr_ref[...] = accr
    yi_ref[...] = acci


def spectral_channel_mix(xr, xi, wr, wi):
    """xr/xi: (B, Cin, 1, F) f32 ; wr/wi: (Cin, Cout, F) f32 -> (B, Cout, F)."""
    B, Cin, _, F = xr.shape
    Cout = wr.shape[1]
    x_spec = pl.BlockSpec((None, Cin, 1, F), lambda b: (b, 0, 0, 0))
    w_spec = pl.BlockSpec((Cin, Cout, F), lambda b: (0, 0, 0))
    y_spec = pl.BlockSpec((None, Cout, F), lambda b: (b, 0, 0))
    yr, yi = pl.pallas_call(
        spectral_mix_kernel,
        out_shape=(jax.ShapeDtypeStruct((B, Cout, F), jnp.float32),
                   jax.ShapeDtypeStruct((B, Cout, F), jnp.float32)),
        grid=(B,),
        in_specs=[x_spec, x_spec, w_spec, w_spec],
        out_specs=(y_spec, y_spec),
        compiler_params=pltpu.CompilerParams(
            dimension_semantics=("parallel",)),   # lets v7x split batch over 2 TCs
    )(xr, xi, wr, wi)
    return yr, yi


# ----------------------------------------------------------------------------
# Pallas kernel 2: fused network head
#   conv2-bias + ReLU + AdaptiveAvgPool(4,4) (folded into fc1 weight)
#   + fc1 + ReLU + fc2        (bf16 weights, f32 MXU accumulation)
# ----------------------------------------------------------------------------
def head_kernel(x_ref, b2_ref, w1_ref, b1_ref, w2_ref, bo_ref, o_ref):
    h0 = jnp.maximum(x_ref[...] + b2_ref[...], 0.0)                  # (B, C*Hc*Wc)
    h1 = jnp.dot(h0.astype(jnp.bfloat16), w1_ref[...],
                 preferred_element_type=jnp.float32) + b1_ref[...]   # (B, 128)
    h1 = jnp.maximum(h1, 0.0)
    o_ref[...] = jnp.dot(h1.astype(jnp.bfloat16), w2_ref[...],
                         preferred_element_type=jnp.float32) + bo_ref[...]


def head_pallas(x, b2, w1, b1, w2, bo):
    B, D = x.shape
    Hd = w1.shape[1]
    O = w2.shape[1]

    def full(shape):
        return pl.BlockSpec(shape, lambda i, _s=shape: (0,) * len(_s))

    return pl.pallas_call(
        head_kernel,
        out_shape=jax.ShapeDtypeStruct((B, O), jnp.float32),
        grid=(1,),
        in_specs=[full((B, D)), full((1, D)), full((D, Hd)), full((1, Hd)),
                  full((Hd, O)), full((1, O))],
        out_specs=full((B, O)),
    )(x, b2, w1, b1, w2, bo)


# ----------------------------------------------------------------------------
# Plain-JAX glue: FFTs, Hermitian reconstruction, trigonometric downsampling
# ----------------------------------------------------------------------------
def hermitian_extend(y_half, W):
    """Rebuild full-width spectrum (..., H, W) from the rfft half (..., H, Wf).

    Exact for spectra of real signals: Y[h, W-q] = conj(Y[(-h) % H, q])."""
    Wf = y_half.shape[-1]
    neg = y_half[..., 1:W - Wf + 1]                      # source cols 1 .. W-Wf
    neg = jnp.flip(neg, axis=-1)                         # cols W-Wf .. 1
    neg = jnp.roll(jnp.flip(neg, axis=-2), 1, axis=-2)   # row h <- row (-h) % H
    return jnp.concatenate([y_half, jnp.conj(neg)], axis=-1)


def spectral_conv_rfft(x, w_r, w_i, stride):
    """x: (B, Cin, H, W) f32; w_r/w_i: (Cin, Cout, H*(W//2+1)).

    Returns (B, Cout, H//stride, W//stride) float32 (bias NOT added)."""
    B, Cin, H, W = x.shape
    Wf = W // 2 + 1
    Hout, Wout = H // stride, W // stride
    Cout = w_r.shape[1]

    x_ft = jnp.fft.rfft2(x, norm="forward")               # (B, Cin, H, Wf)
    xr = jnp.real(x_ft).reshape(B, Cin, 1, H * Wf)
    xi = jnp.imag(x_ft).reshape(B, Cin, 1, H * Wf)

    yr, yi = spectral_channel_mix(xr, xi, w_r, w_i)        # (B, Cout, H*Wf)
    y_half = (yr + 1j * yi).reshape(B, Cout, H, Wf)
    y_ft = hermitian_extend(y_half, W)                     # (B, Cout, H, W)

    # trigonometric (low-frequency-crop) downsampling by `stride`
    hk = Hout - Hout // 2
    wk = Wout - Wout // 2
    y_ft = jnp.concatenate([y_ft[..., :hk, :], y_ft[..., H - Hout // 2:, :]],
                           axis=-2)
    y_ft = jnp.concatenate([y_ft[..., :, :wk], y_ft[..., :, W - Wout // 2:]],
                           axis=-1)
    return jnp.real(jnp.fft.ifft2(y_ft, norm="forward"))


# ----------------------------------------------------------------------------
# Parameter-only precomputation (done once, outside the forward path)
# ----------------------------------------------------------------------------
def kernel_rfft_planes(w, H, W):
    """w: (Cout, Cin, k1, k2) -> real/imag planes (Cin, Cout, H*(W//2+1))."""
    Cout, Cin, k1, k2 = w.shape
    kpad = jnp.zeros((Cout, Cin, H, W), jnp.float32).at[:, :, :k1, :k2].set(w)
    kpad = jnp.roll(kpad, shift=(-(k1 // 2), -(k2 // 2)), axis=(-2, -1))
    w_ft = jnp.fft.rfft2(kpad)                             # unnormalized
    Wf = W // 2 + 1
    w_ft = jnp.transpose(w_ft, (1, 0, 2, 3)).reshape(Cin, Cout, H * Wf)
    return jnp.real(w_ft).astype(jnp.float32), jnp.imag(w_ft).astype(jnp.float32)


def adaptive_pool_matrix(in_size, out_size):
    """Row-stochastic matrix reproducing nn.AdaptiveAvgPool1d windows."""
    P = np.zeros((out_size, in_size), np.float32)
    for i in range(out_size):
        s = (i * in_size) // out_size
        e = -((-(i + 1) * in_size) // out_size)  # ceil
        P[i, s:e] = 1.0 / (e - s)
    return P


def make_pool_mt(in_h, in_w, out_h, out_w):
    Ph = adaptive_pool_matrix(in_h, out_h)
    Pw = adaptive_pool_matrix(in_w, out_w)
    M = np.einsum("ph,qw->pqhw", Ph, Pw).reshape(out_h * out_w, in_h * in_w)
    return jnp.asarray(M.T)                    # (in_h*in_w, out_h*out_w)


def prepare_params(raw, im_shape=(28, 28), stride=2, pool_out=(4, 4)):
    H1, W1 = im_shape
    H2, W2 = H1 // stride, W1 // stride        # layer-2 input spatial
    H3, W3 = H2 // stride, W2 // stride        # layer-2 output spatial
    Cout = raw["w2"].shape[0]

    w1r, w1i = kernel_rfft_planes(raw["w1"], H1, W1)
    w2r, w2i = kernel_rfft_planes(raw["w2"], H2, W2)

    # AdaptiveAvgPool2d(pool_out) folded into fc1's weight:
    #   W_eff[c*H3*W3 + hw, j] = sum_p pool_mt[hw, p] * fc1_w[c*16 + p, j]
    pool_mt = make_pool_mt(H3, W3, pool_out[0], pool_out[1])          # (H3*W3, 16)
    fc1_w_r = raw["fc1_w"].reshape(Cout, pool_out[0] * pool_out[1], -1)
    w_eff = jnp.einsum("hp,cpj->chj", pool_mt, fc1_w_r)
    w_eff = w_eff.reshape(Cout * H3 * W3, -1)

    return {
        "w1_ft_r": w1r, "w1_ft_i": w1i,
        "w2_ft_r": w2r, "w2_ft_i": w2i,
        "b1": raw["b1"],
        "b2_flat": jnp.repeat(raw["b2"], H3 * W3)[None, :],           # (1, Cout*H3*W3)
        "head_w1": w_eff.astype(jnp.bfloat16),                        # (Cout*H3*W3, 128)
        "fc1_b": raw["fc1_b"],
        "head_w2": raw["fc2_w"].astype(jnp.bfloat16),                 # (128, 10)
        "fc2_b": raw["fc2_b"],
    }


# ----------------------------------------------------------------------------
# Full SpectralCNN forward
# ----------------------------------------------------------------------------
def spectral_cnn_forward(x, params, mean=0.0, std=1.0, stride=2):
    x = (x - mean) / std

    # spectral block 1: conv (Pallas mix) + bias + ReLU (bias/ReLU XLA-fused)
    y = spectral_conv_rfft(x, params["w1_ft_r"], params["w1_ft_i"], stride)
    y = jnp.maximum(y + params["b1"][None, :, None, None], 0.0)

    # spectral block 2: conv (Pallas mix); bias + ReLU fused into the head
    y = spectral_conv_rfft(y, params["w2_ft_r"], params["w2_ft_i"], stride)
    B, C, Hc, Wc = y.shape
    y_flat = y.reshape(B, C * Hc * Wc)

    # fused head: bias2 + ReLU + avgpool(->fc1 weight) + fc1 + ReLU + fc2
    return head_pallas(y_flat, params["b2_flat"], params["head_w1"],
                       params["fc1_b"], params["head_w2"], params["fc2_b"])


if __name__ == "__main__":
    key = jax.random.PRNGKey(0)
    keys = jax.random.split(key, 8)

    B = 2
    mid_channels, out_channels = 32, 64
    ksize = 5

    x = jax.random.normal(keys[0], (B, 1, 28, 28), jnp.float32)

    raw = {
        "w1": jax.random.normal(keys[1], (mid_channels, 1, ksize, ksize),
                                jnp.float32) * 0.2,
        "b1": jax.random.normal(keys[2], (mid_channels,), jnp.float32) * 0.1,
        "w2": jax.random.normal(keys[3], (out_channels, mid_channels,
                                          ksize, ksize), jnp.float32) * 0.05,
        "b2": jax.random.normal(keys[4], (out_channels,), jnp.float32) * 0.1,
        "fc1_w": jax.random.normal(keys[5], (4 * 4 * out_channels, 128),
                                   jnp.float32) * 0.03,
        "fc1_b": jnp.zeros((1, 128), jnp.float32),
        "fc2_w": jax.random.normal(keys[6], (128, 10), jnp.float32) * 0.09,
        "fc2_b": jnp.zeros((1, 10), jnp.float32),
    }

    # parameter-only precompute (kernel FFTs, pool-folded fc1, expanded bias)
    params = prepare_params(raw)

    fwd = jax.jit(spectral_cnn_forward)
    y = fwd(x, params)
    y = jax.block_until_ready(y)
    assert y.shape == (B, 10) and y.dtype == jnp.float32
    print("KERNEL_OK")
</pallas_src>

<mosaic_0001>
module attributes {stable_mosaic.version = 11 : i64} {
  func.func @spectral_mix_kernel(%arg0: i32, %arg1: memref<1x1x1x420xf32, #tpu.memory_space<vmem>>, %arg2: memref<1x1x1x420xf32, #tpu.memory_space<vmem>>, %arg3: memref<1x32x420xf32, #tpu.memory_space<vmem>>, %arg4: memref<1x32x420xf32, #tpu.memory_space<vmem>>, %arg5: memref<1x32x420xf32, #tpu.memory_space<vmem>>, %arg6: memref<1x32x420xf32, #tpu.memory_space<vmem>>) attributes {dimension_semantics = [#tpu.dimension_semantics<parallel>], iteration_bounds = array<i64: 2>, scalar_prefetch = 0 : i64, scratch_operands = 0 : i64, tpu.core_type = #tpu.core_type<tc>, window_params = [{transform_indices = @transform_0, window_bounds = array<i64: 1, 1, 1, 420>}, {transform_indices = @transform_1, window_bounds = array<i64: 1, 1, 1, 420>}, {pipeline_mode = #tpu.pipeline_mode<synchronous>, transform_indices = @transform_2, window_bounds = array<i64: 1, 32, 420>}, {pipeline_mode = #tpu.pipeline_mode<synchronous>, transform_indices = @transform_3, window_bounds = array<i64: 1, 32, 420>}, {transform_indices = @transform_4, window_bounds = array<i64: 1, 32, 420>}, {transform_indices = @transform_5, window_bounds = array<i64: 1, 32, 420>}]} {
    %cst = arith.constant 0.000000e+00 : f32
    %0 = vector.broadcast %cst : f32 to vector<32x420xf32>
    %c0_i32 = arith.constant 0 : i32
    %c0 = arith.constant 0 : index
    %1 = arith.index_cast %c0_i32 : i32 to index
    %c0_0 = arith.constant 0 : index
    %c0_1 = arith.constant 0 : index
    %2 = vector.load %arg1[%c0, %1, %c0_0, %c0_1] : memref<1x1x1x420xf32, #tpu.memory_space<vmem>>, vector<1x1x1x420xf32>
    %3 = vector.shape_cast %2 : vector<1x1x1x420xf32> to vector<1x420xf32>
    %c0_2 = arith.constant 0 : index
    %4 = arith.index_cast %c0_i32 : i32 to index
    %c0_3 = arith.constant 0 : index
    %c0_4 = arith.constant 0 : index
    %5 = vector.load %arg2[%c0_2, %4, %c0_3, %c0_4] : memref<1x1x1x420xf32, #tpu.memory_space<vmem>>, vector<1x1x1x420xf32>
    %6 = vector.shape_cast %5 : vector<1x1x1x420xf32> to vector<1x420xf32>
    %7 = arith.index_cast %c0_i32 : i32 to index
    %c0_5 = arith.constant 0 : index
    %c0_6 = arith.constant 0 : index
    %8 = vector.load %arg3[%7, %c0_5, %c0_6] : memref<1x32x420xf32, #tpu.memory_space<vmem>>, vector<1x32x420xf32>
    %9 = vector.shape_cast %8 : vector<1x32x420xf32> to vector<32x420xf32>
    %10 = arith.index_cast %c0_i32 : i32 to index
    %c0_7 = arith.constant 0 : index
    %c0_8 = arith.constant 0 : index
    %11 = vector.load %arg4[%10, %c0_7, %c0_8] : memref<1x32x420xf32, #tpu.memory_space<vmem>>, vector<1x32x420xf32>
    %12 = vector.shape_cast %11 : vector<1x32x420xf32> to vector<32x420xf32>
    %13 = vector.broadcast %3 : vector<1x420xf32> to vector<32x420xf32>
    %14 = arith.mulf %13, %9 : vector<32x420xf32>
    %15 = arith.addf %0, %14 : vector<32x420xf32>
    %16 = vector.broadcast %6 : vector<1x420xf32> to vector<32x420xf32>
    %17 = arith.mulf %16, %12 : vector<32x420xf32>
    %18 = arith.subf %15, %17 : vector<32x420xf32>
    %19 = vector.broadcast %3 : vector<1x420xf32> to vector<32x420xf32>
    %20 = arith.mulf %19, %12 : vector<32x420xf32>
    %21 = arith.addf %0, %20 : vector<32x420xf32>
    %22 = vector.broadcast %6 : vector<1x420xf32> to vector<32x420xf32>
    %23 = arith.mulf %22, %9 : vector<32x420xf32>
    %24 = arith.addf %21, %23 : vector<32x420xf32>
    %c1_i32 = arith.constant 1 : i32
    %c0_9 = arith.constant 0 : index
    %c0_10 = arith.constant 0 : index
    %c0_11 = arith.constant 0 : index
    %25 = vector.load %arg5[%c0_9, %c0_10, %c0_11] : memref<1x32x420xf32, #tpu.memory_space<vmem>>, vector<1x32x420xf32>
    %26 = vector.shape_cast %25 : vector<1x32x420xf32> to vector<32x420xf32>
    %27 = vector.shape_cast %18 : vector<32x420xf32> to vector<1x32x420xf32>
    tpu.vector_store %arg5[%c0_9, %c0_10, %c0_11], %27 {strides = array<i32>} : memref<1x32x420xf32, #tpu.memory_space<vmem>>, vector<1x32x420xf32>,
    %c0_12 = arith.constant 0 : index
    %c0_13 = arith.constant 0 : index
    %c0_14 = arith.constant 0 : index
    %28 = vector.load %arg6[%c0_12, %c0_13, %c0_14] : memref<1x32x420xf32, #tpu.memory_space<vmem>>, vector<1x32x420xf32>
    %29 = vector.shape_cast %28 : vector<1x32x420xf32> to vector<32x420xf32>
    %30 = vector.shape_cast %24 : vector<32x420xf32> to vector<1x32x420xf32>
    tpu.vector_store %arg6[%c0_12, %c0_13, %c0_14], %30 {strides = array<i32>} : memref<1x32x420xf32, #tpu.memory_space<vmem>>, vector<1x32x420xf32>,
    return
  }
  func.func @transform_0(%arg0: i32) -> (i32, i32, i32, i32) {
    %c0_i32 = arith.constant 0 : i32
    %c0_i32_0 = arith.constant 0 : i32
    %c0_i32_1 = arith.constant 0 : i32
    %c0_i32_2 = arith.constant 0 : i32
    return %arg0, %c0_i32, %c0_i32_0, %c0_i32_1 : i32, i32, i32, i32
  }
  func.func @transform_1(%arg0: i32) -> (i32, i32, i32, i32) {
    %c0_i32 = arith.constant 0 : i32
    %c0_i32_0 = arith.constant 0 : i32
    %c0_i32_1 = arith.constant 0 : i32
    %c0_i32_2 = arith.constant 0 : i32
    return %arg0, %c0_i32, %c0_i32_0, %c0_i32_1 : i32, i32, i32, i32
  }
  func.func @transform_2(%arg0: i32) -> (i32, i32, i32) {
    %c0_i32 = arith.constant 0 : i32
    %c0_i32_0 = arith.constant 0 : i32
    %c0_i32_1 = arith.constant 0 : i32
    %c0_i32_2 = arith.constant 0 : i32
    return %c0_i32, %c0_i32_0, %c0_i32_1 : i32, i32, i32
  }
  func.func @transform_3(%arg0: i32) -> (i32, i32, i32) {
    %c0_i32 = arith.constant 0 : i32
    %c0_i32_0 = arith.constant 0 : i32
    %c0_i32_1 = arith.constant 0 : i32
    %c0_i32_2 = arith.constant 0 : i32
    return %c0_i32, %c0_i32_0, %c0_i32_1 : i32, i32, i32
  }
  func.func @transform_4(%arg0: i32) -> (i32, i32, i32) {
    %c0_i32 = arith.constant 0 : i32
    %c0_i32_0 = arith.constant 0 : i32
    %c0_i32_1 = arith.constant 0 : i32
    return %arg0, %c0_i32, %c0_i32_0 : i32, i32, i32
  }
  func.func @transform_5(%arg0: i32) -> (i32, i32, i32) {
    %c0_i32 = arith.constant 0 : i32
    %c0_i32_0 = arith.constant 0 : i32
    %c0_i32_1 = arith.constant 0 : i32
    return %arg0, %c0_i32, %c0_i32_0 : i32, i32, i32
  }
}

module attributes {stable_mosaic.version = 11 : i64} {
  func.func @spectral_mix_kernel(%arg0: i32, %arg1: memref<1x32x1x112xf32, #tpu.memory_space<vmem>>, %arg2: memref<1x32x1x112xf32, #tpu.memory_space<vmem>>, %arg3: memref<32x64x112xf32, #tpu.memory_space<vmem>>, %arg4: memref<32x64x112xf32, #tpu.memory_space<vmem>>, %arg5: memref<1x64x112xf32, #tpu.memory_space<vmem>>, %arg6: memref<1x64x112xf32, #tpu.memory_space<vmem>>) attributes {dimension_semantics = [#tpu.dimension_semantics<parallel>], iteration_bounds = array<i64: 2>, scalar_prefetch = 0 : i64, scratch_operands = 0 : i64, tpu.core_type = #tpu.core_type<tc>, window_params = [{transform_indices = @transform_0, window_bounds = array<i64: 1, 32, 1, 112>}, {transform_indices = @transform_1, window_bounds = array<i64: 1, 32, 1, 112>}, {pipeline_mode = #tpu.pipeline_mode<synchronous>, transform_indices = @transform_2, window_bounds = array<i64: 32, 64, 112>}, {pipeline_mode = #tpu.pipeline_mode<synchronous>, transform_indices = @transform_3, window_bounds = array<i64: 32, 64, 112>}, {transform_indices = @transform_4, window_bounds = array<i64: 1, 64, 112>}, {transform_indices = @transform_5, window_bounds = array<i64: 1, 64, 112>}]} {
    %cst = arith.constant 0.000000e+00 : f32
    %0 = vector.broadcast %cst : f32 to vector<64x112xf32>
    %c0_i32 = arith.constant 0 : i32
    %c32_i32 = arith.constant 32 : i32
    %1 = arith.addi %c0_i32, %c32_i32 : i32
    %c1_i32 = arith.constant 1 : i32
    %2:2 = scf.for %arg7 = %c0_i32 to %1 step %c1_i32 iter_args(%arg8 = %0, %arg9 = %0) -> (vector<64x112xf32>, vector<64x112xf32>)  : i32 {
      %c0_6 = arith.constant 0 : index
      %9 = arith.index_cast %arg7 : i32 to index
      %c0_7 = arith.constant 0 : index
      %c0_8 = arith.constant 0 : index
      %10 = vector.load %arg1[%c0_6, %9, %c0_7, %c0_8] : memref<1x32x1x112xf32, #tpu.memory_space<vmem>>, vector<1x1x1x112xf32>
      %11 = vector.shape_cast %10 : vector<1x1x1x112xf32> to vector<1x112xf32>
      %c0_9 = arith.constant 0 : index
      %12 = arith.index_cast %arg7 : i32 to index
      %c0_10 = arith.constant 0 : index
      %c0_11 = arith.constant 0 : index
      %13 = vector.load %arg2[%c0_9, %12, %c0_10, %c0_11] : memref<1x32x1x112xf32, #tpu.memory_space<vmem>>, vector<1x1x1x112xf32>
      %14 = vector.shape_cast %13 : vector<1x1x1x112xf32> to vector<1x112xf32>
      %15 = arith.index_cast %arg7 : i32 to index
      %c0_12 = arith.constant 0 : index
      %c0_13 = arith.constant 0 : index
      %16 = vector.load %arg3[%15, %c0_12, %c0_13] : memref<32x64x112xf32, #tpu.memory_space<vmem>>, vector<1x64x112xf32>
      %17 = vector.shape_cast %16 : vector<1x64x112xf32> to vector<64x112xf32>
      %18 = arith.index_cast %arg7 : i32 to index
      %c0_14 = arith.constant 0 : index
      %c0_15 = arith.constant 0 : index
      %19 = vector.load %arg4[%18, %c0_14, %c0_15] : memref<32x64x112xf32, #tpu.memory_space<vmem>>, vector<1x64x112xf32>
      %20 = vector.shape_cast %19 : vector<1x64x112xf32> to vector<64x112xf32>
      %21 = vector.broadcast %11 : vector<1x112xf32> to vector<64x112xf32>
      %22 = arith.mulf %21, %17 : vector<64x112xf32>
      %23 = arith.addf %arg8, %22 : vector<64x112xf32>
      %24 = vector.broadcast %14 : vector<1x112xf32> to vector<64x112xf32>
      %25 = arith.mulf %24, %20 : vector<64x112xf32>
      %26 = arith.subf %23, %25 : vector<64x112xf32>
      %27 = vector.broadcast %11 : vector<1x112xf32> to vector<64x112xf32>
      %28 = arith.mulf %27, %20 : vector<64x112xf32>
      %29 = arith.addf %arg9, %28 : vector<64x112xf32>
      %30 = vector.broadcast %14 : vector<1x112xf32> to vector<64x112xf32>
      %31 = arith.mulf %30, %17 : vector<64x112xf32>
      %32 = arith.addf %29, %31 : vector<64x112xf32>
      scf.yield %26, %32 : vector<64x112xf32>, vector<64x112xf32>
    }
    %c32_i32_0 = arith.constant 32 : i32
    %c0 = arith.constant 0 : index
    %c0_1 = arith.constant 0 : index
    %c0_2 = arith.constant 0 : index
    %3 = vector.load %arg5[%c0, %c0_1, %c0_2] : memref<1x64x112xf32, #tpu.memory_space<vmem>>, vector<1x64x112xf32>
    %4 = vector.shape_cast %3 : vector<1x64x112xf32> to vector<64x112xf32>
    %5 = vector.shape_cast %2#0 : vector<64x112xf32> to vector<1x64x112xf32>
    tpu.vector_store %arg5[%c0, %c0_1, %c0_2], %5 {strides = array<i32>} : memref<1x64x112xf32, #tpu.memory_space<vmem>>, vector<1x64x112xf32>,
    %c0_3 = arith.constant 0 : index
    %c0_4 = arith.constant 0 : index
    %c0_5 = arith.constant 0 : index
    %6 = vector.load %arg6[%c0_3, %c0_4, %c0_5] : memref<1x64x112xf32, #tpu.memory_space<vmem>>, vector<1x64x112xf32>
    %7 = vector.shape_cast %6 : vector<1x64x112xf32> to vector<64x112xf32>
    %8 = vector.shape_cast %2#1 : vector<64x112xf32> to vector<1x64x112xf32>
    tpu.vector_store %arg6[%c0_3, %c0_4, %c0_5], %8 {strides = array<i32>} : memref<1x64x112xf32, #tpu.memory_space<vmem>>, vector<1x64x112xf32>,
    return
  }
  func.func @transform_0(%arg0: i32) -> (i32, i32, i32, i32) {
    %c0_i32 = arith.constant 0 : i32
    %c0_i32_0 = arith.constant 0 : i32
    %c0_i32_1 = arith.constant 0 : i32
    %c0_i32_2 = arith.constant 0 : i32
    return %arg0, %c0_i32, %c0_i32_0, %c0_i32_1 : i32, i32, i32, i32
  }
  func.func @transform_1(%arg0: i32) -> (i32, i32, i32, i32) {
    %c0_i32 = arith.constant 0 : i32
    %c0_i32_0 = arith.constant 0 : i32
    %c0_i32_1 = arith.constant 0 : i32
    %c0_i32_2 = arith.constant 0 : i32
    return %arg0, %c0_i32, %c0_i32_0, %c0_i32_1 : i32, i32, i32, i32
  }
  func.func @transform_2(%arg0: i32) -> (i32, i32, i32) {
    %c0_i32 = arith.constant 0 : i32
    %c0_i32_0 = arith.constant 0 : i32
    %c0_i32_1 = arith.constant 0 : i32
    %c0_i32_2 = arith.constant 0 : i32
    return %c0_i32, %c0_i32_0, %c0_i32_1 : i32, i32, i32
  }
  func.func @transform_3(%arg0: i32) -> (i32, i32, i32) {
    %c0_i32 = arith.constant 0 : i32
    %c0_i32_0 = arith.constant 0 : i32
    %c0_i32_1 = arith.constant 0 : i32
    %c0_i32_2 = arith.constant 0 : i32
    return %c0_i32, %c0_i32_0, %c0_i32_1 : i32, i32, i32
  }
  func.func @transform_4(%arg0: i32) -> (i32, i32, i32) {
    %c0_i32 = arith.constant 0 : i32
    %c0_i32_0 = arith.constant 0 : i32
    %c0_i32_1 = arith.constant 0 : i32
    return %arg0, %c0_i32, %c0_i32_0 : i32, i32, i32
  }
  func.func @transform_5(%arg0: i32) -> (i32, i32, i32) {
    %c0_i32 = arith.constant 0 : i32
    %c0_i32_0 = arith.constant 0 : i32
    %c0_i32_1 = arith.constant 0 : i32
    return %arg0, %c0_i32, %c0_i32_0 : i32, i32, i32
  }
}

module attributes {stable_mosaic.version = 11 : i64} {
  func.func @head_kernel(%arg0: i32, %arg1: memref<2x3136xf32, #tpu.memory_space<vmem>>, %arg2: memref<1x3136xf32, #tpu.memory_space<vmem>>, %arg3: memref<3136x128xbf16, #tpu.memory_space<vmem>>, %arg4: memref<1x128xf32, #tpu.memory_space<vmem>>, %arg5: memref<128x10xbf16, #tpu.memory_space<vmem>>, %arg6: memref<1x10xf32, #tpu.memory_space<vmem>>, %arg7: memref<2x10xf32, #tpu.memory_space<vmem>>) attributes {dimension_semantics = [#tpu.dimension_semantics<arbitrary>], iteration_bounds = array<i64: 1>, scalar_prefetch = 0 : i64, scratch_operands = 0 : i64, tpu.core_type = #tpu.core_type<tc>, window_params = [{pipeline_mode = #tpu.pipeline_mode<synchronous>, transform_indices = @transform_0, window_bounds = array<i64: 2, 3136>}, {pipeline_mode = #tpu.pipeline_mode<synchronous>, transform_indices = @transform_1, window_bounds = array<i64: 1, 3136>}, {pipeline_mode = #tpu.pipeline_mode<synchronous>, transform_indices = @transform_2, window_bounds = array<i64: 3136, 128>}, {pipeline_mode = #tpu.pipeline_mode<synchronous>, transform_indices = @transform_3, window_bounds = array<i64: 1, 128>}, {pipeline_mode = #tpu.pipeline_mode<synchronous>, transform_indices = @transform_4, window_bounds = array<i64: 128, 10>}, {pipeline_mode = #tpu.pipeline_mode<synchronous>, transform_indices = @transform_5, window_bounds = array<i64: 1, 10>}, {pipeline_mode = #tpu.pipeline_mode<synchronous>, transform_indices = @transform_6, window_bounds = array<i64: 2, 10>}]} {
    %c0 = arith.constant 0 : index
    %c0_0 = arith.constant 0 : index
    %0 = vector.load %arg1[%c0, %c0_0] : memref<2x3136xf32, #tpu.memory_space<vmem>>, vector<2x3136xf32>
    %c0_1 = arith.constant 0 : index
    %c0_2 = arith.constant 0 : index
    %1 = vector.load %arg2[%c0_1, %c0_2] : memref<1x3136xf32, #tpu.memory_space<vmem>>, vector<1x3136xf32>
    %2 = vector.broadcast %1 : vector<1x3136xf32> to vector<2x3136xf32>
    %3 = arith.addf %0, %2 : vector<2x3136xf32>
    %cst = arith.constant 0.000000e+00 : f32
    %4 = vector.broadcast %cst : f32 to vector<2x3136xf32>
    %5 = arith.maximumf %3, %4 : vector<2x3136xf32>
    %6 = arith.truncf %5 : vector<2x3136xf32> to vector<2x3136xbf16>
    %c0_3 = arith.constant 0 : index
    %c0_4 = arith.constant 0 : index
    %7 = vector.load %arg3[%c0_3, %c0_4] : memref<3136x128xbf16, #tpu.memory_space<vmem>>, vector<3136x128xbf16>
    %cst_5 = arith.constant dense<0.000000e+00> : vector<2x128xf32>
    %8 = tpu.matmul %6, %7, %cst_5 {dimension_numbers = #tpu.dot_dimension_numbers<[1], [0], [0], [1], [0, 0, 1, 1], [], []>} : vector<2x3136xbf16>, vector<3136x128xbf16>, vector<2x128xf32> -> vector<2x128xf32>
    %c0_6 = arith.constant 0 : index
    %c0_7 = arith.constant 0 : index
    %9 = vector.load %arg4[%c0_6, %c0_7] : memref<1x128xf32, #tpu.memory_space<vmem>>, vector<1x128xf32>
    %10 = vector.broadcast %9 : vector<1x128xf32> to vector<2x128xf32>
    %11 = arith.addf %8, %10 : vector<2x128xf32>
    %cst_8 = arith.constant 0.000000e+00 : f32
    %12 = vector.broadcast %cst_8 : f32 to vector<2x128xf32>
    %13 = arith.maximumf %11, %12 : vector<2x128xf32>
    %14 = arith.truncf %13 : vector<2x128xf32> to vector<2x128xbf16>
    %c0_9 = arith.constant 0 : index
    %c0_10 = arith.constant 0 : index
    %15 = vector.load %arg5[%c0_9, %c0_10] : memref<128x10xbf16, #tpu.memory_space<vmem>>, vector<128x10xbf16>
    %cst_11 = arith.constant dense<0.000000e+00> : vector<2x10xf32>
    %16 = tpu.matmul %14, %15, %cst_11 {dimension_numbers = #tpu.dot_dimension_numbers<[1], [0], [0], [1], [0, 0, 1, 1], [], []>} : vector<2x128xbf16>, vector<128x10xbf16>, vector<2x10xf32> -> vector<2x10xf32>
    %c0_12 = arith.constant 0 : index
    %c0_13 = arith.constant 0 : index
    %17 = vector.load %arg6[%c0_12, %c0_13] : memref<1x10xf32, #tpu.memory_space<vmem>>, vector<1x10xf32>
    %18 = vector.broadcast %17 : vector<1x10xf32> to vector<2x10xf32>
    %19 = arith.addf %16, %18 : vector<2x10xf32>
    %c0_14 = arith.constant 0 : index
    %c0_15 = arith.constant 0 : index
    %20 = vector.load %arg7[%c0_14, %c0_15] : memref<2x10xf32, #tpu.memory_space<vmem>>, vector<2x10xf32>
    tpu.vector_store %arg7[%c0_14, %c0_15], %19 {strides = array<i32>} : memref<2x10xf32, #tpu.memory_space<vmem>>, vector<2x10xf32>,
    return
  }
  func.func @transform_0(%arg0: i32) -> (i32, i32) {
    %c0_i32 = arith.constant 0 : i32
    %c0_i32_0 = arith.constant 0 : i32
    %c0_i32_1 = arith.constant 0 : i32
    return %c0_i32, %c0_i32_0 : i32, i32
  }
  func.func @transform_1(%arg0: i32) -> (i32, i32) {
    %c0_i32 = arith.constant 0 : i32
    %c0_i32_0 = arith.constant 0 : i32
    %c0_i32_1 = arith.constant 0 : i32
    return %c0_i32, %c0_i32_0 : i32, i32
  }
  func.func @transform_2(%arg0: i32) -> (i32, i32) {
    %c0_i32 = arith.constant 0 : i32
    %c0_i32_0 = arith.constant 0 : i32
    %c0_i32_1 = arith.constant 0 : i32
    return %c0_i32, %c0_i32_0 : i32, i32
  }
  func.func @transform_3(%arg0: i32) -> (i32, i32) {
    %c0_i32 = arith.constant 0 : i32
    %c0_i32_0 = arith.constant 0 : i32
    %c0_i32_1 = arith.constant 0 : i32
    return %c0_i32, %c0_i32_0 : i32, i32
  }
  func.func @transform_4(%arg0: i32) -> (i32, i32) {
    %c0_i32 = arith.constant 0 : i32
    %c0_i32_0 = arith.constant 0 : i32
    %c0_i32_1 = arith.constant 0 : i32
    return %c0_i32, %c0_i32_0 : i32, i32
  }
  func.func @transform_5(%arg0: i32) -> (i32, i32) {
    %c0_i32 = arith.constant 0 : i32
    %c0_i32_0 = arith.constant 0 : i32
    %c0_i32_1 = arith.constant 0 : i32
    return %c0_i32, %c0_i32_0 : i32, i32
  }
  func.func @transform_6(%arg0: i32) -> (i32, i32) {
    %c0_i32 = arith.constant 0 : i32
    %c0_i32_0 = arith.constant 0 : i32
    %c0_i32_1 = arith.constant 0 : i32
    return %c0_i32, %c0_i32_0 : i32, i32
  }
}

</mosaic_0001>

<bundles_post_ra>
// kernel: reverse.2
= control target key start
LH: loop header
LB: loop body
LE: loop exit
PB: predicated region body
PF: predicated region fallthrough
CT: control target
= control target key end

     0   :  { %s3655_s0 = inlined_call_operand.vmem [shape: f32[2,32,27,13], index: 0, kind: input, shape index: {}]   ;;  %s3656_s1 = inlined_call_operand.vmem [shape: f32[2,32,27,13], index: 1, kind: output, shape index: {}]  }
   0x1   :  { %v236_v0 = vld [vmem:[%s3655_s0] sm:$0xff]  ;;  %v238_v1 = vld [vmem:[%s3655_s0 + $0x8] sm:$0xff]  ;;  %v240_v2 = vld [vmem:[%s3655_s0 + $0x10] sm:$0xff] }
   0x2   :  { %237 = vst [vmem:[#allocation0 + $0x8] sm:$0xff] %v236_v0  ;;  %239 = vst [vmem:[#allocation0 + $0x10] sm:$0xff] %v238_v1  ;;  %v242_v3 = vld [vmem:[%s3655_s0 + $0x18] sm:$0xff]  ;;  %v244_v4 = vld [vmem:[%s3655_s0 + $0x20] sm:$0xff] }
   0x3   :  { %241 = vst [vmem:[#allocation0 + $0x18] sm:$0xff] %v240_v2  ;;  %v246_v5 = vld [vmem:[%s3655_s0 + $0x28] sm:$0xff]  ;;  %243 = vst [vmem:[#allocation0 + $0x20] sm:$0xff] %v242_v3  ;;  %v248_v6 = vld [vmem:[%s3655_s0 + $0x30] sm:$0xff] }
   0x4   :  { %245 = vst [vmem:[#allocation0 + $0x30] sm:$0xff] %v244_v4  ;;  %247 = vst [vmem:[#allocation0 + $0x38] sm:$0xff] %v246_v5  ;;  %v250_v7 = vld [vmem:[%s3655_s0 + $0x38] sm:$0xff]  ;;  %v252_v8 = vld [vmem:[%s3655_s0 + $0x40] sm:$0xff] }
   0x5   :  { %249 = vst [vmem:[#allocation0 + $0x40] sm:$0xff] %v248_v6  ;;  %251 = vst [vmem:[#allocation0 + $0x48] sm:$0xff] %v250_v7  ;;  %v254_v9 = vld [vmem:[%s3655_s0 + $0x48] sm:$0xff]  ;;  %v256_v10 = vld [vmem:[%s3655_s0 + $0x50] sm:$0xff] }
   0x6   :  { %253 = vst [vmem:[#allocation0 + $0x58] sm:$0xff] %v252_v8  ;;  %v258_v11 = vld [vmem:[%s3655_s0 + $0x58] sm:$0xff]  ;;  %255 = vst [vmem:[#allocation0 + $0x60] sm:$0xff] %v254_v9  ;;  %v260_v12 = vld [vmem:[%s3655_s0 + $0x60] sm:$0xff] }
   0x7   :  { %257 = vst [vmem:[#allocation0 + $0x68] sm:$0xff] %v256_v10  ;;  %259 = vst [vmem:[#allocation0 + $0x70] sm:$0xff] %v258_v11  ;;  %v262_v13 = vld [vmem:[%s3655_s0 + $0x68] sm:$0xff]  ;;  %v264_v14 = vld [vmem:[%s3655_s0 + $0x70] sm:$0xff] }
   0x8   :  { %261 = vst [vmem:[#allocation0 + $0x80] sm:$0xff] %v260_v12  ;;  %263 = vst [vmem:[#allocation0 + $0x88] sm:$0xff] %v262_v13  ;;  %v266_v15 = vld [vmem:[%s3655_s0 + $0x78] sm:$0xff]  ;;  %v268_v16 = vld [vmem:[%s3655_s0 + $0x80] sm:$0xff] }
   0x9   :  { %265 = vst [vmem:[#allocation0 + $0x90] sm:$0xff] %v264_v14  ;;  %v270_v17 = vld [vmem:[%s3655_s0 + $0x88] sm:$0xff]  ;;  %267 = vst [vmem:[#allocation0 + $0x98] sm:$0xff] %v266_v15  ;;  %v272_v18 = vld [vmem:[%s3655_s0 + $0x90] sm:$0xff] }
   0xa   :  { %269 = vst [vmem:[#allocation0 + $0xa8] sm:$0xff] %v268_v16  ;;  %271 = vst [vmem:[#allocation0 + $0xb0] sm:$0xff] %v270_v17  ;;  %v274_v19 = vld [vmem:[%s3655_s0 + $0x98] sm:$0xff]  ;;  %v276_v20 = vld [vmem:[%s3655_s0 + $0xa0] sm:$0xff] }
   0xb   :  { %273 = vst [vmem:[#allocation0 + $0xb8] sm:$0xff] %v272_v18  ;;  %275 = vst [vmem:[#allocation0 + $0xc0] sm:$0xff] %v274_v19  ;;  %v278_v21 = vld [vmem:[%s3655_s0 + $0xa8] sm:$0xff]  ;;  %v280_v22 = vld [vmem:[%s3655_s0 + $0xb0] sm:$0xff] }
   0xc   :  { %277 = vst [vmem:[#allocation0 + $0xd0] sm:$0xff] %v276_v20  ;;  %v282_v23 = vld [vmem:[%s3655_s0 + $0xb8] sm:$0xff]  ;;  %279 = vst [vmem:[#allocation0 + $0xd8] sm:$0xff] %v278_v21  ;;  %v284_v24 = vld [vmem:[%s3655_s0 + $0xc0] sm:$0xff]  ;;  %v457_v20 = vlaneseq }
   0xd   :  { %281 = vst [vmem:[#allocation0 + $0xe0] sm:$0xff] %v280_v22  ;;  %283 = vst [vmem:[#allocation0 + $0xe8] sm:$0xff] %v282_v23  ;;  %v286_v25 = vld [vmem:[%s3655_s0 + $0xc8] sm:$0xff]  ;;  %v288_v26 = vld [vmem:[%s3655_s0 + $0xd0] sm:$0xff] }
   0xe   :  { %285 = vst [vmem:[#allocation0 + $0xf8] sm:$0xff] %v284_v24  ;;  %287 = vst [vmem:[#allocation0 + $0x100] sm:$0xff] %v286_v25  ;;  %v290_v27 = vld [vmem:[%s3655_s0 + $0xd8] sm:$0xff]  ;;  %v292_v28 = vld [vmem:[%s3655_s0 + $0xe0] sm:$0xff] }
   0xf   :  { %289 = vst [vmem:[#allocation0 + $0x108] sm:$0xff] %v288_v26  ;;  %v294_v29 = vld [vmem:[%s3655_s0 + $0xe8] sm:$0xff]  ;;  %291 = vst [vmem:[#allocation0 + $0x110] sm:$0xff] %v290_v27  ;;  %v296_v30 = vld [vmem:[%s3655_s0 + $0xf0] sm:$0xff] }
  0x10   :  { %293 = vst [vmem:[#allocation0 + $0x120] sm:$0xff] %v292_v28  ;;  %295 = vst [vmem:[#allocation0 + $0x128] sm:$0xff] %v294_v29  ;;  %v298_v31 = vld [vmem:[%s3655_s0 + $0xf8] sm:$0xff]  ;;  %v300_v32 = vld [vmem:[%s3655_s0 + $0x100] sm:$0xff] }
  0x11   :  { %297 = vst [vmem:[#allocation0 + $0x130] sm:$0xff] %v296_v30  ;;  %299 = vst [vmem:[#allocation0 + $0x138] sm:$0xff] %v298_v31  ;;  %v302_v33 = vld [vmem:[%s3655_s0 + $0x108] sm:$0xff]  ;;  %v304_v34 = vld [vmem:[%s3655_s0 + $0x110] sm:$0xff] }
  0x12   :  { %301 = vst [vmem:[#allocation0 + $0x148] sm:$0xff] %v300_v32  ;;  %v306_v35 = vld [vmem:[%s3655_s0 + $0x118] sm:$0xff]  ;;  %303 = vst [vmem:[#allocation0 + $0x150] sm:$0xff] %v302_v33  ;;  %v308_v36 = vld [vmem:[%s3655_s0 + $0x120] sm:$0xff]  ;;  %v3108_v33 = vshrl.u32 %v457_v20, 7 }
  0x13   :  { %305 = vst [vmem:[#allocation0 + $0x158] sm:$0xff] %v304_v34  ;;  %307 = vst [vmem:[#allocation0 + $0x160] sm:$0xff] %v306_v35  ;;  %v310_v37 = vld [vmem:[%s3655_s0 + $0x128] sm:$0xff]  ;;  %v312_v38 = vld [vmem:[%s3655_s0 + $0x130] sm:$0xff] }
  0x14   :  { %309 = vst [vmem:[#allocation0 + $0x170] sm:$0xff] %v308_v36  ;;  %311 = vst [vmem:[#allocation0 + $0x178] sm:$0xff] %v310_v37  ;;  %v314_v39 = vld [vmem:[%s3655_s0 + $0x138] sm:$0xff]  ;;  %v316_v40 = vld [vmem:[%s3655_s0 + $0x140] sm:$0xff]  ;;  %vm459_vm0 = vcmp.lt.s32.totalorder %v3108_v33, 3 }
  0x15   :  { %313 = vst [vmem:[#allocation0 + $0x180] sm:$0xff] %v312_v38  ;;  %v318_v41 = vld [vmem:[%s3655_s0 + $0x148] sm:$0xff]  ;;  %315 = vst [vmem:[#allocation0 + $0x188] sm:$0xff] %v314_v39  ;;  %v320_v42 = vld [vmem:[%s3655_s0 + $0x150] sm:$0xff] }
  0x16   :  { %317 = vst [vmem:[#allocation0 + $0x198] sm:$0xff] %v316_v40  ;;  %319 = vst [vmem:[#allocation0 + $0x1a0] sm:$0xff] %v318_v41  ;;  %v322_v43 = vld [vmem:[%s3655_s0 + $0x158] sm:$0xff]  ;;  %v324_v44 = vld [vmem:[%s3655_s0 + $0x160] sm:$0xff] }
  0x17   :  { %321 = vst [vmem:[#allocation0 + $0x1a8] sm:$0xff] %v320_v42  ;;  %323 = vst [vmem:[#allocation0 + $0x1b0] sm:$0xff] %v322_v43  ;;  %v326_v45 = vld [vmem:[%s3655_s0 + $0x168] sm:$0xff]  ;;  %v328_v46 = vld [vmem:[%s3655_s0 + $0x170] sm:$0xff] }
  0x18   :  { %325 = vst [vmem:[#allocation0 + $0x1c0] sm:$0xff] %v324_v44  ;;  %v330_v47 = vld [vmem:[%s3655_s0 + $0x178] sm:$0xff]  ;;  %327 = vst [vmem:[#allocation0 + $0x1c8] sm:$0xff] %v326_v45  ;;  %v332_v48 = vld [vmem:[%s3655_s0 + $0x180] sm:$0xff] }
  0x19   :  { %329 = vst [vmem:[#allocation0 + $0x1d0] sm:$0xff] %v328_v46  ;;  %331 = vst [vmem:[#allocation0 + $0x1d8] sm:$0xff] %v330_v47  ;;  %v334_v49 = vld [vmem:[%s3655_s0 + $0x188] sm:$0xff]  ;;  %v336_v50 = vld [vmem:[%s3655_s0 + $0x190] sm:$0xff] }
  0x1a   :  { %333 = vst [vmem:[#allocation0 + $0x1e8] sm:$0xff] %v332_v48  ;;  %335 = vst [vmem:[#allocation0 + $0x1f0] sm:$0xff] %v334_v49  ;;  %v338_v51 = vld [vmem:[%s3655_s0 + $0x198] sm:$0xff]  ;;  %v340_v52 = vld [vmem:[%s3655_s0 + $0x1a0] sm:$0xff] }
  0x1b   :  { %337 = vst [vmem:[#allocation0 + $0x1f8] sm:$0xff] %v336_v50  ;;  %v342_v53 = vld [vmem:[%s3655_s0 + $0x1a8] sm:$0xff]  ;;  %339 = vst [vmem:[#allocation0 + $0x200] sm:$0xff] %v338_v51  ;;  %v344_v54 = vld [vmem:[%s3655_s0 + $0x1b0] sm:$0xff] }
  0x1c   :  { %341 = vst [vmem:[#allocation0 + $0x210] sm:$0xff] %v340_v52  ;;  %343 = vst [vmem:[#allocation0 + $0x218] sm:$0xff] %v342_v53  ;;  %v346_v55 = vld [vmem:[%s3655_s0 + $0x1b8] sm:$0xff]  ;;  %v348_v56 = vld [vmem:[%s3655_s0 + $0x1c0] sm:$0xff] }
  0x1d   :  { %345 = vst [vmem:[#allocation0 + $0x220] sm:$0xff] %v344_v54  ;;  %347 = vst [vmem:[#allocation0 + $0x228] sm:$0xff] %v346_v55  ;;  %v350_v57 = vld [vmem:[%s3655_s0 + $0x1c8] sm:$0xff]  ;;  %v352_v58 = vld [vmem:[%s3655_s0 + $0x1d0] sm:$0xff] }
  0x1e   :  { %349 = vst [vmem:[#allocation0 + $0x238] sm:$0xff] %v348_v56  ;;  %v354_v59 = vld [vmem:[%s3655_s0 + $0x1d8] sm:$0xff]  ;;  %351 = vst [vmem:[#allocation0 + $0x240] sm:$0xff] %v350_v57  ;;  %v356_v60 = vld [vmem:[%s3655_s0 + $0x1e0] sm:$0xff] }
  0x1f   :  { %353 = vst [vmem:[#allocation0 + $0x248] sm:$0xff] %v352_v58  ;;  %355 = vst [vmem:[#allocation0 + $0x250] sm:$0xff] %v354_v59  ;;  %v358_v61 = vld [vmem:[%s3655_s0 + $0x1e8] sm:$0xff]  ;;  %v360_v62 = vld [vmem:[%s3655_s0 + $0x1f0] sm:$0xff] }
  0x20   :  { %357 = vst [vmem:[#allocation0 + $0x260] sm:$0xff] %v356_v60  ;;  %359 = vst [vmem:[#allocation0 + $0x268] sm:$0xff] %v358_v61  ;;  %v362_v63 = vld [vmem:[%s3655_s0 + $0x1f8] sm:$0xff]  ;;  %v364_v0 = vld [vmem:[%s3655_s0 + $0x200] sm:$0xff] }
  0x21   :  { %361 = vst [vmem:[#allocation0 + $0x270] sm:$0xff] %v360_v62  ;;  %v366_v1 = vld [vmem:[%s3655_s0 + $0x208] sm:$0xff]  ;;  %363 = vst [vmem:[#allocation0 + $0x278] sm:$0xff] %v362_v63  ;;  %v368_v2 = vld [vmem:[%s3655_s0 + $0x210] sm:$0xff] }
  0x22   :  { %365 = vst [vmem:[#allocation0 + $0x288] sm:$0xff] %v364_v0  ;;  %367 = vst [vmem:[#allocation0 + $0x290] sm:$0xff] %v366_v1  ;;  %v370_v3 = vld [vmem:[%s3655_s0 + $0x218] sm:$0xff]  ;;  %v372_v4 = vld [vmem:[%s3655_s0 + $0x220] sm:$0xff] }
  0x23   :  { %369 = vst [vmem:[#allocation0 + $0x298] sm:$0xff] %v368_v2  ;;  %371 = vst [vmem:[#allocation0 + $0x2a0] sm:$0xff] %v370_v3  ;;  %v374_v5 = vld [vmem:[%s3655_s0 + $0x228] sm:$0xff]  ;;  %v376_v6 = vld [vmem:[%s3655_s0 + $0x230] sm:$0xff] }
  0x24   :  { %373 = vst [vmem:[#allocation0 + $0x2b0] sm:$0xff] %v372_v4  ;;  %v378_v7 = vld [vmem:[%s3655_s0 + $0x238] sm:$0xff]  ;;  %375 = vst [vmem:[#allocation0 + $0x2b8] sm:$0xff] %v374_v5  ;;  %v380_v8 = vld [vmem:[%s3655_s0 + $0x240] sm:$0xff] }
  0x25   :  { %377 = vst [vmem:[#allocation0 + $0x2c0] sm:$0xff] %v376_v6  ;;  %379 = vst [vmem:[#allocation0 + $0x2c8] sm:$0xff] %v378_v7  ;;  %v382_v9 = vld [vmem:[%s3655_s0 + $0x248] sm:$0xff]  ;;  %v384_v10 = vld [vmem:[%s3655_s0 + $0x250] sm:$0xff] }
  0x26   :  { %381 = vst [vmem:[#allocation0 + $0x2d8] sm:$0xff] %v380_v8  ;;  %383 = vst [vmem:[#allocation0 + $0x2e0] sm:$0xff] %v382_v9  ;;  %v386_v11 = vld [vmem:[%s3655_s0 + $0x258] sm:$0xff]  ;;  %v388_v12 = vld [vmem:[%s3655_s0 + $0x260] sm:$0xff] }
  0x27   :  { %385 = vst [vmem:[#allocation0 + $0x2e8] sm:$0xff] %v384_v10  ;;  %v390_v13 = vld [vmem:[%s3655_s0 + $0x268] sm:$0xff]  ;;  %387 = vst [vmem:[#allocation0 + $0x2f0] sm:$0xff] %v386_v11  ;;  %v392_v14 = vld [vmem:[%s3655_s0 + $0x270] sm:$0xff] }
  0x28   :  { %389 = vst [vmem:[#allocation0 + $0x300] sm:$0xff] %v388_v12  ;;  %391 = vst [vmem:[#allocation0 + $0x308] sm:$0xff] %v390_v13  ;;  %v394_v15 = vld [vmem:[%s3655_s0 + $0x278] sm:$0xff]  ;;  %v396_v16 = vld [vmem:[%s3655_s0 + $0x280] sm:$0xff] }
  0x29   :  { %393 = vst [vmem:[#allocation0 + $0x310] sm:$0xff] %v392_v14  ;;  %395 = vst [vmem:[#allocation0 + $0x318] sm:$0xff] %v394_v15  ;;  %v398_v17 = vld [vmem:[%s3655_s0 + $0x288] sm:$0xff]  ;;  %v400_v18 = vld [vmem:[%s3655_s0 + $0x290] sm:$0xff] }
  0x2a   :  { %397 = vst [vmem:[#allocation0 + $0x328] sm:$0xff] %v396_v16  ;;  %v402_v19 = vld [vmem:[%s3655_s0 + $0x298] sm:$0xff]  ;;  %399 = vst [vmem:[#allocation0 + $0x330] sm:$0xff] %v398_v17  ;;  %v404_v21 = vld [vmem:[%s3655_s0 + $0x2a0] sm:$0xff] }
  0x2b   :  { %401 = vst [vmem:[#allocation0 + $0x338] sm:$0xff] %v400_v18  ;;  %403 = vst [vmem:[#allocation0 + $0x340] sm:$0xff] %v402_v19  ;;  %v406_v22 = vld [vmem:[%s3655_s0 + $0x2a8] sm:$0xff]  ;;  %v408_v23 = vld [vmem:[%s3655_s0 + $0x2b0] sm:$0xff] }
  0x2c   :  { %405 = vst [vmem:[#allocation0 + $0x350] sm:$0xff] %v404_v21  ;;  %407 = vst [vmem:[#allocation0 + $0x358] sm:$0xff] %v406_v22  ;;  %v410_v24 = vld [vmem:[%s3655_s0 + $0x2b8] sm:$0xff]  ;;  %v412_v25 = vld [vmem:[%s3655_s0 + $0x2c0] sm:$0xff] }
  0x2d   :  { %409 = vst [vmem:[#allocation0 + $0x360] sm:$0xff] %v408_v23  ;;  %v414_v26 = vld [vmem:[%s3655_s0 + $0x2c8] sm:$0xff]  ;;  %411 = vst [vmem:[#allocation0 + $0x368] sm:$0xff] %v410_v24  ;;  %v416_v27 = vld [vmem:[%s3655_s0 + $0x2d0] sm:$0xff] }
  0x2e   :  { %413 = vst [vmem:[#allocation0 + $0x378] sm:$0xff] %v412_v25  ;;  %415 = vst [vmem:[#allocation0 + $0x380] sm:$0xff] %v414_v26  ;;  %v418_v28 = vld [vmem:[%s3655_s0 + $0x2d8] sm:$0xff]  ;;  %v420_v29 = vld [vmem:[%s3655_s0 + $0x2e0] sm:$0xff] }
  0x2f   :  { %417 = vst [vmem:[#allocation0 + $0x388] sm:$0xff] %v416_v27  ;;  %419 = vst [vmem:[#allocation0 + $0x390] sm:$0xff] %v418_v28  ;;  %v422_v30 = vld [vmem:[%s3655_s0 + $0x2e8] sm:$0xff]  ;;  %v424_v31 = vld [vmem:[%s3655_s0 + $0x2f0] sm:$0xff] }
  0x30   :  { %421 = vst [vmem:[#allocation0 + $0x3a0] sm:$0xff] %v420_v29  ;;  %v426_v32 = vld [vmem:[%s3655_s0 + $0x2f8] sm:$0xff]  ;;  %423 = vst [vmem:[#allocation0 + $0x3a8] sm:$0xff] %v422_v30  ;;  %v428_v34 = vld [vmem:[%s3655_s0 + $0x300] sm:$0xff] }
  0x31   :  { %425 = vst [vmem:[#allocation0 + $0x3b0] sm:$0xff] %v424_v31  ;;  %427 = vst [vmem:[#allocation0 + $0x3b8] sm:$0xff] %v426_v32  ;;  %v430_v35 = vld [vmem:[%s3655_s0 + $0x308] sm:$0xff]  ;;  %v432_v36 = vld [vmem:[%s3655_s0 + $0x310] sm:$0xff] }
  0x32   :  { %429 = vst [vmem:[#allocation0 + $0x3c8] sm:$0xff] %v428_v34  ;;  %431 = vst [vmem:[#allocation0 + $0x3d0] sm:$0xff] %v430_v35  ;;  %v434_v37 = vld [vmem:[%s3655_s0 + $0x318] sm:$0xff]  ;;  %v436_v38 = vld [vmem:[%s3655_s0 + $0x320] sm:$0xff] }
  0x33   :  { %433 = vst [vmem:[#allocation0 + $0x3d8] sm:$0xff] %v432_v36  ;;  %v438_v39 = vld [vmem:[%s3655_s0 + $0x328] sm:$0xff]  ;;  %435 = vst [vmem:[#allocation0 + $0x3e0] sm:$0xff] %v434_v37  ;;  %v440_v40 = vld [vmem:[%s3655_s0 + $0x330] sm:$0xff] }
  0x34   :  { %437 = vst [vmem:[#allocation0 + $0x3f0] sm:$0xff] %v436_v38  ;;  %439 = vst [vmem:[#allocation0 + $0x3f8] sm:$0xff] %v438_v39  ;;  %v442_v41 = vld [vmem:[%s3655_s0 + $0x338] sm:$0xff]  ;;  %v455_v44 = vld [vmem:[#allocation0 + $0x207] ss:$-1 sm:$0xff] }
  0x35   :  { %v450_v42 = vld [vmem:[#allocation0 + $0x1ff] ss:$-1 sm:$0xff]  ;;  %441 = vst [vmem:[#allocation0 + $0x400] sm:$0xff] %v440_v40  ;;  %443 = vst [vmem:[#allocation0 + $0x408] sm:$0xff] %v442_v41  ;;  %v464_v45 = vld [vmem:[#allocation0 + $0x1f7] ss:$-1 sm:$0xff] }
  0x36   :  { %v451_v43 = vrot.slane %v450_v42, 5  ;;  %v456_v46 = vrot.slane %v455_v44, 5  ;;  %v465_v47 = vrot.slane %v464_v45, 5  ;;  %v469_v48 = vld [vmem:[#allocation0 + $0x1ff] ss:$-1 sm:$0xff] }
  0x37   :  { %v478_v49 = vld [vmem:[#allocation0 + $0x1ef] ss:$-1 sm:$0xff]  ;;  %v470_v50 = vrot.slane %v469_v48, 5  ;;  %v483_v52 = vld [vmem:[#allocation0 + $0x1f7] ss:$-1 sm:$0xff] }
  0x38   :  { %452 = vst [vmem:[#allocation1] sm:$0xff] %v451_v43  ;;  %v479_v51 = vrot.slane %v478_v49, 5  ;;  %v491_v53 = vld [vmem:[#allocation0 + $0x1e7] ss:$-1 sm:$0xff]  ;;  %466 = vst [vmem:[#allocation1 + $0x8] sm:$0xff] %v465_v47  ;;  %v484_v54 = vrot.slane %v483_v52, 5 }
  0x39   :  { %460 = vst.msk [vmem:[#allocation1] sm:$0xff] %vm459_vm0, %v456_v46  ;;  %v492_v55 = vrot.slane %v491_v53, 5  ;;  %v496_v56 = vld [vmem:[#allocation0 + $0x1ef] ss:$-1 sm:$0xff]  ;;  %v506_v57 = vld [vmem:[#allocation0 + $0x1d7] ss:$-1 sm:$0xff] }
  0x3a   :  { %474 = vst.msk [vmem:[#allocation1 + $0x8] sm:$0xff] %vm459_vm0, %v470_v50  ;;  %480 = vst [vmem:[#allocation1 + $0x10] sm:$0xff] %v479_v51  ;;  %v497_v58 = vrot.slane %v496_v56, 5  ;;  %v507_v59 = vrot.slane %v506_v57, 5  ;;  %v511_v60 = vld [vmem:[#allocation0 + $0x1df] ss:$-1 sm:$0xff] }
  0x3b   :  { %v520_v61 = vld [vmem:[#allocation0 + $0x1cf] ss:$-1 sm:$0xff]  ;;  %488 = vst.msk [vmem:[#allocation1 + $0x10] sm:$0xff] %vm459_vm0, %v484_v54  ;;  %493 = vst [vmem:[#allocation1 + $0x18] sm:$0xff] %v492_v55  ;;  %v512_v62 = vrot.slane %v511_v60, 5 }
  0x3c   :  { %v521_v63 = vrot.slane %v520_v61, 5  ;;  %v525_v0 = vld [vmem:[#allocation0 + $0x1d7] ss:$-1 sm:$0xff]  ;;  %v534_v1 = vld [vmem:[#allocation0 + $0x1c7] ss:$-1 sm:$0xff]  ;;  %501 = vst.msk [vmem:[#allocation1 + $0x18] sm:$0xff] %vm459_vm0, %v497_v58 }
  0x3d   :  { %508 = vst [vmem:[#allocation1 + $0x20] sm:$0xff] %v507_v59  ;;  %v526_v2 = vrot.slane %v525_v0, 5  ;;  %v535_v3 = vrot.slane %v534_v1, 5  ;;  %v539_v4 = vld [vmem:[#allocation0 + $0x1cf] ss:$-1 sm:$0xff] }
  0x3e   :  { %v547_v5 = vld [vmem:[#allocation0 + $0x1bf] ss:$-1 sm:$0xff]  ;;  %516 = vst.msk [vmem:[#allocation1 + $0x20] sm:$0xff] %vm459_vm0, %v512_v62  ;;  %522 = vst [vmem:[#allocation1 + $0x28] sm:$0xff] %v521_v63  ;;  %v540_v6 = vrot.slane %v539_v4, 5 }
  0x3f   :  { %v548_v7 = vrot.slane %v547_v5, 5  ;;  %v552_v8 = vld [vmem:[#allocation0 + $0x1c7] ss:$-1 sm:$0xff]  ;;  %v562_v9 = vld [vmem:[#allocation0 + $0x1af] ss:$-1 sm:$0xff]  ;;  %530 = vst.msk [vmem:[#allocation1 + $0x28] sm:$0xff] %vm459_vm0, %v526_v2 }
  0x40   :  { %536 = vst [vmem:[#allocation1 + $0x30] sm:$0xff] %v535_v3  ;;  %v553_v10 = vrot.slane %v552_v8, 5  ;;  %v563_v11 = vrot.slane %v562_v9, 5  ;;  %v567_v12 = vld [vmem:[#allocation0 + $0x1b7] ss:$-1 sm:$0xff] }
  0x41   :  { %v576_v13 = vld [vmem:[#allocation0 + $0x1a7] ss:$-1 sm:$0xff]  ;;  %544 = vst.msk [vmem:[#allocation1 + $0x30] sm:$0xff] %vm459_vm0, %v540_v6  ;;  %549 = vst [vmem:[#allocation1 + $0x38] sm:$0xff] %v548_v7  ;;  %v568_v14 = vrot.slane %v567_v12, 5 }
  0x42   :  { %v577_v15 = vrot.slane %v576_v13, 5  ;;  %v581_v16 = vld [vmem:[#allocation0 + $0x1af] ss:$-1 sm:$0xff]  ;;  %v590_v17 = vld [vmem:[#allocation0 + $0x19f] ss:$-1 sm:$0xff]  ;;  %557 = vst.msk [vmem:[#allocation1 + $0x38] sm:$0xff] %vm459_vm0, %v553_v10 }
  0x43   :  { %564 = vst [vmem:[#allocation1 + $0x40] sm:$0xff] %v563_v11  ;;  %v582_v18 = vrot.slane %v581_v16, 5  ;;  %v591_v19 = vrot.slane %v590_v17, 5  ;;  %v595_v20 = vld [vmem:[#allocation0 + $0x1a7] ss:$-1 sm:$0xff] }
  0x44   :  { %v603_v21 = vld [vmem:[#allocation0 + $0x197] ss:$-1 sm:$0xff]  ;;  %572 = vst.msk [vmem:[#allocation1 + $0x40] sm:$0xff] %vm459_vm0, %v568_v14  ;;  %578 = vst [vmem:[#allocation1 + $0x48] sm:$0xff] %v577_v15  ;;  %v596_v22 = vrot.slane %v595_v20, 5 }
  0x45   :  { %v604_v23 = vrot.slane %v603_v21, 5  ;;  %v608_v24 = vld [vmem:[#allocation0 + $0x19f] ss:$-1 sm:$0xff]  ;;  %v618_v25 = vld [vmem:[#allocation0 + $0x187] ss:$-1 sm:$0xff]  ;;  %586 = vst.msk [vmem:[#allocation1 + $0x48] sm:$0xff] %vm459_vm0, %v582_v18 }
  0x46   :  { %592 = vst [vmem:[#allocation1 + $0x50] sm:$0xff] %v591_v19  ;;  %v609_v26 = vrot.slane %v608_v24, 5  ;;  %v619_v27 = vrot.slane %v618_v25, 5  ;;  %v623_v28 = vld [vmem:[#allocation0 + $0x18f] ss:$-1 sm:$0xff] }
  0x47   :  { %v632_v29 = vld [vmem:[#allocation0 + $0x17f] ss:$-1 sm:$0xff]  ;;  %600 = vst.msk [vmem:[#allocation1 + $0x50] sm:$0xff] %vm459_vm0, %v596_v22  ;;  %605 = vst [vmem:[#allocation1 + $0x58] sm:$0xff] %v604_v23  ;;  %v624_v30 = vrot.slane %v623_v28, 5 }
  0x48   :  { %v633_v31 = vrot.slane %v632_v29, 5  ;;  %v637_v32 = vld [vmem:[#allocation0 + $0x187] ss:$-1 sm:$0xff]  ;;  %v646_v34 = vld [vmem:[#allocation0 + $0x177] ss:$-1 sm:$0xff]  ;;  %613 = vst.msk [vmem:[#allocation1 + $0x58] sm:$0xff] %vm459_vm0, %v609_v26 }
  0x49   :  { %620 = vst [vmem:[#allocation1 + $0x60] sm:$0xff] %v619_v27  ;;  %v638_v35 = vrot.slane %v637_v32, 5  ;;  %v647_v36 = vrot.slane %v646_v34, 5  ;;  %v651_v37 = vld [vmem:[#allocation0 + $0x17f] ss:$-1 sm:$0xff] }
  0x4a   :  { %v659_v38 = vld [vmem:[#allocation0 + $0x16f] ss:$-1 sm:$0xff]  ;;  %628 = vst.msk [vmem:[#allocation1 + $0x60] sm:$0xff] %vm459_vm0, %v624_v30  ;;  %634 = vst [vmem:[#allocation1 + $0x68] sm:$0xff] %v633_v31  ;;  %v652_v39 = vrot.slane %v651_v37, 5 }
  0x4b   :  { %v660_v40 = vrot.slane %v659_v38, 5  ;;  %v664_v41 = vld [vmem:[#allocation0 + $0x177] ss:$-1 sm:$0xff]  ;;  %v674_v42 = vld [vmem:[#allocation0 + $0x15f] ss:$-1 sm:$0xff]  ;;  %642 = vst.msk [vmem:[#allocation1 + $0x68] sm:$0xff] %vm459_vm0, %v638_v35 }
  0x4c   :  { %648 = vst [vmem:[#allocation1 + $0x70] sm:$0xff] %v647_v36  ;;  %v665_v43 = vrot.slane %v664_v41, 5  ;;  %v675_v44 = vrot.slane %v674_v42, 5  ;;  %v679_v45 = vld [vmem:[#allocation0 + $0x167] ss:$-1 sm:$0xff]  ;;  %v2150_v33 = vld [vmem:[#allocation1 + $0x40] sm:$0xff] }
  0x4d   :  { %v688_v46 = vld [vmem:[#allocation0 + $0x157] ss:$-1 sm:$0xff]  ;;  %656 = vst.msk [vmem:[#allocation1 + $0x70] sm:$0xff] %vm459_vm0, %v652_v39  ;;  %661 = vst [vmem:[#allocation1 + $0x78] sm:$0xff] %v660_v40  ;;  %v680_v47 = vrot.slane %v679_v45, 5 }
  0x4e   :  { %v689_v48 = vrot.slane %v688_v46, 5  ;;  %v693_v49 = vld [vmem:[#allocation0 + $0x15f] ss:$-1 sm:$0xff]  ;;  %v702_v50 = vld [vmem:[#allocation0 + $0x14f] ss:$-1 sm:$0xff]  ;;  %669 = vst.msk [vmem:[#allocation1 + $0x78] sm:$0xff] %vm459_vm0, %v665_v43 }
  0x4f   :  { %676 = vst [vmem:[#allocation1 + $0x80] sm:$0xff] %v675_v44  ;;  %v694_v51 = vrot.slane %v693_v49, 5  ;;  %v703_v52 = vrot.slane %v702_v50, 5  ;;  %v707_v53 = vld [vmem:[#allocation0 + $0x157] ss:$-1 sm:$0xff]  ;;  %2151 = vst [vmem:[%s3656_s1 + $0x40] sm:$0xff] %v2150_v33 }
  0x50   :  { %v715_v54 = vld [vmem:[#allocation0 + $0x147] ss:$-1 sm:$0xff]  ;;  %684 = vst.msk [vmem:[#allocation1 + $0x80] sm:$0xff] %vm459_vm0, %v680_v47  ;;  %690 = vst [vmem:[#allocation1 + $0x88] sm:$0xff] %v689_v48  ;;  %v708_v55 = vrot.slane %v707_v53, 5 }
  0x51   :  { %v716_v56 = vrot.slane %v715_v54, 5  ;;  %v720_v57 = vld [vmem:[#allocation0 + $0x14f] ss:$-1 sm:$0xff]  ;;  %v730_v58 = vld [vmem:[#allocation0 + $0x137] ss:$-1 sm:$0xff]  ;;  %698 = vst.msk [vmem:[#allocation1 + $0x88] sm:$0xff] %vm459_vm0, %v694_v51 }
  0x52   :  { %704 = vst [vmem:[#allocation1 + $0x90] sm:$0xff] %v703_v52  ;;  %v721_v59 = vrot.slane %v720_v57, 5  ;;  %v731_v60 = vrot.slane %v730_v58, 5  ;;  %v735_v61 = vld [vmem:[#allocation0 + $0x13f] ss:$-1 sm:$0xff] }
  0x53   :  { %v744_v62 = vld [vmem:[#allocation0 + $0x12f] ss:$-1 sm:$0xff]  ;;  %712 = vst.msk [vmem:[#allocation1 + $0x90] sm:$0xff] %vm459_vm0, %v708_v55  ;;  %717 = vst [vmem:[#allocation1 + $0x98] sm:$0xff] %v716_v56  ;;  %v736_v63 = vrot.slane %v735_v61, 5 }
  0x54   :  { %v745_v0 = vrot.slane %v744_v62, 5  ;;  %v749_v1 = vld [vmem:[#allocation0 + $0x137] ss:$-1 sm:$0xff]  ;;  %v758_v2 = vld [vmem:[#allocation0 + $0x127] ss:$-1 sm:$0xff]  ;;  %725 = vst.msk [vmem:[#allocation1 + $0x98] sm:$0xff] %vm459_vm0, %v721_v59 }
  0x55   :  { %732 = vst [vmem:[#allocation1 + $0xa0] sm:$0xff] %v731_v60  ;;  %v750_v3 = vrot.slane %v749_v1, 5  ;;  %v759_v4 = vrot.slane %v758_v2, 5  ;;  %v763_v5 = vld [vmem:[#allocation0 + $0x12f] ss:$-1 sm:$0xff] }
  0x56   :  { %v771_v6 = vld [vmem:[#allocation0 + $0x11f] ss:$-1 sm:$0xff]  ;;  %740 = vst.msk [vmem:[#allocation1 + $0xa0] sm:$0xff] %vm459_vm0, %v736_v63  ;;  %746 = vst [vmem:[#allocation1 + $0xa8] sm:$0xff] %v745_v0  ;;  %v764_v7 = vrot.slane %v763_v5, 5 }
  0x57   :  { %v772_v8 = vrot.slane %v771_v6, 5  ;;  %v776_v9 = vld [vmem:[#allocation0 + $0x127] ss:$-1 sm:$0xff]  ;;  %v786_v10 = vld [vmem:[#allocation0 + $0x10f] ss:$-1 sm:$0xff]  ;;  %754 = vst.msk [vmem:[#allocation1 + $0xa8] sm:$0xff] %vm459_vm0, %v750_v3 }
  0x58   :  { %760 = vst [vmem:[#allocation1 + $0xb0] sm:$0xff] %v759_v4  ;;  %v777_v11 = vrot.slane %v776_v9, 5  ;;  %v787_v12 = vrot.slane %v786_v10, 5  ;;  %v791_v13 = vld [vmem:[#allocation0 + $0x117] ss:$-1 sm:$0xff] }
  0x59   :  { %v800_v14 = vld [vmem:[#allocation0 + $0x107] ss:$-1 sm:$0xff]  ;;  %768 = vst.msk [vmem:[#allocation1 + $0xb0] sm:$0xff] %vm459_vm0, %v764_v7  ;;  %773 = vst [vmem:[#allocation1 + $0xb8] sm:$0xff] %v772_v8  ;;  %v792_v15 = vrot.slane %v791_v13, 5 }
  0x5a   :  { %v801_v16 = vrot.slane %v800_v14, 5  ;;  %v805_v17 = vld [vmem:[#allocation0 + $0x10f] ss:$-1 sm:$0xff]  ;;  %v814_v18 = vld [vmem:[#allocation0 + $0xff] ss:$-1 sm:$0xff]  ;;  %781 = vst.msk [vmem:[#allocation1 + $0xb8] sm:$0xff] %vm459_vm0, %v777_v11 }
  0x5b   :  { %788 = vst [vmem:[#allocation1 + $0xc0] sm:$0xff] %v787_v12  ;;  %v806_v19 = vrot.slane %v805_v17, 5  ;;  %v815_v20 = vrot.slane %v814_v18, 5  ;;  %v819_v21 = vld [vmem:[#allocation0 + $0x107] ss:$-1 sm:$0xff] }
  0x5c   :  { %v827_v22 = vld [vmem:[#allocation0 + $0xf7] ss:$-1 sm:$0xff]  ;;  %796 = vst.msk [vmem:[#allocation1 + $0xc0] sm:$0xff] %vm459_vm0, %v792_v15  ;;  %802 = vst [vmem:[#allocation1 + $0xc8] sm:$0xff] %v801_v16  ;;  %v820_v23 = vrot.slane %v819_v21, 5 }
  0x5d   :  { %v828_v24 = vrot.slane %v827_v22, 5  ;;  %v832_v25 = vld [vmem:[#allocation0 + $0xff] ss:$-1 sm:$0xff]  ;;  %v842_v26 = vld [vmem:[#allocation0 + $0xe7] ss:$-1 sm:$0xff]  ;;  %810 = vst.msk [vmem:[#allocation1 + $0xc8] sm:$0xff] %vm459_vm0, %v806_v19 }
  0x5e   :  { %816 = vst [vmem:[#allocation1 + $0xd0] sm:$0xff] %v815_v20  ;;  %v833_v27 = vrot.slane %v832_v25, 5  ;;  %v843_v28 = vrot.slane %v842_v26, 5  ;;  %v847_v29 = vld [vmem:[#allocation0 + $0xef] ss:$-1 sm:$0xff] }
  0x5f   :  { %v856_v30 = vld [vmem:[#allocation0 + $0xdf] ss:$-1 sm:$0xff]  ;;  %824 = vst.msk [vmem:[#allocation1 + $0xd0] sm:$0xff] %vm459_vm0, %v820_v23  ;;  %829 = vst [vmem:[#allocation1 + $0xd8] sm:$0xff] %v828_v24  ;;  %v848_v31 = vrot.slane %v847_v29, 5 }
  0x60   :  { %v857_v32 = vrot.slane %v856_v30, 5  ;;  %v861_v34 = vld [vmem:[#allocation0 + $0xe7] ss:$-1 sm:$0xff]  ;;  %v870_v35 = vld [vmem:[#allocation0 + $0xd7] ss:$-1 sm:$0xff]  ;;  %837 = vst.msk [vmem:[#allocation1 + $0xd8] sm:$0xff] %vm459_vm0, %v833_v27 }
  0x61   :  { %844 = vst [vmem:[#allocation1 + $0xe0] sm:$0xff] %v843_v28  ;;  %v862_v36 = vrot.slane %v861_v34, 5  ;;  %v871_v37 = vrot.slane %v870_v35, 5  ;;  %v875_v38 = vld [vmem:[#allocation0 + $0xdf] ss:$-1 sm:$0xff] }
  0x62   :  { %v883_v39 = vld [vmem:[#allocation0 + $0xcf] ss:$-1 sm:$0xff]  ;;  %852 = vst.msk [vmem:[#allocation1 + $0xe0] sm:$0xff] %vm459_vm0, %v848_v31  ;;  %858 = vst [vmem:[#allocation1 + $0xe8] sm:$0xff] %v857_v32  ;;  %v876_v40 = vrot.slane %v875_v38, 5 }
  0x63   :  { %v884_v41 = vrot.slane %v883_v39, 5  ;;  %v888_v42 = vld [vmem:[#allocation0 + $0xd7] ss:$-1 sm:$0xff]  ;;  %v898_v43 = vld [vmem:[#allocation0 + $0xbf] ss:$-1 sm:$0xff]  ;;  %866 = vst.msk [vmem:[#allocation1 + $0xe8] sm:$0xff] %vm459_vm0, %v862_v36 }
  0x64   :  { %872 = vst [vmem:[#allocation1 + $0xf0] sm:$0xff] %v871_v37  ;;  %v889_v44 = vrot.slane %v888_v42, 5  ;;  %v899_v45 = vrot.slane %v898_v43, 5  ;;  %v903_v46 = vld [vmem:[#allocation0 + $0xc7] ss:$-1 sm:$0xff] }
  0x65   :  { %v912_v47 = vld [vmem:[#allocation0 + $0xb7] ss:$-1 sm:$0xff]  ;;  %880 = vst.msk [vmem:[#allocation1 + $0xf0] sm:$0xff] %vm459_vm0, %v876_v40  ;;  %885 = vst [vmem:[#allocation1 + $0xf8] sm:$0xff] %v884_v41  ;;  %v904_v48 = vrot.slane %v903_v46, 5 }
  0x66   :  { %v913_v49 = vrot.slane %v912_v47, 5  ;;  %v917_v50 = vld [vmem:[#allocation0 + $0xbf] ss:$-1 sm:$0xff]  ;;  %v926_v51 = vld [vmem:[#allocation0 + $0xaf] ss:$-1 sm:$0xff]  ;;  %893 = vst.msk [vmem:[#allocation1 + $0xf8] sm:$0xff] %vm459_vm0, %v889_v44 }
  0x67   :  { %900 = vst [vmem:[#allocation1 + $0x100] sm:$0xff] %v899_v45  ;;  %v918_v52 = vrot.slane %v917_v50, 5  ;;  %v927_v53 = vrot.slane %v926_v51, 5  ;;  %v931_v54 = vld [vmem:[#allocation0 + $0xb7] ss:$-1 sm:$0xff] }
  0x68   :  { %v939_v55 = vld [vmem:[#allocation0 + $0xa7] ss:$-1 sm:$0xff]  ;;  %908 = vst.msk [vmem:[#allocation1 + $0x100] sm:$0xff] %vm459_vm0, %v904_v48  ;;  %914 = vst [vmem:[#allocation1 + $0x108] sm:$0xff] %v913_v49  ;;  %v932_v56 = vrot.slane %v931_v54, 5 }
  0x69   :  { %v940_v57 = vrot.slane %v939_v55, 5  ;;  %v944_v58 = vld [vmem:[#allocation0 + $0xaf] ss:$-1 sm:$0xff]  ;;  %v954_v59 = vld [vmem:[#allocation0 + $0x97] ss:$-1 sm:$0xff]  ;;  %922 = vst.msk [vmem:[#allocation1 + $0x108] sm:$0xff] %vm459_vm0, %v918_v52 }
  0x6a   :  { %928 = vst [vmem:[#allocation1 + $0x110] sm:$0xff] %v927_v53  ;;  %v945_v60 = vrot.slane %v944_v58, 5  ;;  %v955_v61 = vrot.slane %v954_v59, 5  ;;  %v959_v62 = vld [vmem:[#allocation0 + $0x9f] ss:$-1 sm:$0xff] }
  0x6b   :  { %v968_v63 = vld [vmem:[#allocation0 + $0x8f] ss:$-1 sm:$0xff]  ;;  %936 = vst.msk [vmem:[#allocation1 + $0x110] sm:$0xff] %vm459_vm0, %v932_v56  ;;  %941 = vst [vmem:[#allocation1 + $0x118] sm:$0xff] %v940_v57  ;;  %v960_v0 = vrot.slane %v959_v62, 5 }
  0x6c   :  { %v969_v1 = vrot.slane %v968_v63, 5  ;;  %v973_v2 = vld [vmem:[#allocation0 + $0x97] ss:$-1 sm:$0xff]  ;;  %v982_v3 = vld [vmem:[#allocation0 + $0x87] ss:$-1 sm:$0xff]  ;;  %949 = vst.msk [vmem:[#allocation1 + $0x118] sm:$0xff] %vm459_vm0, %v945_v60 }
  0x6d   :  { %956 = vst [vmem:[#allocation1 + $0x120] sm:$0xff] %v955_v61  ;;  %v974_v4 = vrot.slane %v973_v2, 5  ;;  %v983_v5 = vrot.slane %v982_v3, 5  ;;  %v987_v6 = vld [vmem:[#allocation0 + $0x8f] ss:$-1 sm:$0xff] }
  0x6e   :  { %v995_v7 = vld [vmem:[#allocation0 + $0x7f] ss:$-1 sm:$0xff]  ;;  %964 = vst.msk [vmem:[#allocation1 + $0x120] sm:$0xff] %vm459_vm0, %v960_v0  ;;  %970 = vst [vmem:[#allocation1 + $0x128] sm:$0xff] %v969_v1  ;;  %v988_v8 = vrot.slane %v987_v6, 5 }
  0x6f   :  { %v996_v9 = vrot.slane %v995_v7, 5  ;;  %v1000_v10 = vld [vmem:[#allocation0 + $0x87] ss:$-1 sm:$0xff]  ;;  %v1010_v11 = vld [vmem:[#allocation0 + $0x6f] ss:$-1 sm:$0xff]  ;;  %978 = vst.msk [vmem:[#allocation1 + $0x128] sm:$0xff] %vm459_vm0, %v974_v4 }
  0x70   :  { %984 = vst [vmem:[#allocation1 + $0x130] sm:$0xff] %v983_v5  ;;  %v1001_v12 = vrot.slane %v1000_v10, 5  ;;  %v1011_v13 = vrot.slane %v1010_v11, 5  ;;  %v1015_v14 = vld [vmem:[#allocation0 + $0x77] ss:$-1 sm:$0xff] }
  0x71   :  { %v1024_v15 = vld [vmem:[#allocation0 + $0x67] ss:$-1 sm:$0xff]  ;;  %992 = vst.msk [vmem:[#allocation1 + $0x130] sm:$0xff] %vm459_vm0, %v988_v8  ;;  %997 = vst [vmem:[#allocation1 + $0x138] sm:$0xff] %v996_v9  ;;  %v1016_v16 = vrot.slane %v1015_v14, 5 }
  0x72   :  { %v1025_v17 = vrot.slane %v1024_v15, 5  ;;  %v1029_v18 = vld [vmem:[#allocation0 + $0x6f] ss:$-1 sm:$0xff]  ;;  %v1038_v19 = vld [vmem:[#allocation0 + $0x5f] ss:$-1 sm:$0xff]  ;;  %1005 = vst.msk [vmem:[#allocation1 + $0x138] sm:$0xff] %vm459_vm0, %v1001_v12 }
  0x73   :  { %1012 = vst [vmem:[#allocation1 + $0x140] sm:$0xff] %v1011_v13  ;;  %v1030_v20 = vrot.slane %v1029_v18, 5  ;;  %v1039_v21 = vrot.slane %v1038_v19, 5  ;;  %v1043_v22 = vld [vmem:[#allocation0 + $0x67] ss:$-1 sm:$0xff] }
  0x74   :  { %v1051_v23 = vld [vmem:[#allocation0 + $0x57] ss:$-1 sm:$0xff]  ;;  %1020 = vst.msk [vmem:[#allocation1 + $0x140] sm:$0xff] %vm459_vm0, %v1016_v16  ;;  %1026 = vst [vmem:[#allocation1 + $0x148] sm:$0xff] %v1025_v17  ;;  %v1044_v24 = vrot.slane %v1043_v22, 5 }
  0x75   :  { %v1052_v25 = vrot.slane %v1051_v23, 5  ;;  %v1056_v26 = vld [vmem:[#allocation0 + $0x5f] ss:$-1 sm:$0xff]  ;;  %v1066_v27 = vld [vmem:[#allocation0 + $0x47] ss:$-1 sm:$0xff]  ;;  %1034 = vst.msk [vmem:[#allocation1 + $0x148] sm:$0xff] %vm459_vm0, %v1030_v20 }
  0x76   :  { %1040 = vst [vmem:[#allocation1 + $0x150] sm:$0xff] %v1039_v21  ;;  %v1057_v28 = vrot.slane %v1056_v26, 5  ;;  %v1067_v29 = vrot.slane %v1066_v27, 5  ;;  %v1071_v30 = vld [vmem:[#allocation0 + $0x4f] ss:$-1 sm:$0xff] }
  0x77   :  { %v1080_v31 = vld [vmem:[#allocation0 + $0x3f] ss:$-1 sm:$0xff]  ;;  %1048 = vst.msk [vmem:[#allocation1 + $0x150] sm:$0xff] %vm459_vm0, %v1044_v24  ;;  %1053 = vst [vmem:[#allocation1 + $0x158] sm:$0xff] %v1052_v25  ;;  %v1072_v32 = vrot.slane %v1071_v30, 5 }
  0x78   :  { %v1081_v34 = vrot.slane %v1080_v31, 5  ;;  %v1085_v35 = vld [vmem:[#allocation0 + $0x47] ss:$-1 sm:$0xff]  ;;  %v1094_v36 = vld [vmem:[#allocation0 + $0x37] ss:$-1 sm:$0xff]  ;;  %1061 = vst.msk [vmem:[#allocation1 + $0x158] sm:$0xff] %vm459_vm0, %v1057_v28 }
  0x79   :  { %1068 = vst [vmem:[#allocation1 + $0x160] sm:$0xff] %v1067_v29  ;;  %v1086_v37 = vrot.slane %v1085_v35, 5  ;;  %v1095_v38 = vrot.slane %v1094_v36, 5  ;;  %v1099_v39 = vld [vmem:[#allocation0 + $0x3f] ss:$-1 sm:$0xff] }
  0x7a   :  { %v1107_v40 = vld [vmem:[#allocation0 + $0x2f] ss:$-1 sm:$0xff]  ;;  %1076 = vst.msk [vmem:[#allocation1 + $0x160] sm:$0xff] %vm459_vm0, %v1072_v32  ;;  %1082 = vst [vmem:[#allocation1 + $0x168] sm:$0xff] %v1081_v34  ;;  %v1100_v41 = vrot.slane %v1099_v39, 5 }
  0x7b   :  { %v1108_v42 = vrot.slane %v1107_v40, 5  ;;  %v1112_v43 = vld [vmem:[#allocation0 + $0x37] ss:$-1 sm:$0xff]  ;;  %v1121_v44 = vld [vmem:[#allocation0 + $0x1f] ss:$-1 sm:$0xff]  ;;  %1090 = vst.msk [vmem:[#allocation1 + $0x168] sm:$0xff] %vm459_vm0, %v1086_v37 }
  0x7c   :  { %1096 = vst [vmem:[#allocation1 + $0x170] sm:$0xff] %v1095_v38  ;;  %v1113_v45 = vrot.slane %v1112_v43, 5  ;;  %v1122_v46 = vrot.slane %v1121_v44, 5  ;;  %v1126_v47 = vld [vmem:[#allocation0 + $0x27] ss:$-1 sm:$0xff] }
  0x7d   :  { %v1135_v48 = vld [vmem:[#allocation0 + $0x17] ss:$-1 sm:$0xff]  ;;  %1104 = vst.msk [vmem:[#allocation1 + $0x170] sm:$0xff] %vm459_vm0, %v1100_v41  ;;  %1109 = vst [vmem:[#allocation1 + $0x178] sm:$0xff] %v1108_v42  ;;  %v1127_v49 = vrot.slane %v1126_v47, 5 }
  0x7e   :  { %v1136_v50 = vrot.slane %v1135_v48, 5  ;;  %v1140_v51 = vld [vmem:[#allocation0 + $0x1f] ss:$-1 sm:$0xff]  ;;  %v1149_v52 = vld [vmem:[#allocation0 + $0xf] ss:$-1 sm:$0xff]  ;;  %1117 = vst.msk [vmem:[#allocation1 + $0x178] sm:$0xff] %vm459_vm0, %v1113_v45 }
  0x7f   :  { %1123 = vst [vmem:[#allocation1 + $0x180] sm:$0xff] %v1122_v46  ;;  %v1141_v53 = vrot.slane %v1140_v51, 5  ;;  %v1150_v54 = vrot.slane %v1149_v52, 5  ;;  %v1154_v55 = vld [vmem:[#allocation0 + $0x17] ss:$-1 sm:$0xff] }
  0x80   :  { %v1162_v56 = vld [vmem:[#allocation0 + $0x7] ss:$-1 sm:$0xff]  ;;  %1131 = vst.msk [vmem:[#allocation1 + $0x180] sm:$0xff] %vm459_vm0, %v1127_v49  ;;  %1137 = vst [vmem:[#allocation1 + $0x188] sm:$0xff] %v1136_v50  ;;  %v1155_v57 = vrot.slane %v1154_v55, 5 }
  0x81   :  { %v1163_v58 = vrot.slane %v1162_v56, 5  ;;  %v1167_v59 = vld [vmem:[#allocation0 + $0xf] ss:$-1 sm:$0xff]  ;;  %v1177_v60 = vld [vmem:[#allocation0 + $0x407] ss:$-1 sm:$0xff]  ;;  %1145 = vst.msk [vmem:[#allocation1 + $0x188] sm:$0xff] %vm459_vm0, %v1141_v53 }
  0x82   :  { %1151 = vst [vmem:[#allocation1 + $0x190] sm:$0xff] %v1150_v54  ;;  %v1168_v61 = vrot.slane %v1167_v59, 5  ;;  %v1178_v62 = vrot.slane %v1177_v60, 5  ;;  %v1182_v63 = vld [vmem:[#allocation0 + $0x40f] ss:$-1 sm:$0xff] }
  0x83   :  { %v1191_v0 = vld [vmem:[#allocation0 + $0x3ff] ss:$-1 sm:$0xff]  ;;  %1159 = vst.msk [vmem:[#allocation1 + $0x190] sm:$0xff] %vm459_vm0, %v1155_v57  ;;  %1164 = vst [vmem:[#allocation1 + $0x198] sm:$0xff] %v1163_v58  ;;  %v1183_v1 = vrot.slane %v1182_v63, 5 }
  0x84   :  { %v1192_v2 = vrot.slane %v1191_v0, 5  ;;  %v1196_v3 = vld [vmem:[#allocation0 + $0x407] ss:$-1 sm:$0xff]  ;;  %v1205_v4 = vld [vmem:[#allocation0 + $0x3f7] ss:$-1 sm:$0xff]  ;;  %1172 = vst.msk [vmem:[#allocation1 + $0x198] sm:$0xff] %vm459_vm0, %v1168_v61 }
  0x85   :  { %1179 = vst [vmem:[#allocation1 + $0x1a0] sm:$0xff] %v1178_v62  ;;  %v1197_v5 = vrot.slane %v1196_v3, 5  ;;  %v1206_v6 = vrot.slane %v1205_v4, 5  ;;  %v1210_v7 = vld [vmem:[#allocation0 + $0x3ff] ss:$-1 sm:$0xff] }
  0x86   :  { %v1218_v8 = vld [vmem:[#allocation0 + $0x3ef] ss:$-1 sm:$0xff]  ;;  %1187 = vst.msk [vmem:[#allocation1 + $0x1a0] sm:$0xff] %vm459_vm0, %v1183_v1  ;;  %1193 = vst [vmem:[#allocation1 + $0x1a8] sm:$0xff] %v1192_v2  ;;  %v1211_v9 = vrot.slane %v1210_v7, 5 }
  0x87   :  { %v1219_v10 = vrot.slane %v1218_v8, 5  ;;  %v1223_v11 = vld [vmem:[#allocation0 + $0x3f7] ss:$-1 sm:$0xff]  ;;  %v1233_v12 = vld [vmem:[#allocation0 + $0x3df] ss:$-1 sm:$0xff]  ;;  %1201 = vst.msk [vmem:[#allocation1 + $0x1a8] sm:$0xff] %vm459_vm0, %v1197_v5 }
  0x88   :  { %1207 = vst [vmem:[#allocation1 + $0x1b0] sm:$0xff] %v1206_v6  ;;  %v1224_v13 = vrot.slane %v1223_v11, 5  ;;  %v1234_v14 = vrot.slane %v1233_v12, 5  ;;  %v1238_v15 = vld [vmem:[#allocation0 + $0x3e7] ss:$-1 sm:$0xff] }
  0x89   :  { %v1247_v16 = vld [vmem:[#allocation0 + $0x3d7] ss:$-1 sm:$0xff]  ;;  %1215 = vst.msk [vmem:[#allocation1 + $0x1b0] sm:$0xff] %vm459_vm0, %v1211_v9  ;;  %1220 = vst [vmem:[#allocation1 + $0x1b8] sm:$0xff] %v1219_v10  ;;  %v1239_v17 = vrot.slane %v1238_v15, 5 }
  0x8a   :  { %v1248_v18 = vrot.slane %v1247_v16, 5  ;;  %v1252_v19 = vld [vmem:[#allocation0 + $0x3df] ss:$-1 sm:$0xff]  ;;  %v1261_v20 = vld [vmem:[#allocation0 + $0x3cf] ss:$-1 sm:$0xff]  ;;  %1228 = vst.msk [vmem:[#allocation1 + $0x1b8] sm:$0xff] %vm459_vm0, %v1224_v13 }
  0x8b   :  { %1235 = vst [vmem:[#allocation1 + $0x1c0] sm:$0xff] %v1234_v14  ;;  %v1253_v21 = vrot.slane %v1252_v19, 5  ;;  %v1262_v22 = vrot.slane %v1261_v20, 5  ;;  %v1266_v23 = vld [vmem:[#allocation0 + $0x3d7] ss:$-1 sm:$0xff] }
  0x8c   :  { %v1274_v24 = vld [vmem:[#allocation0 + $0x3c7] ss:$-1 sm:$0xff]  ;;  %1243 = vst.msk [vmem:[#allocation1 + $0x1c0] sm:$0xff] %vm459_vm0, %v1239_v17  ;;  %1249 = vst [vmem:[#allocation1 + $0x1c8] sm:$0xff] %v1248_v18  ;;  %v1267_v25 = vrot.slane %v1266_v23, 5 }
  0x8d   :  { %v1275_v26 = vrot.slane %v1274_v24, 5  ;;  %v1279_v27 = vld [vmem:[#allocation0 + $0x3cf] ss:$-1 sm:$0xff]  ;;  %v1289_v28 = vld [vmem:[#allocation0 + $0x3b7] ss:$-1 sm:$0xff]  ;;  %1257 = vst.msk [vmem:[#allocation1 + $0x1c8] sm:$0xff] %vm459_vm0, %v1253_v21 }
  0x8e   :  { %1263 = vst [vmem:[#allocation1 + $0x1d0] sm:$0xff] %v1262_v22  ;;  %v1280_v29 = vrot.slane %v1279_v27, 5  ;;  %v1290_v30 = vrot.slane %v1289_v28, 5  ;;  %v1294_v31 = vld [vmem:[#allocation0 + $0x3bf] ss:$-1 sm:$0xff] }
  0x8f   :  { %v1303_v32 = vld [vmem:[#allocation0 + $0x3af] ss:$-1 sm:$0xff]  ;;  %1271 = vst.msk [vmem:[#allocation1 + $0x1d0] sm:$0xff] %vm459_vm0, %v1267_v25  ;;  %1276 = vst [vmem:[#allocation1 + $0x1d8] sm:$0xff] %v1275_v26  ;;  %v1295_v34 = vrot.slane %v1294_v31, 5 }
  0x90   :  { %v1304_v35 = vrot.slane %v1303_v32, 5  ;;  %v1308_v36 = vld [vmem:[#allocation0 + $0x3b7] ss:$-1 sm:$0xff]  ;;  %v1317_v37 = vld [vmem:[#allocation0 + $0x3a7] ss:$-1 sm:$0xff]  ;;  %1284 = vst.msk [vmem:[#allocation1 + $0x1d8] sm:$0xff] %vm459_vm0, %v1280_v29 }
  0x91   :  { %1291 = vst [vmem:[#allocation1 + $0x1e0] sm:$0xff] %v1290_v30  ;;  %v1309_v38 = vrot.slane %v1308_v36, 5  ;;  %v1318_v39 = vrot.slane %v1317_v37, 5  ;;  %v1322_v40 = vld [vmem:[#allocation0 + $0x3af] ss:$-1 sm:$0xff] }
  0x92   :  { %v1330_v41 = vld [vmem:[#allocation0 + $0x39f] ss:$-1 sm:$0xff]  ;;  %1299 = vst.msk [vmem:[#allocation1 + $0x1e0] sm:$0xff] %vm459_vm0, %v1295_v34  ;;  %1305 = vst [vmem:[#allocation1 + $0x1e8] sm:$0xff] %v1304_v35  ;;  %v1323_v42 = vrot.slane %v1322_v40, 5 }
  0x93   :  { %v1331_v43 = vrot.slane %v1330_v41, 5  ;;  %v1335_v44 = vld [vmem:[#allocation0 + $0x3a7] ss:$-1 sm:$0xff]  ;;  %v1345_v45 = vld [vmem:[#allocation0 + $0x38f] ss:$-1 sm:$0xff]  ;;  %1313 = vst.msk [vmem:[#allocation1 + $0x1e8] sm:$0xff] %vm459_vm0, %v1309_v38 }
  0x94   :  { %1319 = vst [vmem:[#allocation1 + $0x1f0] sm:$0xff] %v1318_v39  ;;  %v1336_v46 = vrot.slane %v1335_v44, 5  ;;  %v1346_v47 = vrot.slane %v1345_v45, 5  ;;  %v1350_v48 = vld [vmem:[#allocation0 + $0x397] ss:$-1 sm:$0xff] }
  0x95   :  { %v1359_v49 = vld [vmem:[#allocation0 + $0x387] ss:$-1 sm:$0xff]  ;;  %1327 = vst.msk [vmem:[#allocation1 + $0x1f0] sm:$0xff] %vm459_vm0, %v1323_v42  ;;  %1332 = vst [vmem:[#allocation1 + $0x1f8] sm:$0xff] %v1331_v43  ;;  %v1351_v50 = vrot.slane %v1350_v48, 5 }
  0x96   :  { %v1360_v51 = vrot.slane %v1359_v49, 5  ;;  %v1364_v52 = vld [vmem:[#allocation0 + $0x38f] ss:$-1 sm:$0xff]  ;;  %v1373_v53 = vld [vmem:[#allocation0 + $0x37f] ss:$-1 sm:$0xff]  ;;  %1340 = vst.msk [vmem:[#allocation1 + $0x1f8] sm:$0xff] %vm459_vm0, %v1336_v46 }
  0x97   :  { %1347 = vst [vmem:[#allocation1 + $0x200] sm:$0xff] %v1346_v47  ;;  %v1365_v54 = vrot.slane %v1364_v52, 5  ;;  %v1374_v55 = vrot.slane %v1373_v53, 5  ;;  %v1378_v56 = vld [vmem:[#allocation0 + $0x387] ss:$-1 sm:$0xff] }
  0x98   :  { %v1386_v57 = vld [vmem:[#allocation0 + $0x377] ss:$-1 sm:$0xff]  ;;  %1355 = vst.msk [vmem:[#allocation1 + $0x200] sm:$0xff] %vm459_vm0, %v1351_v50  ;;  %1361 = vst [vmem:[#allocation1 + $0x208] sm:$0xff] %v1360_v51  ;;  %v1379_v58 = vrot.slane %v1378_v56, 5 }
  0x99   :  { %v1387_v59 = vrot.slane %v1386_v57, 5  ;;  %v1391_v60 = vld [vmem:[#allocation0 + $0x37f] ss:$-1 sm:$0xff]  ;;  %v1401_v61 = vld [vmem:[#allocation0 + $0x367] ss:$-1 sm:$0xff]  ;;  %1369 = vst.msk [vmem:[#allocation1 + $0x208] sm:$0xff] %vm459_vm0, %v1365_v54 }
  0x9a   :  { %1375 = vst [vmem:[#allocation1 + $0x210] sm:$0xff] %v1374_v55  ;;  %v1392_v62 = vrot.slane %v1391_v60, 5  ;;  %v1402_v63 = vrot.slane %v1401_v61, 5  ;;  %v1406_v0 = vld [vmem:[#allocation0 + $0x36f] ss:$-1 sm:$0xff] }
  0x9b   :  { %v1415_v1 = vld [vmem:[#allocation0 + $0x35f] ss:$-1 sm:$0xff]  ;;  %1383 = vst.msk [vmem:[#allocation1 + $0x210] sm:$0xff] %vm459_vm0, %v1379_v58  ;;  %1388 = vst [vmem:[#allocation1 + $0x218] sm:$0xff] %v1387_v59  ;;  %v1407_v2 = vrot.slane %v1406_v0, 5 }
  0x9c   :  { %v1416_v3 = vrot.slane %v1415_v1, 5  ;;  %v1420_v4 = vld [vmem:[#allocation0 + $0x367] ss:$-1 sm:$0xff]  ;;  %v1429_v5 = vld [vmem:[#allocation0 + $0x357] ss:$-1 sm:$0xff]  ;;  %1396 = vst.msk [vmem:[#allocation1 + $0x218] sm:$0xff] %vm459_vm0, %v1392_v62 }
  0x9d   :  { %1403 = vst [vmem:[#allocation1 + $0x220] sm:$0xff] %v1402_v63  ;;  %v1421_v6 = vrot.slane %v1420_v4, 5  ;;  %v1430_v7 = vrot.slane %v1429_v5, 5  ;;  %v1434_v8 = vld [vmem:[#allocation0 + $0x35f] ss:$-1 sm:$0xff] }
  0x9e   :  { %v1442_v9 = vld [vmem:[#allocation0 + $0x34f] ss:$-1 sm:$0xff]  ;;  %1411 = vst.msk [vmem:[#allocation1 + $0x220] sm:$0xff] %vm459_vm0, %v1407_v2  ;;  %1417 = vst [vmem:[#allocation1 + $0x228] sm:$0xff] %v1416_v3  ;;  %v1435_v10 = vrot.slane %v1434_v8, 5 }
  0x9f   :  { %v1443_v11 = vrot.slane %v1442_v9, 5  ;;  %v1447_v12 = vld [vmem:[#allocation0 + $0x357] ss:$-1 sm:$0xff]  ;;  %v1457_v13 = vld [vmem:[#allocation0 + $0x33f] ss:$-1 sm:$0xff]  ;;  %1425 = vst.msk [vmem:[#allocation1 + $0x228] sm:$0xff] %vm459_vm0, %v1421_v6 }
  0xa0   :  { %1431 = vst [vmem:[#allocation1 + $0x230] sm:$0xff] %v1430_v7  ;;  %v1448_v14 = vrot.slane %v1447_v12, 5  ;;  %v1458_v15 = vrot.slane %v1457_v13, 5  ;;  %v1462_v16 = vld [vmem:[#allocation0 + $0x347] ss:$-1 sm:$0xff] }
  0xa1   :  { %v1471_v17 = vld [vmem:[#allocation0 + $0x337] ss:$-1 sm:$0xff]  ;;  %1439 = vst.msk [vmem:[#allocation1 + $0x230] sm:$0xff] %vm459_vm0, %v1435_v10  ;;  %1444 = vst [vmem:[#allocation1 + $0x238] sm:$0xff] %v1443_v11  ;;  %v1463_v18 = vrot.slane %v1462_v16, 5 }
  0xa2   :  { %v1472_v19 = vrot.slane %v1471_v17, 5  ;;  %v1476_v20 = vld [vmem:[#allocation0 + $0x33f] ss:$-1 sm:$0xff]  ;;  %v1485_v21 = vld [vmem:[#allocation0 + $0x32f] ss:$-1 sm:$0xff]  ;;  %1452 = vst.msk [vmem:[#allocation1 + $0x238] sm:$0xff] %vm459_vm0, %v1448_v14 }
  0xa3   :  { %1459 = vst [vmem:[#allocation1 + $0x240] sm:$0xff] %v1458_v15  ;;  %v1477_v22 = vrot.slane %v1476_v20, 5  ;;  %v1486_v23 = vrot.slane %v1485_v21, 5  ;;  %v1490_v24 = vld [vmem:[#allocation0 + $0x337] ss:$-1 sm:$0xff] }
  0xa4   :  { %v1498_v25 = vld [vmem:[#allocation0 + $0x327] ss:$-1 sm:$0xff]  ;;  %1467 = vst.msk [vmem:[#allocation1 + $0x240] sm:$0xff] %vm459_vm0, %v1463_v18  ;;  %1473 = vst [vmem:[#allocation1 + $0x248] sm:$0xff] %v1472_v19  ;;  %v1491_v26 = vrot.slane %v1490_v24, 5 }
  0xa5   :  { %v1499_v27 = vrot.slane %v1498_v25, 5  ;;  %v1503_v28 = vld [vmem:[#allocation0 + $0x32f] ss:$-1 sm:$0xff]  ;;  %v1513_v29 = vld [vmem:[#allocation0 + $0x317] ss:$-1 sm:$0xff]  ;;  %1481 = vst.msk [vmem:[#allocation1 + $0x248] sm:$0xff] %vm459_vm0, %v1477_v22 }
  0xa6   :  { %1487 = vst [vmem:[#allocation1 + $0x250] sm:$0xff] %v1486_v23  ;;  %v1504_v30 = vrot.slane %v1503_v28, 5  ;;  %v1514_v31 = vrot.slane %v1513_v29, 5  ;;  %v1518_v32 = vld [vmem:[#allocation0 + $0x31f] ss:$-1 sm:$0xff] }
  0xa7   :  { %v1527_v34 = vld [vmem:[#allocation0 + $0x30f] ss:$-1 sm:$0xff]  ;;  %1495 = vst.msk [vmem:[#allocation1 + $0x250] sm:$0xff] %vm459_vm0, %v1491_v26  ;;  %1500 = vst [vmem:[#allocation1 + $0x258] sm:$0xff] %v1499_v27  ;;  %v1519_v35 = vrot.slane %v1518_v32, 5 }
  0xa8   :  { %v1528_v36 = vrot.slane %v1527_v34, 5  ;;  %v1532_v37 = vld [vmem:[#allocation0 + $0x317] ss:$-1 sm:$0xff]  ;;  %v1541_v38 = vld [vmem:[#allocation0 + $0x307] ss:$-1 sm:$0xff]  ;;  %1508 = vst.msk [vmem:[#allocation1 + $0x258] sm:$0xff] %vm459_vm0, %v1504_v30 }
  0xa9   :  { %1515 = vst [vmem:[#allocation1 + $0x260] sm:$0xff] %v1514_v31  ;;  %v1533_v39 = vrot.slane %v1532_v37, 5  ;;  %v1542_v40 = vrot.slane %v1541_v38, 5  ;;  %v1546_v41 = vld [vmem:[#allocation0 + $0x30f] ss:$-1 sm:$0xff] }
  0xaa   :  { %v1554_v42 = vld [vmem:[#allocation0 + $0x2ff] ss:$-1 sm:$0xff]  ;;  %1523 = vst.msk [vmem:[#allocation1 + $0x260] sm:$0xff] %vm459_vm0, %v1519_v35  ;;  %1529 = vst [vmem:[#allocation1 + $0x268] sm:$0xff] %v1528_v36  ;;  %v1547_v43 = vrot.slane %v1546_v41, 5 }
  0xab   :  { %v1555_v44 = vrot.slane %v1554_v42, 5  ;;  %v1559_v45 = vld [vmem:[#allocation0 + $0x307] ss:$-1 sm:$0xff]  ;;  %v1569_v46 = vld [vmem:[#allocation0 + $0x2ef] ss:$-1 sm:$0xff]  ;;  %1537 = vst.msk [vmem:[#allocation1 + $0x268] sm:$0xff] %vm459_vm0, %v1533_v39 }
  0xac   :  { %1543 = vst [vmem:[#allocation1 + $0x270] sm:$0xff] %v1542_v40  ;;  %v1560_v47 = vrot.slane %v1559_v45, 5  ;;  %v1570_v48 = vrot.slane %v1569_v46, 5  ;;  %v1574_v49 = vld [vmem:[#allocation0 + $0x2f7] ss:$-1 sm:$0xff] }
  0xad   :  { %v1583_v50 = vld [vmem:[#allocation0 + $0x2e7] ss:$-1 sm:$0xff]  ;;  %1551 = vst.msk [vmem:[#allocation1 + $0x270] sm:$0xff] %vm459_vm0, %v1547_v43  ;;  %1556 = vst [vmem:[#allocation1 + $0x278] sm:$0xff] %v1555_v44  ;;  %v1575_v51 = vrot.slane %v1574_v49, 5  ;;  %v2278_v33 = vld [vmem:[#allocation1 + $0x240] sm:$0xff] }
  0xae   :  { %v1584_v52 = vrot.slane %v1583_v50, 5  ;;  %v1588_v53 = vld [vmem:[#allocation0 + $0x2ef] ss:$-1 sm:$0xff]  ;;  %v1597_v54 = vld [vmem:[#allocation0 + $0x2df] ss:$-1 sm:$0xff]  ;;  %1564 = vst.msk [vmem:[#allocation1 + $0x278] sm:$0xff] %vm459_vm0, %v1560_v47 }
  0xaf   :  { %1571 = vst [vmem:[#allocation1 + $0x280] sm:$0xff] %v1570_v48  ;;  %v1589_v55 = vrot.slane %v1588_v53, 5  ;;  %v1598_v56 = vrot.slane %v1597_v54, 5  ;;  %v1602_v57 = vld [vmem:[#allocation0 + $0x2e7] ss:$-1 sm:$0xff]  ;;  %2279 = vst [vmem:[%s3656_s1 + $0x240] sm:$0xff] %v2278_v33 }
  0xb0   :  { %v1610_v58 = vld [vmem:[#allocation0 + $0x2d7] ss:$-1 sm:$0xff]  ;;  %1579 = vst.msk [vmem:[#allocation1 + $0x280] sm:$0xff] %vm459_vm0, %v1575_v51  ;;  %1585 = vst [vmem:[#allocation1 + $0x288] sm:$0xff] %v1584_v52  ;;  %v1603_v59 = vrot.slane %v1602_v57, 5 }
  0xb1   :  { %v1611_v60 = vrot.slane %v1610_v58, 5  ;;  %v1615_v61 = vld [vmem:[#allocation0 + $0x2df] ss:$-1 sm:$0xff]  ;;  %v1625_v62 = vld [vmem:[#allocation0 + $0x2c7] ss:$-1 sm:$0xff]  ;;  %1593 = vst.msk [vmem:[#allocation1 + $0x288] sm:$0xff] %vm459_vm0, %v1589_v55 }
  0xb2   :  { %1599 = vst [vmem:[#allocation1 + $0x290] sm:$0xff] %v1598_v56  ;;  %v1616_v63 = vrot.slane %v1615_v61, 5  ;;  %v1626_v0 = vrot.slane %v1625_v62, 5  ;;  %v1630_v1 = vld [vmem:[#allocation0 + $0x2cf] ss:$-1 sm:$0xff] }
  0xb3   :  { %v1639_v2 = vld [vmem:[#allocation0 + $0x2bf] ss:$-1 sm:$0xff]  ;;  %1607 = vst.msk [vmem:[#allocation1 + $0x290] sm:$0xff] %vm459_vm0, %v1603_v59  ;;  %1612 = vst [vmem:[#allocation1 + $0x298] sm:$0xff] %v1611_v60  ;;  %v1631_v3 = vrot.slane %v1630_v1, 5 }
  0xb4   :  { %v1640_v4 = vrot.slane %v1639_v2, 5  ;;  %v1644_v5 = vld [vmem:[#allocation0 + $0x2c7] ss:$-1 sm:$0xff]  ;;  %v1653_v6 = vld [vmem:[#allocation0 + $0x2b7] ss:$-1 sm:$0xff]  ;;  %1620 = vst.msk [vmem:[#allocation1 + $0x298] sm:$0xff] %vm459_vm0, %v1616_v63 }
  0xb5   :  { %1627 = vst [vmem:[#allocation1 + $0x2a0] sm:$0xff] %v1626_v0  ;;  %v1645_v7 = vrot.slane %v1644_v5, 5  ;;  %v1654_v8 = vrot.slane %v1653_v6, 5  ;;  %v1658_v9 = vld [vmem:[#allocation0 + $0x2bf] ss:$-1 sm:$0xff] }
  0xb6   :  { %v1666_v10 = vld [vmem:[#allocation0 + $0x2af] ss:$-1 sm:$0xff]  ;;  %1635 = vst.msk [vmem:[#allocation1 + $0x2a0] sm:$0xff] %vm459_vm0, %v1631_v3  ;;  %1641 = vst [vmem:[#allocation1 + $0x2a8] sm:$0xff] %v1640_v4  ;;  %v1659_v11 = vrot.slane %v1658_v9, 5 }
  0xb7   :  { %v1667_v12 = vrot.slane %v1666_v10, 5  ;;  %v1671_v13 = vld [vmem:[#allocation0 + $0x2b7] ss:$-1 sm:$0xff]  ;;  %v1681_v14 = vld [vmem:[#allocation0 + $0x29f] ss:$-1 sm:$0xff]  ;;  %1649 = vst.msk [vmem:[#allocation1 + $0x2a8] sm:$0xff] %vm459_vm0, %v1645_v7 }
  0xb8   :  { %1655 = vst [vmem:[#allocation1 + $0x2b0] sm:$0xff] %v1654_v8  ;;  %v1672_v15 = vrot.slane %v1671_v13, 5  ;;  %v1682_v16 = vrot.slane %v1681_v14, 5  ;;  %v1686_v17 = vld [vmem:[#allocation0 + $0x2a7] ss:$-1 sm:$0xff] }
  0xb9   :  { %v1695_v18 = vld [vmem:[#allocation0 + $0x297] ss:$-1 sm:$0xff]  ;;  %1663 = vst.msk [vmem:[#allocation1 + $0x2b0] sm:$0xff] %vm459_vm0, %v1659_v11  ;;  %1668 = vst [vmem:[#allocation1 + $0x2b8] sm:$0xff] %v1667_v12  ;;  %v1687_v19 = vrot.slane %v1686_v17, 5 }
  0xba   :  { %v1696_v20 = vrot.slane %v1695_v18, 5  ;;  %v1700_v21 = vld [vmem:[#allocation0 + $0x29f] ss:$-1 sm:$0xff]  ;;  %v1709_v22 = vld [vmem:[#allocation0 + $0x28f] ss:$-1 sm:$0xff]  ;;  %1676 = vst.msk [vmem:[#allocation1 + $0x2b8] sm:$0xff] %vm459_vm0, %v1672_v15 }
  0xbb   :  { %1683 = vst [vmem:[#allocation1 + $0x2c0] sm:$0xff] %v1682_v16  ;;  %v1701_v23 = vrot.slane %v1700_v21, 5  ;;  %v1710_v24 = vrot.slane %v1709_v22, 5  ;;  %v1714_v25 = vld [vmem:[#allocation0 + $0x297] ss:$-1 sm:$0xff]  ;;  %v2136_v16 = vld [vmem:[#allocation1 + $0x8] sm:$0xff] }
  0xbc   :  { %v1722_v26 = vld [vmem:[#allocation0 + $0x287] ss:$-1 sm:$0xff]  ;;  %1691 = vst.msk [vmem:[#allocation1 + $0x2c0] sm:$0xff] %vm459_vm0, %v1687_v19  ;;  %1697 = vst [vmem:[#allocation1 + $0x2c8] sm:$0xff] %v1696_v20  ;;  %v1715_v27 = vrot.slane %v1714_v25, 5  ;;  %v2134_v15 = vld [vmem:[#allocation1] sm:$0xff] }
  0xbd   :  { %v1723_v28 = vrot.slane %v1722_v26, 5  ;;  %v1727_v29 = vld [vmem:[#allocation0 + $0x28f] ss:$-1 sm:$0xff]  ;;  %v1737_v30 = vld [vmem:[#allocation0 + $0x277] ss:$-1 sm:$0xff]  ;;  %1705 = vst.msk [vmem:[#allocation1 + $0x2c8] sm:$0xff] %vm459_vm0, %v1701_v23  ;;  %2135 = vst [vmem:[%s3656_s1] sm:$0xff] %v2134_v15 }
  0xbe   :  { %1711 = vst [vmem:[#allocation1 + $0x2d0] sm:$0xff] %v1710_v24  ;;  %v1728_v31 = vrot.slane %v1727_v29, 5  ;;  %v1738_v32 = vrot.slane %v1737_v30, 5  ;;  %v1742_v34 = vld [vmem:[#allocation0 + $0x27f] ss:$-1 sm:$0xff]  ;;  %2137 = vst [vmem:[%s3656_s1 + $0x8] sm:$0xff] %v2136_v16 }
  0xbf   :  { %v1751_v35 = vld [vmem:[#allocation0 + $0x26f] ss:$-1 sm:$0xff]  ;;  %1719 = vst.msk [vmem:[#allocation1 + $0x2d0] sm:$0xff] %vm459_vm0, %v1715_v27  ;;  %1724 = vst [vmem:[#allocation1 + $0x2d8] sm:$0xff] %v1723_v28  ;;  %v1743_v36 = vrot.slane %v1742_v34, 5  ;;  %v2138_v18 = vld [vmem:[#allocation1 + $0x10] sm:$0xff] }
  0xc0   :  { %v1752_v37 = vrot.slane %v1751_v35, 5  ;;  %v1756_v38 = vld [vmem:[#allocation0 + $0x277] ss:$-1 sm:$0xff]  ;;  %v1765_v39 = vld [vmem:[#allocation0 + $0x267] ss:$-1 sm:$0xff]  ;;  %1732 = vst.msk [vmem:[#allocation1 + $0x2d8] sm:$0xff] %vm459_vm0, %v1728_v31 }
  0xc1   :  { %1739 = vst [vmem:[#allocation1 + $0x2e0] sm:$0xff] %v1738_v32  ;;  %v1757_v40 = vrot.slane %v1756_v38, 5  ;;  %v1766_v41 = vrot.slane %v1765_v39, 5  ;;  %v1770_v42 = vld [vmem:[#allocation0 + $0x26f] ss:$-1 sm:$0xff]  ;;  %v2142_v20 = vld [vmem:[#allocation1 + $0x20] sm:$0xff] }
  0xc2   :  { %v1778_v43 = vld [vmem:[#allocation0 + $0x25f] ss:$-1 sm:$0xff]  ;;  %1747 = vst.msk [vmem:[#allocation1 + $0x2e0] sm:$0xff] %vm459_vm0, %v1743_v36  ;;  %1753 = vst [vmem:[#allocation1 + $0x2e8] sm:$0xff] %v1752_v37  ;;  %v1771_v44 = vrot.slane %v1770_v42, 5  ;;  %v2140_v19 = vld [vmem:[#allocation1 + $0x18] sm:$0xff] }
  0xc3   :  { %v1779_v45 = vrot.slane %v1778_v43, 5  ;;  %v1783_v46 = vld [vmem:[#allocation0 + $0x267] ss:$-1 sm:$0xff]  ;;  %v1793_v47 = vld [vmem:[#allocation0 + $0x24f] ss:$-1 sm:$0xff]  ;;  %1761 = vst.msk [vmem:[#allocation1 + $0x2e8] sm:$0xff] %vm459_vm0, %v1757_v40 }
  0xc4   :  { %1767 = vst [vmem:[#allocation1 + $0x2f0] sm:$0xff] %v1766_v41  ;;  %v1784_v48 = vrot.slane %v1783_v46, 5  ;;  %v1794_v49 = vrot.slane %v1793_v47, 5  ;;  %v1798_v50 = vld [vmem:[#allocation0 + $0x257] ss:$-1 sm:$0xff]  ;;  %2139 = vst [vmem:[%s3656_s1 + $0x10] sm:$0xff] %v2138_v18 }
  0xc5   :  { %v1807_v51 = vld [vmem:[#allocation0 + $0x247] ss:$-1 sm:$0xff]  ;;  %1775 = vst.msk [vmem:[#allocation1 + $0x2f0] sm:$0xff] %vm459_vm0, %v1771_v44  ;;  %1780 = vst [vmem:[#allocation1 + $0x2f8] sm:$0xff] %v1779_v45  ;;  %v1799_v52 = vrot.slane %v1798_v50, 5  ;;  %v2144_v21 = vld [vmem:[#allocation1 + $0x28] sm:$0xff] }
  0xc6   :  { %v1808_v53 = vrot.slane %v1807_v51, 5  ;;  %v1812_v54 = vld [vmem:[#allocation0 + $0x24f] ss:$-1 sm:$0xff]  ;;  %v1821_v55 = vld [vmem:[#allocation0 + $0x23f] ss:$-1 sm:$0xff]  ;;  %1788 = vst.msk [vmem:[#allocation1 + $0x2f8] sm:$0xff] %vm459_vm0, %v1784_v48 }
  0xc7   :  { %1795 = vst [vmem:[#allocation1 + $0x300] sm:$0xff] %v1794_v49  ;;  %v1813_v56 = vrot.slane %v1812_v54, 5  ;;  %v1822_v57 = vrot.slane %v1821_v55, 5  ;;  %v1826_v58 = vld [vmem:[#allocation0 + $0x247] ss:$-1 sm:$0xff]  ;;  %2141 = vst [vmem:[%s3656_s1 + $0x18] sm:$0xff] %v2140_v19 }
  0xc8   :  { %v1834_v59 = vld [vmem:[#allocation0 + $0x237] ss:$-1 sm:$0xff]  ;;  %1803 = vst.msk [vmem:[#allocation1 + $0x300] sm:$0xff] %vm459_vm0, %v1799_v52  ;;  %1809 = vst [vmem:[#allocation1 + $0x308] sm:$0xff] %v1808_v53  ;;  %v1827_v60 = vrot.slane %v1826_v58, 5  ;;  %v2146_v22 = vld [vmem:[#allocation1 + $0x30] sm:$0xff] }
  0xc9   :  { %v1835_v61 = vrot.slane %v1834_v59, 5  ;;  %v1839_v62 = vld [vmem:[#allocation0 + $0x23f] ss:$-1 sm:$0xff]  ;;  %v1849_v63 = vld [vmem:[#allocation0 + $0x227] ss:$-1 sm:$0xff]  ;;  %1817 = vst.msk [vmem:[#allocation1 + $0x308] sm:$0xff] %vm459_vm0, %v1813_v56 }
  0xca   :  { %1823 = vst [vmem:[#allocation1 + $0x310] sm:$0xff] %v1822_v57  ;;  %v1840_v0 = vrot.slane %v1839_v62, 5  ;;  %v1850_v1 = vrot.slane %v1849_v63, 5  ;;  %v1854_v2 = vld [vmem:[#allocation0 + $0x22f] ss:$-1 sm:$0xff]  ;;  %2143 = vst [vmem:[%s3656_s1 + $0x20] sm:$0xff] %v2142_v20 }
  0xcb   :  { %v1863_v3 = vld [vmem:[#allocation0 + $0x21f] ss:$-1 sm:$0xff]  ;;  %1831 = vst.msk [vmem:[#allocation1 + $0x310] sm:$0xff] %vm459_vm0, %v1827_v60  ;;  %1836 = vst [vmem:[#allocation1 + $0x318] sm:$0xff] %v1835_v61  ;;  %v1855_v4 = vrot.slane %v1854_v2, 5  ;;  %v2148_v23 = vld [vmem:[#allocation1 + $0x38] sm:$0xff] }
  0xcc   :  { %v1864_v5 = vrot.slane %v1863_v3, 5  ;;  %v1868_v6 = vld [vmem:[#allocation0 + $0x227] ss:$-1 sm:$0xff]  ;;  %v1877_v7 = vld [vmem:[#allocation0 + $0x217] ss:$-1 sm:$0xff]  ;;  %1844 = vst.msk [vmem:[#allocation1 + $0x318] sm:$0xff] %vm459_vm0, %v1840_v0 }
  0xcd   :  { %1851 = vst [vmem:[#allocation1 + $0x320] sm:$0xff] %v1850_v1  ;;  %v1869_v8 = vrot.slane %v1868_v6, 5  ;;  %v1878_v9 = vrot.slane %v1877_v7, 5  ;;  %v1882_v10 = vld [vmem:[#allocation0 + $0x21f] ss:$-1 sm:$0xff]  ;;  %2145 = vst [vmem:[%s3656_s1 + $0x28] sm:$0xff] %v2144_v21 }
  0xce   :  { %v1890_v11 = vld [vmem:[#allocation0 + $0x20f] ss:$-1 sm:$0xff]  ;;  %1859 = vst.msk [vmem:[#allocation1 + $0x320] sm:$0xff] %vm459_vm0, %v1855_v4  ;;  %1865 = vst [vmem:[#allocation1 + $0x328] sm:$0xff] %v1864_v5  ;;  %v1883_v12 = vrot.slane %v1882_v10, 5  ;;  %v2152_v24 = vld [vmem:[#allocation1 + $0x48] sm:$0xff] }
  0xcf   :  { %v1891_v13 = vrot.slane %v1890_v11, 5  ;;  %v1895_v14 = vld [vmem:[#allocation0 + $0x217] ss:$-1 sm:$0xff]  ;;  %1873 = vst.msk [vmem:[#allocation1 + $0x328] sm:$0xff] %vm459_vm0, %v1869_v8  ;;  %1879 = vst [vmem:[#allocation1 + $0x330] sm:$0xff] %v1878_v9  ;;  %v2154_v25 = vld [vmem:[#allocation1 + $0x50] sm:$0xff] }
  0xd0   :  { %v1896_v17 = vrot.slane %v1895_v14, 5  ;;  %1887 = vst.msk [vmem:[#allocation1 + $0x330] sm:$0xff] %vm459_vm0, %v1883_v12  ;;  %2147 = vst [vmem:[%s3656_s1 + $0x30] sm:$0xff] %v2146_v22  ;;  %v2156_v26 = vld [vmem:[#allocation1 + $0x58] sm:$0xff]  ;;  %v2158_v27 = vld [vmem:[#allocation1 + $0x60] sm:$0xff] }
  0xd1   :  { %1892 = vst [vmem:[#allocation1 + $0x338] sm:$0xff] %v1891_v13  ;;  %2149 = vst [vmem:[%s3656_s1 + $0x38] sm:$0xff] %v2148_v23  ;;  %v2160_v28 = vld [vmem:[#allocation1 + $0x68] sm:$0xff]  ;;  %v2162_v29 = vld [vmem:[#allocation1 + $0x70] sm:$0xff] }
  0xd2   :  { %1900 = vst.msk [vmem:[#allocation1 + $0x338] sm:$0xff] %vm459_vm0, %v1896_v17  ;;  %2153 = vst [vmem:[%s3656_s1 + $0x48] sm:$0xff] %v2152_v24  ;;  %v2164_v30 = vld [vmem:[#allocation1 + $0x78] sm:$0xff]  ;;  %v2166_v31 = vld [vmem:[#allocation1 + $0x80] sm:$0xff] }
  0xd3   :  { %2155 = vst [vmem:[%s3656_s1 + $0x50] sm:$0xff] %v2154_v25  ;;  %2157 = vst [vmem:[%s3656_s1 + $0x58] sm:$0xff] %v2156_v26  ;;  %v2168_v32 = vld [vmem:[#allocation1 + $0x88] sm:$0xff]  ;;  %v2170_v34 = vld [vmem:[#allocation1 + $0x90] sm:$0xff] }
  0xd4   :  { %2159 = vst [vmem:[%s3656_s1 + $0x60] sm:$0xff] %v2158_v27  ;;  %2161 = vst [vmem:[%s3656_s1 + $0x68] sm:$0xff] %v2160_v28  ;;  %v2172_v35 = vld [vmem:[#allocation1 + $0x98] sm:$0xff]  ;;  %v2174_v36 = vld [vmem:[#allocation1 + $0xa0] sm:$0xff] }
  0xd5   :  { %2163 = vst [vmem:[%s3656_s1 + $0x70] sm:$0xff] %v2162_v29  ;;  %2165 = vst [vmem:[%s3656_s1 + $0x78] sm:$0xff] %v2164_v30  ;;  %v2176_v37 = vld [vmem:[#allocation1 + $0xa8] sm:$0xff]  ;;  %v2178_v38 = vld [vmem:[#allocation1 + $0xb0] sm:$0xff] }
  0xd6   :  { %2167 = vst [vmem:[%s3656_s1 + $0x80] sm:$0xff] %v2166_v31  ;;  %2169 = vst [vmem:[%s3656_s1 + $0x88] sm:$0xff] %v2168_v32  ;;  %v2180_v39 = vld [vmem:[#allocation1 + $0xb8] sm:$0xff]  ;;  %v2182_v40 = vld [vmem:[#allocation1 + $0xc0] sm:$0xff] }
  0xd7   :  { %2171 = vst [vmem:[%s3656_s1 + $0x90] sm:$0xff] %v2170_v34  ;;  %2173 = vst [vmem:[%s3656_s1 + $0x98] sm:$0xff] %v2172_v35  ;;  %v2184_v41 = vld [vmem:[#allocation1 + $0xc8] sm:$0xff]  ;;  %v2186_v42 = vld [vmem:[#allocation1 + $0xd0] sm:$0xff] }
  0xd8   :  { %2175 = vst [vmem:[%s3656_s1 + $0xa0] sm:$0xff] %v2174_v36  ;;  %2177 = vst [vmem:[%s3656_s1 + $0xa8] sm:$0xff] %v2176_v37  ;;  %v2188_v43 = vld [vmem:[#allocation1 + $0xd8] sm:$0xff]  ;;  %v2190_v44 = vld [vmem:[#allocation1 + $0xe0] sm:$0xff] }
  0xd9   :  { %2179 = vst [vmem:[%s3656_s1 + $0xb0] sm:$0xff] %v2178_v38  ;;  %2181 = vst [vmem:[%s3656_s1 + $0xb8] sm:$0xff] %v2180_v39  ;;  %v2192_v45 = vld [vmem:[#allocation1 + $0xe8] sm:$0xff]  ;;  %v2194_v46 = vld [vmem:[#allocation1 + $0xf0] sm:$0xff] }
  0xda   :  { %2183 = vst [vmem:[%s3656_s1 + $0xc0] sm:$0xff] %v2182_v40  ;;  %2185 = vst [vmem:[%s3656_s1 + $0xc8] sm:$0xff] %v2184_v41  ;;  %v2196_v47 = vld [vmem:[#allocation1 + $0xf8] sm:$0xff]  ;;  %v2198_v48 = vld [vmem:[#allocation1 + $0x100] sm:$0xff] }
  0xdb   :  { %2187 = vst [vmem:[%s3656_s1 + $0xd0] sm:$0xff] %v2186_v42  ;;  %2189 = vst [vmem:[%s3656_s1 + $0xd8] sm:$0xff] %v2188_v43  ;;  %v2200_v49 = vld [vmem:[#allocation1 + $0x108] sm:$0xff]  ;;  %v2202_v50 = vld [vmem:[#allocation1 + $0x110] sm:$0xff] }
  0xdc   :  { %2191 = vst [vmem:[%s3656_s1 + $0xe0] sm:$0xff] %v2190_v44  ;;  %2193 = vst [vmem:[%s3656_s1 + $0xe8] sm:$0xff] %v2192_v45  ;;  %v2204_v51 = vld [vmem:[#allocation1 + $0x118] sm:$0xff]  ;;  %v2206_v52 = vld [vmem:[#allocation1 + $0x120] sm:$0xff] }
  0xdd   :  { %2195 = vst [vmem:[%s3656_s1 + $0xf0] sm:$0xff] %v2194_v46  ;;  %2197 = vst [vmem:[%s3656_s1 + $0xf8] sm:$0xff] %v2196_v47  ;;  %v2208_v53 = vld [vmem:[#allocation1 + $0x128] sm:$0xff]  ;;  %v2210_v54 = vld [vmem:[#allocation1 + $0x130] sm:$0xff] }
  0xde   :  { %2199 = vst [vmem:[%s3656_s1 + $0x100] sm:$0xff] %v2198_v48  ;;  %2201 = vst [vmem:[%s3656_s1 + $0x108] sm:$0xff] %v2200_v49  ;;  %v2212_v55 = vld [vmem:[#allocation1 + $0x138] sm:$0xff]  ;;  %v2214_v56 = vld [vmem:[#allocation1 + $0x140] sm:$0xff] }
  0xdf   :  { %2203 = vst [vmem:[%s3656_s1 + $0x110] sm:$0xff] %v2202_v50  ;;  %2205 = vst [vmem:[%s3656_s1 + $0x118] sm:$0xff] %v2204_v51  ;;  %v2216_v57 = vld [vmem:[#allocation1 + $0x148] sm:$0xff]  ;;  %v2218_v58 = vld [vmem:[#allocation1 + $0x150] sm:$0xff] }
  0xe0   :  { %2207 = vst [vmem:[%s3656_s1 + $0x120] sm:$0xff] %v2206_v52  ;;  %2209 = vst [vmem:[%s3656_s1 + $0x128] sm:$0xff] %v2208_v53  ;;  %v2220_v59 = vld [vmem:[#allocation1 + $0x158] sm:$0xff]  ;;  %v2222_v60 = vld [vmem:[#allocation1 + $0x160] sm:$0xff] }
  0xe1   :  { %2211 = vst [vmem:[%s3656_s1 + $0x130] sm:$0xff] %v2210_v54  ;;  %2213 = vst [vmem:[%s3656_s1 + $0x138] sm:$0xff] %v2212_v55  ;;  %v2224_v61 = vld [vmem:[#allocation1 + $0x168] sm:$0xff]  ;;  %v2226_v62 = vld [vmem:[#allocation1 + $0x170] sm:$0xff] }
  0xe2   :  { %2215 = vst [vmem:[%s3656_s1 + $0x140] sm:$0xff] %v2214_v56  ;;  %2217 = vst [vmem:[%s3656_s1 + $0x148] sm:$0xff] %v2216_v57  ;;  %v2228_v63 = vld [vmem:[#allocation1 + $0x178] sm:$0xff]  ;;  %v2230_v0 = vld [vmem:[#allocation1 + $0x180] sm:$0xff] }
  0xe3   :  { %2219 = vst [vmem:[%s3656_s1 + $0x150] sm:$0xff] %v2218_v58  ;;  %2221 = vst [vmem:[%s3656_s1 + $0x158] sm:$0xff] %v2220_v59  ;;  %v2232_v1 = vld [vmem:[#allocation1 + $0x188] sm:$0xff]  ;;  %v2234_v2 = vld [vmem:[#allocation1 + $0x190] sm:$0xff] }
  0xe4   :  { %2223 = vst [vmem:[%s3656_s1 + $0x160] sm:$0xff] %v2222_v60  ;;  %2225 = vst [vmem:[%s3656_s1 + $0x168] sm:$0xff] %v2224_v61  ;;  %v2236_v3 = vld [vmem:[#allocation1 + $0x198] sm:$0xff]  ;;  %v2238_v4 = vld [vmem:[#allocation1 + $0x1a0] sm:$0xff] }
  0xe5   :  { %2227 = vst [vmem:[%s3656_s1 + $0x170] sm:$0xff] %v2226_v62  ;;  %2229 = vst [vmem:[%s3656_s1 + $0x178] sm:$0xff] %v2228_v63  ;;  %v2240_v5 = vld [vmem:[#allocation1 + $0x1a8] sm:$0xff]  ;;  %v2242_v6 = vld [vmem:[#allocation1 + $0x1b0] sm:$0xff] }
  0xe6   :  { %2231 = vst [vmem:[%s3656_s1 + $0x180] sm:$0xff] %v2230_v0  ;;  %2233 = vst [vmem:[%s3656_s1 + $0x188] sm:$0xff] %v2232_v1  ;;  %v2244_v7 = vld [vmem:[#allocation1 + $0x1b8] sm:$0xff]  ;;  %v2246_v8 = vld [vmem:[#allocation1 + $0x1c0] sm:$0xff] }
  0xe7   :  { %2235 = vst [vmem:[%s3656_s1 + $0x190] sm:$0xff] %v2234_v2  ;;  %2237 = vst [vmem:[%s3656_s1 + $0x198] sm:$0xff] %v2236_v3  ;;  %v2248_v9 = vld [vmem:[#allocation1 + $0x1c8] sm:$0xff]  ;;  %v2250_v10 = vld [vmem:[#allocation1 + $0x1d0] sm:$0xff] }
  0xe8   :  { %2239 = vst [vmem:[%s3656_s1 + $0x1a0] sm:$0xff] %v2238_v4  ;;  %2241 = vst [vmem:[%s3656_s1 + $0x1a8] sm:$0xff] %v2240_v5  ;;  %v2252_v11 = vld [vmem:[#allocation1 + $0x1d8] sm:$0xff]  ;;  %v2254_v12 = vld [vmem:[#allocation1 + $0x1e0] sm:$0xff] }
  0xe9   :  { %2243 = vst [vmem:[%s3656_s1 + $0x1b0] sm:$0xff] %v2242_v6  ;;  %2245 = vst [vmem:[%s3656_s1 + $0x1b8] sm:$0xff] %v2244_v7  ;;  %v2256_v13 = vld [vmem:[#allocation1 + $0x1e8] sm:$0xff]  ;;  %v2258_v14 = vld [vmem:[#allocation1 + $0x1f0] sm:$0xff] }
  0xea   :  { %2247 = vst [vmem:[%s3656_s1 + $0x1c0] sm:$0xff] %v2246_v8  ;;  %2249 = vst [vmem:[%s3656_s1 + $0x1c8] sm:$0xff] %v2248_v9  ;;  %v2260_v15 = vld [vmem:[#allocation1 + $0x1f8] sm:$0xff]  ;;  %v2262_v16 = vld [vmem:[#allocation1 + $0x200] sm:$0xff] }
  0xeb   :  { %2251 = vst [vmem:[%s3656_s1 + $0x1d0] sm:$0xff] %v2250_v10  ;;  %2253 = vst [vmem:[%s3656_s1 + $0x1d8] sm:$0xff] %v2252_v11  ;;  %v2264_v17 = vld [vmem:[#allocation1 + $0x208] sm:$0xff]  ;;  %v2266_v18 = vld [vmem:[#allocation1 + $0x210] sm:$0xff] }
  0xec   :  { %2255 = vst [vmem:[%s3656_s1 + $0x1e0] sm:$0xff] %v2254_v12  ;;  %2257 = vst [vmem:[%s3656_s1 + $0x1e8] sm:$0xff] %v2256_v13  ;;  %v2268_v19 = vld [vmem:[#allocation1 + $0x218] sm:$0xff]  ;;  %v2270_v20 = vld [vmem:[#allocation1 + $0x220] sm:$0xff] }
  0xed   :  { %2259 = vst [vmem:[%s3656_s1 + $0x1f0] sm:$0xff] %v2258_v14  ;;  %2261 = vst [vmem:[%s3656_s1 + $0x1f8] sm:$0xff] %v2260_v15  ;;  %v2272_v21 = vld [vmem:[#allocation1 + $0x228] sm:$0xff]  ;;  %v2274_v22 = vld [vmem:[#allocation1 + $0x230] sm:$0xff] }
  0xee   :  { %2263 = vst [vmem:[%s3656_s1 + $0x200] sm:$0xff] %v2262_v16  ;;  %2265 = vst [vmem:[%s3656_s1 + $0x208] sm:$0xff] %v2264_v17  ;;  %v2276_v23 = vld [vmem:[#allocation1 + $0x238] sm:$0xff]  ;;  %v2280_v24 = vld [vmem:[#allocation1 + $0x248] sm:$0xff] }
  0xef   :  { %2267 = vst [vmem:[%s3656_s1 + $0x210] sm:$0xff] %v2266_v18  ;;  %2269 = vst [vmem:[%s3656_s1 + $0x218] sm:$0xff] %v2268_v19  ;;  %v2282_v25 = vld [vmem:[#allocation1 + $0x250] sm:$0xff]  ;;  %v2284_v26 = vld [vmem:[#allocation1 + $0x258] sm:$0xff] }
  0xf0   :  { %2271 = vst [vmem:[%s3656_s1 + $0x220] sm:$0xff] %v2270_v20  ;;  %2273 = vst [vmem:[%s3656_s1 + $0x228] sm:$0xff] %v2272_v21  ;;  %v2286_v27 = vld [vmem:[#allocation1 + $0x260] sm:$0xff]  ;;  %v2288_v28 = vld [vmem:[#allocation1 + $0x268] sm:$0xff] }
  0xf1   :  { %2275 = vst [vmem:[%s3656_s1 + $0x230] sm:$0xff] %v2274_v22  ;;  %2277 = vst [vmem:[%s3656_s1 + $0x238] sm:$0xff] %v2276_v23  ;;  %v2290_v29 = vld [vmem:[#allocation1 + $0x270] sm:$0xff]  ;;  %v2292_v30 = vld [vmem:[#allocation1 + $0x278] sm:$0xff] }
  0xf2   :  { %2281 = vst [vmem:[%s3656_s1 + $0x248] sm:$0xff] %v2280_v24  ;;  %2283 = vst [vmem:[%s3656_s1 + $0x250] sm:$0xff] %v2282_v25  ;;  %v2294_v31 = vld [vmem:[#allocation1 + $0x280] sm:$0xff]  ;;  %v2296_v32 = vld [vmem:[#allocation1 + $0x288] sm:$0xff] }
  0xf3   :  { %2285 = vst [vmem:[%s3656_s1 + $0x258] sm:$0xff] %v2284_v26  ;;  %2287 = vst [vmem:[%s3656_s1 + $0x260] sm:$0xff] %v2286_v27  ;;  %v2298_v34 = vld [vmem:[#allocation1 + $0x290] sm:$0xff]  ;;  %v2300_v35 = vld [vmem:[#allocation1 + $0x298] sm:$0xff] }
  0xf4   :  { %2289 = vst [vmem:[%s3656_s1 + $0x268] sm:$0xff] %v2288_v28  ;;  %2291 = vst [vmem:[%s3656_s1 + $0x270] sm:$0xff] %v2290_v29  ;;  %v2302_v36 = vld [vmem:[#allocation1 + $0x2a0] sm:$0xff]  ;;  %v2304_v37 = vld [vmem:[#allocation1 + $0x2a8] sm:$0xff] }
  0xf5   :  { %2293 = vst [vmem:[%s3656_s1 + $0x278] sm:$0xff] %v2292_v30  ;;  %2295 = vst [vmem:[%s3656_s1 + $0x280] sm:$0xff] %v2294_v31  ;;  %v2306_v38 = vld [vmem:[#allocation1 + $0x2b0] sm:$0xff]  ;;  %v2308_v39 = vld [vmem:[#allocation1 + $0x2b8] sm:$0xff] }
  0xf6   :  { %2297 = vst [vmem:[%s3656_s1 + $0x288] sm:$0xff] %v2296_v32  ;;  %2299 = vst [vmem:[%s3656_s1 + $0x290] sm:$0xff] %v2298_v34  ;;  %v2310_v40 = vld [vmem:[#allocation1 + $0x2c0] sm:$0xff]  ;;  %v2312_v41 = vld [vmem:[#allocation1 + $0x2c8] sm:$0xff] }
  0xf7   :  { %2301 = vst [vmem:[%s3656_s1 + $0x298] sm:$0xff] %v2300_v35  ;;  %2303 = vst [vmem:[%s3656_s1 + $0x2a0] sm:$0xff] %v2302_v36  ;;  %v2314_v42 = vld [vmem:[#allocation1 + $0x2d0] sm:$0xff]  ;;  %v2316_v43 = vld [vmem:[#allocation1 + $0x2d8] sm:$0xff] }
  0xf8   :  { %2305 = vst [vmem:[%s3656_s1 + $0x2a8] sm:$0xff] %v2304_v37  ;;  %2307 = vst [vmem:[%s3656_s1 + $0x2b0] sm:$0xff] %v2306_v38  ;;  %v2318_v44 = vld [vmem:[#allocation1 + $0x2e0] sm:$0xff]  ;;  %v2320_v45 = vld [vmem:[#allocation1 + $0x2e8] sm:$0xff] }
  0xf9   :  { %2309 = vst [vmem:[%s3656_s1 + $0x2b8] sm:$0xff] %v2308_v39  ;;  %2311 = vst [vmem:[%s3656_s1 + $0x2c0] sm:$0xff] %v2310_v40  ;;  %v2322_v46 = vld [vmem:[#allocation1 + $0x2f0] sm:$0xff]  ;;  %v2324_v47 = vld [vmem:[#allocation1 + $0x2f8] sm:$0xff] }
  0xfa   :  { %2313 = vst [vmem:[%s3656_s1 + $0x2c8] sm:$0xff] %v2312_v41  ;;  %2315 = vst [vmem:[%s3656_s1 + $0x2d0] sm:$0xff] %v2314_v42  ;;  %v2326_v48 = vld [vmem:[#allocation1 + $0x300] sm:$0xff]  ;;  %v2328_v49 = vld [vmem:[#allocation1 + $0x308] sm:$0xff] }
  0xfb   :  { %2317 = vst [vmem:[%s3656_s1 + $0x2d8] sm:$0xff] %v2316_v43  ;;  %2319 = vst [vmem:[%s3656_s1 + $0x2e0] sm:$0xff] %v2318_v44  ;;  %v2330_v50 = vld [vmem:[#allocation1 + $0x310] sm:$0xff]  ;;  %v2332_v51 = vld [vmem:[#allocation1 + $0x318] sm:$0xff] }
  0xfc   :  { %2321 = vst [vmem:[%s3656_s1 + $0x2e8] sm:$0xff] %v2320_v45  ;;  %2323 = vst [vmem:[%s3656_s1 + $0x2f0] sm:$0xff] %v2322_v46  ;;  %v2334_v52 = vld [vmem:[#allocation1 + $0x320] sm:$0xff]  ;;  %v2336_v53 = vld [vmem:[#allocation1 + $0x328] sm:$0xff] }
  0xfd   :  { %2325 = vst [vmem:[%s3656_s1 + $0x2f8] sm:$0xff] %v2324_v47  ;;  %2327 = vst [vmem:[%s3656_s1 + $0x300] sm:$0xff] %v2326_v48  ;;  %v2338_v54 = vld [vmem:[#allocation1 + $0x330] sm:$0xff]  ;;  %v2340_v55 = vld [vmem:[#allocation1 + $0x338] sm:$0xff] }
  0xfe   :  { %2329 = vst [vmem:[%s3656_s1 + $0x308] sm:$0xff] %v2328_v49  ;;  %2331 = vst [vmem:[%s3656_s1 + $0x310] sm:$0xff] %v2330_v50 }
  0xff   :  { %2333 = vst [vmem:[%s3656_s1 + $0x318] sm:$0xff] %v2332_v51  ;;  %2335 = vst [vmem:[%s3656_s1 + $0x320] sm:$0xff] %v2334_v52 }
 0x100   :  { %2337 = vst [vmem:[%s3656_s1 + $0x328] sm:$0xff] %v2336_v53  ;;  %2339 = vst [vmem:[%s3656_s1 + $0x330] sm:$0xff] %v2338_v54 }
 0x101   :  { %2341 = vst [vmem:[%s3656_s1 + $0x338] sm:$0xff] %v2340_v55 }

// kernel: reverse.1
= control target key start
LH: loop header
LB: loop body
LE: loop exit
PB: predicated region body
PF: predicated region fallthrough
CT: control target
= control target key end

     0   :  { %v151_v26 = vld [vmem:[#allocation1 + $0x32] sm:$0x1]  ;;  %v161_v27 = vld [vmem:[#allocation1 + $0x30] sm:$0x1]  ;;  %v171_v28 = vld [vmem:[#allocation1 + $0x2e] sm:$0x1]  ;;  %s1267_s0 = inlined_call_operand.vmem [shape: f32[2,32,1,13], index: 0, kind: input, shape index: {}]   ;;  %s1268_s1 = inlined_call_operand.vmem [shape: f32[2,32,1,13], index: 1, kind: output, shape index: {}]  }
   0x1   :  { %v18_v0 = vld [vmem:[%s1267_s0] sm:$0x1]  ;;  %v20_v1 = vld [vmem:[%s1267_s0 + $0x1] sm:$0x1]  ;;  %v22_v2 = vld [vmem:[%s1267_s0 + $0x2] sm:$0x1] }
   0x2   :  { %19 = vst [vmem:[#allocation1 + $0x1] sm:$0x1] %v18_v0  ;;  %21 = vst [vmem:[#allocation1 + $0x3] sm:$0x1] %v20_v1  ;;  %v24_v3 = vld [vmem:[%s1267_s0 + $0x3] sm:$0x1] }
   0x3   :  { %23 = vst [vmem:[#allocation1 + $0x5] sm:$0x1] %v22_v2  ;;  %v26_v4 = vld [vmem:[%s1267_s0 + $0x4] sm:$0x1]  ;;  %v28_v5 = vld [vmem:[%s1267_s0 + $0x5] sm:$0x1] }
   0x4   :  { %25 = vst [vmem:[#allocation1 + $0x7] sm:$0x1] %v24_v3  ;;  %27 = vst [vmem:[#allocation1 + $0x9] sm:$0x1] %v26_v4  ;;  %v30_v6 = vld [vmem:[%s1267_s0 + $0x6] sm:$0x1] }
   0x5   :  { %29 = vst [vmem:[#allocation1 + $0xb] sm:$0x1] %v28_v5  ;;  %v32_v7 = vld [vmem:[%s1267_s0 + $0x7] sm:$0x1]  ;;  %v34_v8 = vld [vmem:[%s1267_s0 + $0x8] sm:$0x1]  ;;  %v409_v5 = vlaneseq }
   0x6   :  { %31 = vst [vmem:[#allocation1 + $0xd] sm:$0x1] %v30_v6  ;;  %33 = vst [vmem:[#allocation1 + $0xf] sm:$0x1] %v32_v7  ;;  %v36_v9 = vld [vmem:[%s1267_s0 + $0x9] sm:$0x1] }
   0x7   :  { %35 = vst [vmem:[#allocation1 + $0x11] sm:$0x1] %v34_v8  ;;  %v38_v10 = vld [vmem:[%s1267_s0 + $0xa] sm:$0x1]  ;;  %v40_v11 = vld [vmem:[%s1267_s0 + $0xb] sm:$0x1] }
   0x8   :  { %37 = vst [vmem:[#allocation1 + $0x13] sm:$0x1] %v36_v9  ;;  %39 = vst [vmem:[#allocation1 + $0x15] sm:$0x1] %v38_v10  ;;  %v42_v12 = vld [vmem:[%s1267_s0 + $0xc] sm:$0x1] }
   0x9   :  { %41 = vst [vmem:[#allocation1 + $0x17] sm:$0x1] %v40_v11  ;;  %v44_v13 = vld [vmem:[%s1267_s0 + $0xd] sm:$0x1]  ;;  %v46_v14 = vld [vmem:[%s1267_s0 + $0xe] sm:$0x1] }
   0xa   :  { %43 = vst [vmem:[#allocation1 + $0x19] sm:$0x1] %v42_v12  ;;  %45 = vst [vmem:[#allocation1 + $0x1b] sm:$0x1] %v44_v13  ;;  %v48_v15 = vld [vmem:[%s1267_s0 + $0xf] sm:$0x1] }
   0xb   :  { %47 = vst [vmem:[#allocation1 + $0x1d] sm:$0x1] %v46_v14  ;;  %v50_v16 = vld [vmem:[%s1267_s0 + $0x10] sm:$0x1]  ;;  %v52_v17 = vld [vmem:[%s1267_s0 + $0x11] sm:$0x1] }
   0xc   :  { %49 = vst [vmem:[#allocation1 + $0x1f] sm:$0x1] %v48_v15  ;;  %51 = vst [vmem:[#allocation1 + $0x21] sm:$0x1] %v50_v16  ;;  %v54_v18 = vld [vmem:[%s1267_s0 + $0x12] sm:$0x1] }
   0xd   :  { %53 = vst [vmem:[#allocation1 + $0x23] sm:$0x1] %v52_v17  ;;  %v56_v19 = vld [vmem:[%s1267_s0 + $0x13] sm:$0x1]  ;;  %v58_v20 = vld [vmem:[%s1267_s0 + $0x14] sm:$0x1] }
   0xe   :  { %55 = vst [vmem:[#allocation1 + $0x25] sm:$0x1] %v54_v18  ;;  %57 = vst [vmem:[#allocation1 + $0x27] sm:$0x1] %v56_v19  ;;  %v60_v21 = vld [vmem:[%s1267_s0 + $0x15] sm:$0x1] }
   0xf   :  { %59 = vst [vmem:[#allocation1 + $0x29] sm:$0x1] %v58_v20  ;;  %v62_v22 = vld [vmem:[%s1267_s0 + $0x16] sm:$0x1]  ;;  %v64_v23 = vld [vmem:[%s1267_s0 + $0x17] sm:$0x1] }
  0x10   :  { %61 = vst [vmem:[#allocation1 + $0x2b] sm:$0x1] %v60_v21  ;;  %63 = vst [vmem:[#allocation1 + $0x2d] sm:$0x1] %v62_v22  ;;  %v66_v24 = vld [vmem:[%s1267_s0 + $0x18] sm:$0x1] }
  0x11   :  { %65 = vst [vmem:[#allocation1 + $0x2f] sm:$0x1] %v64_v23  ;;  %v68_v25 = vld [vmem:[%s1267_s0 + $0x19] sm:$0x1]  ;;  %67 = vst [vmem:[#allocation1 + $0x31] sm:$0x1] %v66_v24 }
  0x12   :  { %69 = vst [vmem:[#allocation1 + $0x33] sm:$0x1] %v68_v25  ;;  %153 = vst [vmem:[#allocation0 + $0x190] sm:$0x1] %v151_v26  ;;  %v181_v29 = vld [vmem:[#allocation1 + $0x2c] sm:$0x1] }
  0x13   :  { %163 = vst [vmem:[#allocation0 + $0x180] sm:$0x1] %v161_v27  ;;  %173 = vst [vmem:[#allocation0 + $0x170] sm:$0x1] %v171_v28  ;;  %v191_v30 = vld [vmem:[#allocation1 + $0x2a] sm:$0x1] }
  0x14   :  { %183 = vst [vmem:[#allocation0 + $0x160] sm:$0x1] %v181_v29  ;;  %v201_v31 = vld [vmem:[#allocation1 + $0x28] sm:$0x1]  ;;  %v211_v32 = vld [vmem:[#allocation1 + $0x26] sm:$0x1] }
  0x15   :  { %193 = vst [vmem:[#allocation0 + $0x150] sm:$0x1] %v191_v30  ;;  %203 = vst [vmem:[#allocation0 + $0x140] sm:$0x1] %v201_v31  ;;  %v221_v33 = vld [vmem:[#allocation1 + $0x24] sm:$0x1] }
  0x16   :  { %213 = vst [vmem:[#allocation0 + $0x130] sm:$0x1] %v211_v32  ;;  %v231_v34 = vld [vmem:[#allocation1 + $0x22] sm:$0x1]  ;;  %v241_v35 = vld [vmem:[#allocation1 + $0x20] sm:$0x1] }
  0x17   :  { %223 = vst [vmem:[#allocation0 + $0x120] sm:$0x1] %v221_v33  ;;  %233 = vst [vmem:[#allocation0 + $0x110] sm:$0x1] %v231_v34  ;;  %v251_v36 = vld [vmem:[#allocation1 + $0x1e] sm:$0x1] }
  0x18   :  { %243 = vst [vmem:[#allocation0 + $0x100] sm:$0x1] %v241_v35  ;;  %v256_v37 = vld [vmem:[#allocation1 + $0x1d] sm:$0x1]  ;;  %v261_v38 = vld [vmem:[#allocation1 + $0x1c] sm:$0x1] }
  0x19   :  { %v226_v39 = vld [vmem:[#allocation1 + $0x23] sm:$0x1]  ;;  %v236_v40 = vld [vmem:[#allocation1 + $0x21] sm:$0x1]  ;;  %v246_v41 = vld [vmem:[#allocation1 + $0x1f] sm:$0x1] }
  0x1a   :  { %253 = vst [vmem:[#allocation0 + $0xf0] sm:$0x1] %v251_v36  ;;  %258 = vst [vmem:[#allocation0 + $0xe8] sm:$0x1] %v256_v37  ;;  %v196_v42 = vld [vmem:[#allocation1 + $0x29] sm:$0x1] }
  0x1b   :  { %263 = vst [vmem:[#allocation0 + $0xe0] sm:$0x1] %v261_v38  ;;  %v206_v43 = vld [vmem:[#allocation1 + $0x27] sm:$0x1]  ;;  %v216_v44 = vld [vmem:[#allocation1 + $0x25] sm:$0x1] }
  0x1c   :  { %228 = vst [vmem:[#allocation0 + $0x118] sm:$0x1] %v226_v39  ;;  %238 = vst [vmem:[#allocation0 + $0x108] sm:$0x1] %v236_v40  ;;  %v166_v45 = vld [vmem:[#allocation1 + $0x2f] sm:$0x1] }
  0x1d   :  { %248 = vst [vmem:[#allocation0 + $0xf8] sm:$0x1] %v246_v41  ;;  %v176_v46 = vld [vmem:[#allocation1 + $0x2d] sm:$0x1]  ;;  %v186_v47 = vld [vmem:[#allocation1 + $0x2b] sm:$0x1] }
  0x1e   :  { %198 = vst [vmem:[#allocation0 + $0x148] sm:$0x1] %v196_v42  ;;  %208 = vst [vmem:[#allocation0 + $0x138] sm:$0x1] %v206_v43  ;;  %v146_v48 = vld [vmem:[#allocation1 + $0x33] sm:$0x1] }
  0x1f   :  { %218 = vst [vmem:[#allocation0 + $0x128] sm:$0x1] %v216_v44  ;;  %v156_v49 = vld [vmem:[#allocation1 + $0x31] sm:$0x1]  ;;  %168 = vst [vmem:[#allocation0 + $0x178] sm:$0x1] %v166_v45 }
  0x20   :  { %178 = vst [vmem:[#allocation0 + $0x168] sm:$0x1] %v176_v46  ;;  %188 = vst [vmem:[#allocation0 + $0x158] sm:$0x1] %v186_v47  ;;  %v266_v50 = vld [vmem:[#allocation1 + $0x1b] sm:$0x1] }
  0x21   :  { %148 = vst [vmem:[#allocation0 + $0x198] sm:$0x1] %v146_v48  ;;  %158 = vst [vmem:[#allocation0 + $0x188] sm:$0x1] %v156_v49  ;;  %v271_v51 = vld [vmem:[#allocation1 + $0x1a] sm:$0x1] }
  0x22   :  { %268 = vst [vmem:[#allocation0 + $0xd8] sm:$0x1] %v266_v50  ;;  %v276_v52 = vld [vmem:[#allocation1 + $0x19] sm:$0x1]  ;;  %v281_v53 = vld [vmem:[#allocation1 + $0x18] sm:$0x1] }
  0x23   :  { %273 = vst [vmem:[#allocation0 + $0xd0] sm:$0x1] %v271_v51  ;;  %278 = vst [vmem:[#allocation0 + $0xc8] sm:$0x1] %v276_v52  ;;  %v286_v54 = vld [vmem:[#allocation1 + $0x17] sm:$0x1] }
  0x24   :  { %283 = vst [vmem:[#allocation0 + $0xc0] sm:$0x1] %v281_v53  ;;  %v291_v55 = vld [vmem:[#allocation1 + $0x16] sm:$0x1]  ;;  %v296_v56 = vld [vmem:[#allocation1 + $0x15] sm:$0x1] }
  0x25   :  { %288 = vst [vmem:[#allocation0 + $0xb8] sm:$0x1] %v286_v54  ;;  %293 = vst [vmem:[#allocation0 + $0xb0] sm:$0x1] %v291_v55  ;;  %v301_v57 = vld [vmem:[#allocation1 + $0x14] sm:$0x1] }
  0x26   :  { %298 = vst [vmem:[#allocation0 + $0xa8] sm:$0x1] %v296_v56  ;;  %v306_v58 = vld [vmem:[#allocation1 + $0x13] sm:$0x1]  ;;  %v311_v59 = vld [vmem:[#allocation1 + $0x12] sm:$0x1] }
  0x27   :  { %303 = vst [vmem:[#allocation0 + $0xa0] sm:$0x1] %v301_v57  ;;  %308 = vst [vmem:[#allocation0 + $0x98] sm:$0x1] %v306_v58  ;;  %v316_v60 = vld [vmem:[#allocation1 + $0x11] sm:$0x1] }
  0x28   :  { %313 = vst [vmem:[#allocation0 + $0x90] sm:$0x1] %v311_v59  ;;  %v321_v61 = vld [vmem:[#allocation1 + $0x10] sm:$0x1]  ;;  %v326_v62 = vld [vmem:[#allocation1 + $0xf] sm:$0x1] }
  0x29   :  { %318 = vst [vmem:[#allocation0 + $0x88] sm:$0x1] %v316_v60  ;;  %323 = vst [vmem:[#allocation0 + $0x80] sm:$0x1] %v321_v61  ;;  %v331_v63 = vld [vmem:[#allocation1 + $0xe] sm:$0x1] }
  0x2a   :  { %328 = vst [vmem:[#allocation0 + $0x78] sm:$0x1] %v326_v62  ;;  %v336_v0 = vld [vmem:[#allocation1 + $0xd] sm:$0x1]  ;;  %v341_v1 = vld [vmem:[#allocation1 + $0xc] sm:$0x1] }
  0x2b   :  { %333 = vst [vmem:[#allocation0 + $0x70] sm:$0x1] %v331_v63  ;;  %338 = vst [vmem:[#allocation0 + $0x68] sm:$0x1] %v336_v0  ;;  %v346_v2 = vld [vmem:[#allocation1 + $0xb] sm:$0x1] }
  0x2c   :  { %343 = vst [vmem:[#allocation0 + $0x60] sm:$0x1] %v341_v1  ;;  %v351_v3 = vld [vmem:[#allocation1 + $0xa] sm:$0x1]  ;;  %v356_v4 = vld [vmem:[#allocation1 + $0x9] sm:$0x1] }
  0x2d   :  { %348 = vst [vmem:[#allocation0 + $0x58] sm:$0x1] %v346_v2  ;;  %353 = vst [vmem:[#allocation0 + $0x50] sm:$0x1] %v351_v3  ;;  %v361_v6 = vld [vmem:[#allocation1 + $0x8] sm:$0x1] }
  0x2e   :  { %358 = vst [vmem:[#allocation0 + $0x48] sm:$0x1] %v356_v4  ;;  %v366_v7 = vld [vmem:[#allocation1 + $0x7] sm:$0x1]  ;;  %v371_v8 = vld [vmem:[#allocation1 + $0x6] sm:$0x1] }
  0x2f   :  { %363 = vst [vmem:[#allocation0 + $0x40] sm:$0x1] %v361_v6  ;;  %368 = vst [vmem:[#allocation0 + $0x38] sm:$0x1] %v366_v7  ;;  %v376_v9 = vld [vmem:[#allocation1 + $0x5] sm:$0x1] }
  0x30   :  { %373 = vst [vmem:[#allocation0 + $0x30] sm:$0x1] %v371_v8  ;;  %v381_v10 = vld [vmem:[#allocation1 + $0x4] sm:$0x1]  ;;  %v386_v11 = vld [vmem:[#allocation1 + $0x3] sm:$0x1] }
  0x31   :  { %378 = vst [vmem:[#allocation0 + $0x28] sm:$0x1] %v376_v9  ;;  %383 = vst [vmem:[#allocation0 + $0x20] sm:$0x1] %v381_v10  ;;  %v391_v12 = vld [vmem:[#allocation1 + $0x2] sm:$0x1] }
  0x32   :  { %388 = vst [vmem:[#allocation0 + $0x18] sm:$0x1] %v386_v11  ;;  %v395_v13 = vld [vmem:[#allocation1 + $0x1] sm:$0x1]  ;;  %v398_v14 = vld [vmem:[#allocation1] sm:$0x1] }
  0x33   :  { %393 = vst [vmem:[#allocation0 + $0x10] sm:$0x1] %v391_v12  ;;  %397 = vst [vmem:[#allocation0 + $0x8] sm:$0x1] %v395_v13  ;;  %v402_v15 = vld [vmem:[#allocation0 + $0xc7] ss:$-1 sm:$0xff] }
  0x34   :  { %399 = vst [vmem:[#allocation0] sm:$0x1] %v398_v14  ;;  %v407_v16 = vld [vmem:[#allocation0 + $0xcf] ss:$-1 sm:$0xff]  ;;  %v1200_v17 = vshrl.u32 %v409_v5, 7  ;;  %v403_v18 = vrot.slane %v402_v15, 7 }
  0x35   :  { %v408_v19 = vrot.slane %v407_v16, 7  ;;  %v416_v20 = vld [vmem:[#allocation0 + $0xb7] ss:$-1 sm:$0xff]  ;;  %v421_v21 = vld [vmem:[#allocation0 + $0xbf] ss:$-1 sm:$0xff] }
  0x36   :  { %vm411_vm0 = vcmp.lt.s32.totalorder %v1200_v17, 1  ;;  %v417_v22 = vrot.slane %v416_v20, 7  ;;  %v422_v23 = vrot.slane %v421_v21, 7  ;;  %v430_v24 = vld [vmem:[#allocation0 + $0xa7] ss:$-1 sm:$0xff]  ;;  %404 = vst [vmem:[#allocation2] sm:$0xff] %v403_v18 }
  0x37   :  { %v431_v25 = vrot.slane %v430_v24, 7  ;;  %v435_v26 = vld [vmem:[#allocation0 + $0xaf] ss:$-1 sm:$0xff]  ;;  %v444_v27 = vld [vmem:[#allocation0 + $0x97] ss:$-1 sm:$0xff]  ;;  %412 = vst.msk [vmem:[#allocation2] sm:$0xff] %vm411_vm0, %v408_v19 }
  0x38   :  { %418 = vst [vmem:[#allocation2 + $0x8] sm:$0xff] %v417_v22  ;;  %v436_v28 = vrot.slane %v435_v26, 7  ;;  %v445_v29 = vrot.slane %v444_v27, 7  ;;  %v449_v30 = vld [vmem:[#allocation0 + $0x9f] ss:$-1 sm:$0xff] }
  0x39   :  { %v458_v31 = vld [vmem:[#allocation0 + $0x87] ss:$-1 sm:$0xff]  ;;  %426 = vst.msk [vmem:[#allocation2 + $0x8] sm:$0xff] %vm411_vm0, %v422_v23  ;;  %432 = vst [vmem:[#allocation2 + $0x10] sm:$0xff] %v431_v25  ;;  %v450_v32 = vrot.slane %v449_v30, 7 }
  0x3a   :  { %v459_v33 = vrot.slane %v458_v31, 7  ;;  %v463_v34 = vld [vmem:[#allocation0 + $0x8f] ss:$-1 sm:$0xff]  ;;  %v472_v35 = vld [vmem:[#allocation0 + $0x77] ss:$-1 sm:$0xff]  ;;  %440 = vst.msk [vmem:[#allocation2 + $0x10] sm:$0xff] %vm411_vm0, %v436_v28 }
  0x3b   :  { %446 = vst [vmem:[#allocation2 + $0x18] sm:$0xff] %v445_v29  ;;  %v464_v36 = vrot.slane %v463_v34, 7  ;;  %v473_v37 = vrot.slane %v472_v35, 7  ;;  %v477_v38 = vld [vmem:[#allocation0 + $0x7f] ss:$-1 sm:$0xff] }
  0x3c   :  { %v486_v39 = vld [vmem:[#allocation0 + $0x67] ss:$-1 sm:$0xff]  ;;  %454 = vst.msk [vmem:[#allocation2 + $0x18] sm:$0xff] %vm411_vm0, %v450_v32  ;;  %460 = vst [vmem:[#allocation2 + $0x20] sm:$0xff] %v459_v33  ;;  %v478_v40 = vrot.slane %v477_v38, 7 }
  0x3d   :  { %v487_v41 = vrot.slane %v486_v39, 7  ;;  %v491_v42 = vld [vmem:[#allocation0 + $0x6f] ss:$-1 sm:$0xff]  ;;  %v500_v43 = vld [vmem:[#allocation0 + $0x57] ss:$-1 sm:$0xff]  ;;  %468 = vst.msk [vmem:[#allocation2 + $0x20] sm:$0xff] %vm411_vm0, %v464_v36 }
  0x3e   :  { %474 = vst [vmem:[#allocation2 + $0x28] sm:$0xff] %v473_v37  ;;  %v492_v44 = vrot.slane %v491_v42, 7  ;;  %v501_v45 = vrot.slane %v500_v43, 7  ;;  %v505_v46 = vld [vmem:[#allocation0 + $0x5f] ss:$-1 sm:$0xff] }
  0x3f   :  { %v514_v47 = vld [vmem:[#allocation0 + $0x47] ss:$-1 sm:$0xff]  ;;  %482 = vst.msk [vmem:[#allocation2 + $0x28] sm:$0xff] %vm411_vm0, %v478_v40  ;;  %488 = vst [vmem:[#allocation2 + $0x30] sm:$0xff] %v487_v41  ;;  %v506_v48 = vrot.slane %v505_v46, 7 }
  0x40   :  { %v515_v49 = vrot.slane %v514_v47, 7  ;;  %v519_v50 = vld [vmem:[#allocation0 + $0x4f] ss:$-1 sm:$0xff]  ;;  %v528_v51 = vld [vmem:[#allocation0 + $0x37] ss:$-1 sm:$0xff]  ;;  %496 = vst.msk [vmem:[#allocation2 + $0x30] sm:$0xff] %vm411_vm0, %v492_v44 }
  0x41   :  { %502 = vst [vmem:[#allocation2 + $0x38] sm:$0xff] %v501_v45  ;;  %v520_v52 = vrot.slane %v519_v50, 7  ;;  %v529_v53 = vrot.slane %v528_v51, 7  ;;  %v533_v54 = vld [vmem:[#allocation0 + $0x3f] ss:$-1 sm:$0xff] }
  0x42   :  { %v542_v55 = vld [vmem:[#allocation0 + $0x27] ss:$-1 sm:$0xff]  ;;  %510 = vst.msk [vmem:[#allocation2 + $0x38] sm:$0xff] %vm411_vm0, %v506_v48  ;;  %516 = vst [vmem:[#allocation2 + $0x40] sm:$0xff] %v515_v49  ;;  %v534_v56 = vrot.slane %v533_v54, 7 }
  0x43   :  { %v543_v57 = vrot.slane %v542_v55, 7  ;;  %v547_v58 = vld [vmem:[#allocation0 + $0x2f] ss:$-1 sm:$0xff]  ;;  %v556_v59 = vld [vmem:[#allocation0 + $0x17] ss:$-1 sm:$0xff]  ;;  %524 = vst.msk [vmem:[#allocation2 + $0x40] sm:$0xff] %vm411_vm0, %v520_v52 }
  0x44   :  { %530 = vst [vmem:[#allocation2 + $0x48] sm:$0xff] %v529_v53  ;;  %v548_v60 = vrot.slane %v547_v58, 7  ;;  %v557_v61 = vrot.slane %v556_v59, 7  ;;  %v561_v62 = vld [vmem:[#allocation0 + $0x1f] ss:$-1 sm:$0xff] }
  0x45   :  { %v569_v63 = vld [vmem:[#allocation0 + $0x7] ss:$-1 sm:$0xff]  ;;  %538 = vst.msk [vmem:[#allocation2 + $0x48] sm:$0xff] %vm411_vm0, %v534_v56  ;;  %544 = vst [vmem:[#allocation2 + $0x50] sm:$0xff] %v543_v57  ;;  %v562_v0 = vrot.slane %v561_v62, 7 }
  0x46   :  { %v570_v1 = vrot.slane %v569_v63, 7  ;;  %v574_v2 = vld [vmem:[#allocation0 + $0xf] ss:$-1 sm:$0xff]  ;;  %v583_v3 = vld [vmem:[#allocation0 + $0x197] ss:$-1 sm:$0xff]  ;;  %552 = vst.msk [vmem:[#allocation2 + $0x50] sm:$0xff] %vm411_vm0, %v548_v60 }
  0x47   :  { %558 = vst [vmem:[#allocation2 + $0x58] sm:$0xff] %v557_v61  ;;  %v575_v4 = vrot.slane %v574_v2, 7  ;;  %v584_v5 = vrot.slane %v583_v3, 7  ;;  %v588_v6 = vld [vmem:[#allocation0 + $0x19f] ss:$-1 sm:$0xff] }
  0x48   :  { %v597_v7 = vld [vmem:[#allocation0 + $0x187] ss:$-1 sm:$0xff]  ;;  %566 = vst.msk [vmem:[#allocation2 + $0x58] sm:$0xff] %vm411_vm0, %v562_v0  ;;  %571 = vst [vmem:[#allocation2 + $0x60] sm:$0xff] %v570_v1  ;;  %v589_v8 = vrot.slane %v588_v6, 7 }
  0x49   :  { %v598_v9 = vrot.slane %v597_v7, 7  ;;  %v602_v10 = vld [vmem:[#allocation0 + $0x18f] ss:$-1 sm:$0xff]  ;;  %v611_v11 = vld [vmem:[#allocation0 + $0x177] ss:$-1 sm:$0xff]  ;;  %579 = vst.msk [vmem:[#allocation2 + $0x60] sm:$0xff] %vm411_vm0, %v575_v4 }
  0x4a   :  { %585 = vst [vmem:[#allocation2 + $0x68] sm:$0xff] %v584_v5  ;;  %v603_v12 = vrot.slane %v602_v10, 7  ;;  %v612_v13 = vrot.slane %v611_v11, 7  ;;  %v616_v14 = vld [vmem:[#allocation0 + $0x17f] ss:$-1 sm:$0xff] }
  0x4b   :  { %v625_v15 = vld [vmem:[#allocation0 + $0x167] ss:$-1 sm:$0xff]  ;;  %593 = vst.msk [vmem:[#allocation2 + $0x68] sm:$0xff] %vm411_vm0, %v589_v8  ;;  %599 = vst [vmem:[#allocation2 + $0x70] sm:$0xff] %v598_v9  ;;  %v617_v16 = vrot.slane %v616_v14, 7 }
  0x4c   :  { %v626_v18 = vrot.slane %v625_v15, 7  ;;  %v630_v19 = vld [vmem:[#allocation0 + $0x16f] ss:$-1 sm:$0xff]  ;;  %v639_v20 = vld [vmem:[#allocation0 + $0x157] ss:$-1 sm:$0xff]  ;;  %607 = vst.msk [vmem:[#allocation2 + $0x70] sm:$0xff] %vm411_vm0, %v603_v12 }
  0x4d   :  { %613 = vst [vmem:[#allocation2 + $0x78] sm:$0xff] %v612_v13  ;;  %v631_v21 = vrot.slane %v630_v19, 7  ;;  %v640_v22 = vrot.slane %v639_v20, 7  ;;  %v644_v23 = vld [vmem:[#allocation0 + $0x15f] ss:$-1 sm:$0xff] }
  0x4e   :  { %v653_v24 = vld [vmem:[#allocation0 + $0x147] ss:$-1 sm:$0xff]  ;;  %621 = vst.msk [vmem:[#allocation2 + $0x78] sm:$0xff] %vm411_vm0, %v617_v16  ;;  %627 = vst [vmem:[#allocation2 + $0x80] sm:$0xff] %v626_v18  ;;  %v645_v25 = vrot.slane %v644_v23, 7 }
  0x4f   :  { %v654_v26 = vrot.slane %v653_v24, 7  ;;  %v658_v27 = vld [vmem:[#allocation0 + $0x14f] ss:$-1 sm:$0xff]  ;;  %v667_v28 = vld [vmem:[#allocation0 + $0x137] ss:$-1 sm:$0xff]  ;;  %635 = vst.msk [vmem:[#allocation2 + $0x80] sm:$0xff] %vm411_vm0, %v631_v21 }
  0x50   :  { %641 = vst [vmem:[#allocation2 + $0x88] sm:$0xff] %v640_v22  ;;  %v659_v29 = vrot.slane %v658_v27, 7  ;;  %v668_v30 = vrot.slane %v667_v28, 7  ;;  %v672_v31 = vld [vmem:[#allocation0 + $0x13f] ss:$-1 sm:$0xff] }
  0x51   :  { %v681_v32 = vld [vmem:[#allocation0 + $0x127] ss:$-1 sm:$0xff]  ;;  %649 = vst.msk [vmem:[#allocation2 + $0x88] sm:$0xff] %vm411_vm0, %v645_v25  ;;  %655 = vst [vmem:[#allocation2 + $0x90] sm:$0xff] %v654_v26  ;;  %v673_v33 = vrot.slane %v672_v31, 7 }
  0x52   :  { %v682_v34 = vrot.slane %v681_v32, 7  ;;  %v686_v35 = vld [vmem:[#allocation0 + $0x12f] ss:$-1 sm:$0xff]  ;;  %v695_v36 = vld [vmem:[#allocation0 + $0x117] ss:$-1 sm:$0xff]  ;;  %663 = vst.msk [vmem:[#allocation2 + $0x90] sm:$0xff] %vm411_vm0, %v659_v29 }
  0x53   :  { %669 = vst [vmem:[#allocation2 + $0x98] sm:$0xff] %v668_v30  ;;  %v687_v37 = vrot.slane %v686_v35, 7  ;;  %v696_v38 = vrot.slane %v695_v36, 7  ;;  %v700_v39 = vld [vmem:[#allocation0 + $0x11f] ss:$-1 sm:$0xff] }
  0x54   :  { %v709_v40 = vld [vmem:[#allocation0 + $0x107] ss:$-1 sm:$0xff]  ;;  %677 = vst.msk [vmem:[#allocation2 + $0x98] sm:$0xff] %vm411_vm0, %v673_v33  ;;  %683 = vst [vmem:[#allocation2 + $0xa0] sm:$0xff] %v682_v34  ;;  %v701_v41 = vrot.slane %v700_v39, 7 }
  0x55   :  { %v710_v42 = vrot.slane %v709_v40, 7  ;;  %v714_v43 = vld [vmem:[#allocation0 + $0x10f] ss:$-1 sm:$0xff]  ;;  %v723_v44 = vld [vmem:[#allocation0 + $0xf7] ss:$-1 sm:$0xff]  ;;  %691 = vst.msk [vmem:[#allocation2 + $0xa0] sm:$0xff] %vm411_vm0, %v687_v37 }
  0x56   :  { %697 = vst [vmem:[#allocation2 + $0xa8] sm:$0xff] %v696_v38  ;;  %v715_v45 = vrot.slane %v714_v43, 7  ;;  %v724_v46 = vrot.slane %v723_v44, 7  ;;  %v728_v47 = vld [vmem:[#allocation0 + $0xff] ss:$-1 sm:$0xff] }
  0x57   :  { %v737_v48 = vld [vmem:[#allocation0 + $0xe7] ss:$-1 sm:$0xff]  ;;  %705 = vst.msk [vmem:[#allocation2 + $0xa8] sm:$0xff] %vm411_vm0, %v701_v41  ;;  %711 = vst [vmem:[#allocation2 + $0xb0] sm:$0xff] %v710_v42  ;;  %v729_v49 = vrot.slane %v728_v47, 7 }
  0x58   :  { %v738_v50 = vrot.slane %v737_v48, 7  ;;  %v742_v51 = vld [vmem:[#allocation0 + $0xef] ss:$-1 sm:$0xff]  ;;  %v751_v52 = vld [vmem:[#allocation0 + $0xd7] ss:$-1 sm:$0xff]  ;;  %719 = vst.msk [vmem:[#allocation2 + $0xb0] sm:$0xff] %vm411_vm0, %v715_v45 }
  0x59   :  { %725 = vst [vmem:[#allocation2 + $0xb8] sm:$0xff] %v724_v46  ;;  %v743_v53 = vrot.slane %v742_v51, 7  ;;  %v752_v54 = vrot.slane %v751_v52, 7  ;;  %v756_v55 = vld [vmem:[#allocation0 + $0xdf] ss:$-1 sm:$0xff] }
  0x5a   :  { %v765_v56 = vld [vmem:[#allocation2] sm:$0x1]  ;;  %733 = vst.msk [vmem:[#allocation2 + $0xb8] sm:$0xff] %vm411_vm0, %v729_v49  ;;  %739 = vst [vmem:[#allocation2 + $0xc0] sm:$0xff] %v738_v50  ;;  %v757_v57 = vrot.slane %v756_v55, 7 }
  0x5b   :  { %767 = vst [vmem:[#allocation3] sm:$0x1] %v765_v56  ;;  %v769_v58 = vld [vmem:[#allocation2 + $0x8] sm:$0x1]  ;;  %v774_v59 = vld [vmem:[#allocation2 + $0x10] sm:$0x1] }
  0x5c   :  { %747 = vst.msk [vmem:[#allocation2 + $0xc0] sm:$0xff] %vm411_vm0, %v743_v53  ;;  %753 = vst [vmem:[#allocation2 + $0xc8] sm:$0xff] %v752_v54  ;;  %v780_v60 = vld [vmem:[#allocation2 + $0x18] sm:$0x1]  ;;  %v786_v61 = vld [vmem:[#allocation2 + $0x20] sm:$0x1] }
  0x5d   :  { %772 = vst [vmem:[#allocation3 + $0x1] sm:$0x1] %v769_v58  ;;  %778 = vst [vmem:[#allocation3 + $0x2] sm:$0x1] %v774_v59  ;;  %v792_v62 = vld [vmem:[#allocation2 + $0x28] sm:$0x1] }
  0x5e   :  { %761 = vst.msk [vmem:[#allocation2 + $0xc8] sm:$0xff] %vm411_vm0, %v757_v57  ;;  %784 = vst [vmem:[#allocation3 + $0x3] sm:$0x1] %v780_v60  ;;  %v798_v17 = vld [vmem:[#allocation2 + $0x30] sm:$0x1] }
  0x5f   :  { %790 = vst [vmem:[#allocation3 + $0x4] sm:$0x1] %v786_v61  ;;  %796 = vst [vmem:[#allocation3 + $0x5] sm:$0x1] %v792_v62  ;;  %v804_v63 = vld [vmem:[#allocation2 + $0x38] sm:$0x1] }
  0x60   :  { %v810_v0 = vld [vmem:[#allocation2 + $0x40] sm:$0x1]  ;;  %802 = vst [vmem:[#allocation3 + $0x6] sm:$0x1] %v798_v17  ;;  %808 = vst [vmem:[#allocation3 + $0x7] sm:$0x1] %v804_v63 }
  0x61   :  { %814 = vst [vmem:[#allocation3 + $0x8] sm:$0x1] %v810_v0  ;;  %v816_v1 = vld [vmem:[#allocation2 + $0x48] sm:$0x1]  ;;  %v822_v2 = vld [vmem:[#allocation2 + $0x50] sm:$0x1] }
  0x62   :  { %v828_v3 = vld [vmem:[#allocation2 + $0x58] sm:$0x1]  ;;  %820 = vst [vmem:[#allocation3 + $0x9] sm:$0x1] %v816_v1  ;;  %826 = vst [vmem:[#allocation3 + $0xa] sm:$0x1] %v822_v2 }
  0x63   :  { %832 = vst [vmem:[#allocation3 + $0xb] sm:$0x1] %v828_v3  ;;  %v834_v4 = vld [vmem:[#allocation2 + $0x60] sm:$0x1]  ;;  %v840_v5 = vld [vmem:[#allocation2 + $0x68] sm:$0x1] }
  0x64   :  { %v846_v6 = vld [vmem:[#allocation2 + $0x70] sm:$0x1]  ;;  %838 = vst [vmem:[#allocation3 + $0xc] sm:$0x1] %v834_v4  ;;  %844 = vst [vmem:[#allocation3 + $0xd] sm:$0x1] %v840_v5 }
  0x65   :  { %850 = vst [vmem:[#allocation3 + $0xe] sm:$0x1] %v846_v6  ;;  %v852_v7 = vld [vmem:[#allocation2 + $0x78] sm:$0x1]  ;;  %v858_v8 = vld [vmem:[#allocation2 + $0x80] sm:$0x1] }
  0x66   :  { %v864_v9 = vld [vmem:[#allocation2 + $0x88] sm:$0x1]  ;;  %856 = vst [vmem:[#allocation3 + $0xf] sm:$0x1] %v852_v7  ;;  %862 = vst [vmem:[#allocation3 + $0x10] sm:$0x1] %v858_v8 }
  0x67   :  { %868 = vst [vmem:[#allocation3 + $0x11] sm:$0x1] %v864_v9  ;;  %v870_v10 = vld [vmem:[#allocation2 + $0x90] sm:$0x1]  ;;  %v876_v11 = vld [vmem:[#allocation2 + $0x98] sm:$0x1] }
  0x68   :  { %v882_v12 = vld [vmem:[#allocation2 + $0xa0] sm:$0x1]  ;;  %874 = vst [vmem:[#allocation3 + $0x12] sm:$0x1] %v870_v10  ;;  %880 = vst [vmem:[#allocation3 + $0x13] sm:$0x1] %v876_v11 }
  0x69   :  { %886 = vst [vmem:[#allocation3 + $0x14] sm:$0x1] %v882_v12  ;;  %v888_v13 = vld [vmem:[#allocation2 + $0xa8] sm:$0x1]  ;;  %v894_v14 = vld [vmem:[#allocation2 + $0xb0] sm:$0x1] }
  0x6a   :  { %v900_v15 = vld [vmem:[#allocation2 + $0xb8] sm:$0x1]  ;;  %892 = vst [vmem:[#allocation3 + $0x15] sm:$0x1] %v888_v13  ;;  %898 = vst [vmem:[#allocation3 + $0x16] sm:$0x1] %v894_v14 }
  0x6b   :  { %904 = vst [vmem:[#allocation3 + $0x17] sm:$0x1] %v900_v15  ;;  %v906_v16 = vld [vmem:[#allocation2 + $0xc0] sm:$0x1]  ;;  %v912_v18 = vld [vmem:[#allocation2 + $0xc8] sm:$0x1] }
  0x6c   :  { %910 = vst [vmem:[#allocation3 + $0x18] sm:$0x1] %v906_v16  ;;  %916 = vst [vmem:[#allocation3 + $0x19] sm:$0x1] %v912_v18  ;;  %v931_v19 = vld [vmem:[#allocation3] sm:$0xff] }
  0x6d   :  { %932 = vst [vmem:[%s1268_s1] sm:$0xff] %v931_v19  ;;  %v933_v20 = vld [vmem:[#allocation3 + $0x8] sm:$0xff] }
  0x6e   :  { %934 = vst [vmem:[%s1268_s1 + $0x8] sm:$0xff] %v933_v20 }
  0x72   :  { %v935_v21 = vld [vmem:[#allocation3 + $0x10] sm:$0xff] }
  0x73   :  { %936 = vst [vmem:[%s1268_s1 + $0x10] sm:$0xff] %v935_v21  ;;  %v946_v22 = vld [vmem:[#allocation3 + $0x18] sm:$0x3] }
  0x74   :  { %1111 = vst [vmem:[%s1268_s1 + $0x18] sm:$0x3] %v946_v22 }

// kernel: spectral_cnn_forward.3
= control target key start
LH: loop header
LB: loop body
LE: loop exit
PB: predicated region body
PF: predicated region fallthrough
CT: control target
= control target key end

     0   :  { %s650_s18 = smov 0   ;;  %s1029_s0 = inlined_call_operand.vmem [shape: f32[2,1,1,420], index: 0, kind: input, shape index: {}]   ;;  %s1030_s1 = inlined_call_operand.vmem [shape: f32[2,1,1,420], index: 1, kind: input, shape index: {}]   ;;  %s1031_s2 = inlined_call_operand.vmem [shape: f32[1,32,420], index: 2, kind: input, shape index: {}]   ;;  %s1032_s3 = inlined_call_operand.vmem [shape: f32[1,32,420], index: 3, kind: input, shape index: {}]   ;;  %s1033_s4 = inlined_call_operand.vmem [shape: f32[2,32,420], index: 4, kind: output, shape index: {0}]   ;;  %s1034_s5 = inlined_call_operand.vmem [shape: f32[2,32,420], index: 5, kind: output, shape index: {1}]  }
   0x1 LB: > { %s589_s19 = sadd.s32 4294967295, %s618_s18   ;;  %p593_p0 = scmp.ge.s32.totalorder %s618_s18, 1  ;;  %s618_s18 = sphi %s650_s18, %s16_s18  }
   0x2   : > { %p198_p1 = scmp.lt.s32.totalorder %s618_s18, 3 }
   0x4   : > { %p199_p2 = pnand %p593_p0, %p198_p1 }
   0x5   : > { %p234_p3 = scmp.lt.s32.totalorder (!%p199_p2), %s589_s19, 1  ;;  %v287_v0 = vlaneseq (!%p199_p2)  ;;  %v664_v2 = vld [vmem:[%s1031_s2] sm:$0xff] (!%p199_p2)  ;;  %v680_v8 = vld [vmem:[%s1031_s2 + $0x8] sm:$0xff] (!%p199_p2)  ;;  %v690_v12 = vld [vmem:[%s1031_s2 + $0x10] sm:$0xff] (!%p199_p2)  ;;  %vm459_vm0 = vcmask (!%p199_p2), 293888  }
   0x6   : > { %202 = sbr.rel (%p199_p2) target bundleno = 48 (0x30), region = 36  ;;  %v675_v7 = vld [vmem:[%s1032_s3] sm:$0xff] (!%p199_p2)  ;;  %v685_v9 = vld [vmem:[%s1032_s3 + $0x8] sm:$0xff] (!%p199_p2)  ;;  %v704_v17 = vld [vmem:[%s1032_s3 + $0x10] sm:$0xff] (!%p199_p2) }
   0x7   : > { %v288_v1 = vshrl.u32 (!%p199_p2), %v287_v0, 7  ;;  %v709_v18 = vld [vmem:[%s1031_s2 + $0x18] sm:$0xff] (!%p199_p2)  ;;  %v727_v24 = vld [vmem:[%s1031_s2 + $0x20] sm:$0xff] (!%p199_p2)  ;;  %v745_v30 = vld [vmem:[%s1031_s2 + $0x28] sm:$0xff] (!%p199_p2) }
   0x8   : > { %v714_v19 = vld [vmem:[%s1032_s3 + $0x18] sm:$0xff] (!%p199_p2)  ;;  %v732_v25 = vld [vmem:[%s1032_s3 + $0x20] sm:$0xff] (!%p199_p2)  ;;  %v750_v31 = vld [vmem:[%s1032_s3 + $0x28] sm:$0xff] (!%p199_p2) }
   0x9   : > { %v289_v3 = vsub.s32 (!%p199_p2), 0, %v288_v1  ;;  %v293_v4 = vsub.s32 (!%p199_p2), 1, %v288_v1  ;;  %v297_v5 = vsub.s32 (!%p199_p2), 2, %v288_v1  ;;  %v301_v6 = vsub.s32 (!%p199_p2), 3, %v288_v1  ;;  %v770_v36 = vld [vmem:[%s1031_s2 + $0x30] sm:$0xff] (!%p199_p2)  ;;  %v780_v38 = vld [vmem:[%s1031_s2 + $0x38] sm:$0xff] (!%p199_p2) }
   0xa   : > { %v775_v37 = vld [vmem:[%s1032_s3 + $0x30] sm:$0xff] (!%p199_p2)  ;;  %v789_v43 = vld [vmem:[%s1032_s3 + $0x38] sm:$0xff] (!%p199_p2)  ;;  %v794_v44 = vld [vmem:[%s1031_s2 + $0x40] sm:$0xff] (!%p199_p2) }
   0xb   : > { %v799_v45 = vld [vmem:[%s1032_s3 + $0x40] sm:$0xff] (!%p199_p2)  ;;  %v808_v50 = vld [vmem:[%s1031_s2 + $0x48] sm:$0xff] (!%p199_p2)  ;;  %v818_v52 = vld [vmem:[%s1031_s2 + $0x50] sm:$0xff] (!%p199_p2) }
   0xc   : > { %v813_v51 = vld [vmem:[%s1032_s3 + $0x48] sm:$0xff] (!%p199_p2)  ;;  %v831_v57 = vld [vmem:[%s1032_s3 + $0x50] sm:$0xff] (!%p199_p2)  ;;  %v836_v58 = vld [vmem:[%s1031_s2 + $0x58] sm:$0xff] (!%p199_p2) }
   0xd   : > { %s1036_s19 = smov (!%p234_p3, %s589_s19), 1  ;;  %v850_v63 = vld [vmem:[%s1032_s3 + $0x58] sm:$0xff]  ;;  %v855_v0 = vld [vmem:[%s1031_s2 + $0x60] sm:$0xff] }
   0xe   : > { %s594_s20 = sshll.u32 %s1036_s19, 2  ;;  %s602_s12 = sshll.u32 %s1036_s19, 7  ;;  %v860_v1 = vld [vmem:[%s1032_s3 + $0x60] sm:$0xff] }
   0xf   : > { %s237_s25 = scalar_lea.vmem %s1029_s0, %s594_s20  ;;  %s241_s28 = scalar_lea.vmem %s1030_s1, %s594_s20 }
  0x10   : > { %v252_v10 = vld [vmem:[%s237_s25] sm:$0xf]  ;;  %s757_s6 = scalar_lea.vmem %s1033_s4, %s602_s12  ;;  %s937_s7 = scalar_lea.vmem %s1034_s5, %s602_s12 }
  0x11   : > { %v253_v11 = vld [vmem:[%s241_s28] sm:$0xf]  ;;  %v693_v13 = vrot.slane %v252_v10, %v289_v3  ;;  %v697_v15 = vrot.slane %v252_v10, %v293_v4  ;;  %v716_v20 = vrot.slane %v252_v10, %v297_v5  ;;  %v720_v22 = vrot.slane %v252_v10, %v301_v6  ;;  %v872_v10 = vld [vmem:[%s1031_s2 + $0x68] sm:$0xff] }
  0x12   : > { %v695_v14 = vrot.slane %v253_v11, %v289_v3  ;;  %v699_v16 = vrot.slane %v253_v11, %v293_v4  ;;  %v718_v21 = vrot.slane %v253_v11, %v297_v5  ;;  %v722_v23 = vrot.slane %v253_v11, %v301_v6  ;;  %v877_v11 = vld [vmem:[%s1032_s3 + $0x68] sm:$0xff] }
  0x13   : > { %v307_v26 = vmul.f32 %v693_v13, %v664_v2  ;;  %v308_v28 = vmul.f32 %v697_v15, %v680_v8  ;;  %v309_v32 = vmul.f32 %v716_v20, %v690_v12  ;;  %v310_v34 = vmul.f32 %v720_v22, %v709_v18 }
  0x14   : > { %v360_v27 = vmul.f32 %v695_v14, %v675_v7  ;;  %v361_v29 = vmul.f32 %v699_v16, %v685_v9  ;;  %v362_v33 = vmul.f32 %v718_v21, %v704_v17  ;;  %v363_v35 = vmul.f32 %v722_v23, %v714_v19 }
  0x15   : > { %v311_v41 = vmul.f32 %v693_v13, %v727_v24  ;;  %v364_v42 = vmul.f32 %v695_v14, %v732_v25  ;;  %v312_v48 = vmul.f32 %v697_v15, %v745_v30  ;;  %v365_v49 = vmul.f32 %v699_v16, %v750_v31 }
  0x16   : > { %v376_v39 = vsub.f32 %v307_v26, %v360_v27  ;;  %v377_v40 = vsub.f32 %v308_v28, %v361_v29  ;;  %v378_v46 = vsub.f32 %v309_v32, %v362_v33  ;;  %v379_v47 = vsub.f32 %v310_v34, %v363_v35  ;;  %v882_v26 = vld [vmem:[%s1031_s2 + $0x70] sm:$0xff]  ;;  %v897_v34 = vld [vmem:[%s1031_s2 + $0x78] sm:$0xff] }
  0x17   : > { %v380_v53 = vsub.f32 %v311_v41, %v364_v42  ;;  %v313_v54 = vmul.f32 %v716_v20, %v770_v36  ;;  %v366_v55 = vmul.f32 %v718_v21, %v775_v37  ;;  %v314_v56 = vmul.f32 %v720_v22, %v780_v38  ;;  %v892_v33 = vld [vmem:[%s1032_s3 + $0x70] sm:$0xff]  ;;  %v909_v42 = vld [vmem:[%s1032_s3 + $0x78] sm:$0xff] }
  0x18   : > { %456 = vst [vmem:[%s757_s6] sm:$0xff] %v376_v39  ;;  %457 = vst [vmem:[%s757_s6 + $0x8] sm:$0xff] %v377_v40  ;;  %v381_v59 = vsub.f32 %v312_v48, %v365_v49  ;;  %v367_v60 = vmul.f32 %v722_v23, %v789_v43  ;;  %v315_v61 = vmul.f32 %v693_v13, %v794_v44 }
  0x19   : > { %458 = vst [vmem:[%s757_s6 + $0x10] sm:$0xff] %v378_v46  ;;  %460 = vst.msk [vmem:[%s757_s6 + $0x18] sm:$0xff] %vm459_vm0, %v379_v47  ;;  %v368_v62 = vmul.f32 %v695_v14, %v799_v45  ;;  %v382_v3 = vsub.f32 %v313_v54, %v366_v55  ;;  %v316_v4 = vmul.f32 %v697_v15, %v808_v50 }
  0x1a   : > { %461 = vst [vmem:[%s757_s6 + $0x20] sm:$0xff] %v380_v53  ;;  %v369_v5 = vmul.f32 %v699_v16, %v813_v51  ;;  %v317_v6 = vmul.f32 %v716_v20, %v818_v52  ;;  %462 = vst [vmem:[%s757_s6 + $0x28] sm:$0xff] %v381_v59  ;;  %v383_v27 = vsub.f32 %v314_v56, %v367_v60 }
  0x1b   : > { %v384_v28 = vsub.f32 %v315_v61, %v368_v62  ;;  %v370_v29 = vmul.f32 %v718_v21, %v831_v57  ;;  %v318_v32 = vmul.f32 %v720_v22, %v836_v58  ;;  %463 = vst [vmem:[%s757_s6 + $0x30] sm:$0xff] %v382_v3  ;;  %v371_v39 = vmul.f32 %v722_v23, %v850_v63 }
  0x1c   : > { %v385_v35 = vsub.f32 %v316_v4, %v369_v5  ;;  %v319_v40 = vmul.f32 %v693_v13, %v855_v0  ;;  %v372_v41 = vmul.f32 %v695_v14, %v860_v1  ;;  %464 = vst.msk [vmem:[%s757_s6 + $0x38] sm:$0xff] %vm459_vm0, %v383_v27  ;;  %v320_v47 = vmul.f32 %v697_v15, %v872_v10 }
  0x1d   : > { %465 = vst [vmem:[%s757_s6 + $0x40] sm:$0xff] %v384_v28  ;;  %v386_v46 = vsub.f32 %v317_v6, %v370_v29  ;;  %v373_v48 = vmul.f32 %v699_v16, %v877_v11  ;;  %v321_v49 = vmul.f32 %v716_v20, %v882_v26  ;;  %v387_v53 = vsub.f32 %v318_v32, %v371_v39 }
  0x1e   : > { %466 = vst [vmem:[%s757_s6 + $0x48] sm:$0xff] %v385_v35  ;;  %v388_v54 = vsub.f32 %v319_v40, %v372_v41  ;;  %v374_v55 = vmul.f32 %v718_v21, %v892_v33  ;;  %v322_v56 = vmul.f32 %v720_v22, %v897_v34  ;;  %v375_v60 = vmul.f32 %v722_v23, %v909_v42 }
  0x1f   : > { %467 = vst [vmem:[%s757_s6 + $0x50] sm:$0xff] %v386_v46  ;;  %v389_v59 = vsub.f32 %v320_v47, %v373_v48  ;;  %v392_v61 = vmul.f32 %v693_v13, %v675_v7  ;;  %v424_v62 = vmul.f32 %v695_v14, %v664_v2  ;;  %468 = vst.msk [vmem:[%s757_s6 + $0x58] sm:$0xff] %vm459_vm0, %v387_v53 }
  0x20   : > { %469 = vst [vmem:[%s757_s6 + $0x60] sm:$0xff] %v388_v54  ;;  %v390_v3 = vsub.f32 %v321_v49, %v374_v55  ;;  %v393_v4 = vmul.f32 %v697_v15, %v685_v9  ;;  %v425_v7 = vmul.f32 %v699_v16, %v680_v8  ;;  %v394_v2 = vmul.f32 %v716_v20, %v704_v17 }
  0x21   : > { %470 = vst [vmem:[%s757_s6 + $0x68] sm:$0xff] %v389_v59  ;;  %v391_v5 = vsub.f32 %v322_v56, %v375_v60  ;;  %v440_v6 = vadd.f32 %v424_v62, %v392_v61  ;;  %v426_v27 = vmul.f32 %v718_v21, %v690_v12  ;;  %v395_v28 = vmul.f32 %v720_v22, %v714_v19 }
  0x22   : > { %471 = vst [vmem:[%s757_s6 + $0x70] sm:$0xff] %v390_v3  ;;  %v441_v29 = vadd.f32 %v425_v7, %v393_v4  ;;  %v427_v9 = vmul.f32 %v722_v23, %v709_v18  ;;  %v396_v8 = vmul.f32 %v693_v13, %v732_v25  ;;  %v428_v17 = vmul.f32 %v695_v14, %v727_v24 }
  0x23   : > { %472 = vst.msk [vmem:[%s757_s6 + $0x78] sm:$0xff] %vm459_vm0, %v391_v5  ;;  %473 = vst [vmem:[%s937_s7] sm:$0xff] %v440_v6  ;;  %v442_v12 = vadd.f32 %v426_v27, %v394_v2  ;;  %v397_v19 = vmul.f32 %v697_v15, %v750_v31  ;;  %v429_v32 = vmul.f32 %v699_v16, %v745_v30 }
  0x24   : > { %v398_v18 = vmul.f32 %v716_v20, %v775_v37  ;;  %474 = vst [vmem:[%s937_s7 + $0x8] sm:$0xff] %v441_v29  ;;  %v443_v25 = vadd.f32 %v427_v9, %v395_v28  ;;  %v444_v35 = vadd.f32 %v428_v17, %v396_v8  ;;  %v430_v24 = vmul.f32 %v718_v21, %v770_v36 }
  0x25   : > { %v399_v39 = vmul.f32 %v720_v22, %v789_v43  ;;  %475 = vst [vmem:[%s937_s7 + $0x10] sm:$0xff] %v442_v12  ;;  %v445_v40 = vadd.f32 %v429_v32, %v397_v19  ;;  %v431_v31 = vmul.f32 %v722_v23, %v780_v38  ;;  %v400_v30 = vmul.f32 %v693_v13, %v799_v45 }
  0x26   : > { %v432_v37 = vmul.f32 %v695_v14, %v794_v44  ;;  %476 = vst.msk [vmem:[%s937_s7 + $0x18] sm:$0xff] %vm459_vm0, %v443_v25  ;;  %477 = vst [vmem:[%s937_s7 + $0x20] sm:$0xff] %v444_v35  ;;  %v446_v36 = vadd.f32 %v430_v24, %v398_v18  ;;  %v401_v43 = vmul.f32 %v697_v15, %v813_v51 }
  0x27   : > { %v433_v41 = vmul.f32 %v699_v16, %v808_v50  ;;  %v402_v38 = vmul.f32 %v716_v20, %v831_v57  ;;  %478 = vst [vmem:[%s937_s7 + $0x28] sm:$0xff] %v445_v40  ;;  %v447_v45 = vadd.f32 %v431_v31, %v399_v39  ;;  %v434_v44 = vmul.f32 %v718_v21, %v818_v52 }
  0x28   : > { %v448_v46 = vadd.f32 %v432_v37, %v400_v30  ;;  %v403_v47 = vmul.f32 %v720_v22, %v850_v63  ;;  %479 = vst [vmem:[%s937_s7 + $0x30] sm:$0xff] %v446_v36  ;;  %v435_v51 = vmul.f32 %v722_v23, %v836_v58  ;;  %v404_v50 = vmul.f32 %v693_v13, %v860_v1 }
  0x29   : > { %v449_v48 = vadd.f32 %v433_v41, %v401_v43  ;;  %v436_v57 = vmul.f32 %v695_v14, %v855_v0  ;;  %480 = vst.msk [vmem:[%s937_s7 + $0x38] sm:$0xff] %vm459_vm0, %v447_v45  ;;  %v450_v52 = vadd.f32 %v434_v44, %v402_v38  ;;  %v405_v63 = vmul.f32 %v697_v15, %v877_v11 }
  0x2a   : > { %481 = vst [vmem:[%s937_s7 + $0x40] sm:$0xff] %v448_v46  ;;  %v437_v58 = vmul.f32 %v699_v16, %v872_v10  ;;  %v406_v13 = vmul.f32 %v716_v20, %v892_v33  ;;  %v451_v1 = vadd.f32 %v435_v51, %v403_v47  ;;  %v438_v0 = vmul.f32 %v718_v21, %v882_v26 }
  0x2b   : > { %482 = vst [vmem:[%s937_s7 + $0x48] sm:$0xff] %v449_v48  ;;  %v452_v14 = vadd.f32 %v436_v57, %v404_v50  ;;  %v407_v49 = vmul.f32 %v720_v22, %v909_v42  ;;  %483 = vst [vmem:[%s937_s7 + $0x50] sm:$0xff] %v450_v52  ;;  %v439_v15 = vmul.f32 %v722_v23, %v897_v34 }
  0x2c   : > { %v453_v53 = vadd.f32 %v437_v58, %v405_v63  ;;  %484 = vst.msk [vmem:[%s937_s7 + $0x58] sm:$0xff] %vm459_vm0, %v451_v1  ;;  %v454_v16 = vadd.f32 %v438_v0, %v406_v13 }
  0x2d   : > { %485 = vst [vmem:[%s937_s7 + $0x60] sm:$0xff] %v452_v14  ;;  %v455_v20 = vadd.f32 %v439_v15, %v407_v49 }
  0x2e   : > { %486 = vst [vmem:[%s937_s7 + $0x68] sm:$0xff] %v453_v53  ;;  %487 = vst [vmem:[%s937_s7 + $0x70] sm:$0xff] %v454_v16 }
  0x2f   : > { %488 = vst.msk [vmem:[%s937_s7 + $0x78] sm:$0xff] %vm459_vm0, %v455_v20 }
  0x30 PF: > { %s16_s18 = sadd.s32 1, %s618_s18  }
  0x31   : > { %p13_p4 = scmp.ge.s32.totalorder %s16_s18, 4  }
  0x33   :  { %15 = sbr.rel (!%p13_p4) target bundleno = 1 (0x1), region = 81 }

// kernel: reverse.11
= control target key start
LH: loop header
LB: loop body
LE: loop exit
PB: predicated region body
PF: predicated region fallthrough
CT: control target
= control target key end

     0   :  { %v137_v6 = vlaneseq  ;;  %v143_v26 = vld [vmem:[#allocation0 + $0x7f] ss:$-1 sm:$0xff]  ;;  %v171_v27 = vld [vmem:[#allocation0 + $0x67] ss:$-1 sm:$0xff]  ;;  %v199_v28 = vld [vmem:[#allocation0 + $0x4f] ss:$-1 sm:$0xff]  ;;  %s889_s0 = inlined_call_operand.vmem [shape: f32[2,64,13,6], index: 0, kind: input, shape index: {}]   ;;  %s890_s1 = inlined_call_operand.vmem [shape: f32[2,64,13,6], index: 1, kind: output, shape index: {}]  }
   0x1   :  { %v76_v0 = vld [vmem:[%s889_s0] sm:$0xff]  ;;  %v78_v1 = vld [vmem:[%s889_s0 + $0x8] sm:$0xff]  ;;  %v80_v2 = vld [vmem:[%s889_s0 + $0x10] sm:$0xff]  ;;  %v144_v29 = vrot.slane %v143_v26, 3  ;;  %v172_v30 = vrot.slane %v171_v27, 3  ;;  %v200_v31 = vrot.slane %v199_v28, 3 }
   0x2   :  { %77 = vst [vmem:[#allocation0 + $0x8] sm:$0xff] %v76_v0  ;;  %79 = vst [vmem:[#allocation0 + $0x10] sm:$0xff] %v78_v1  ;;  %v82_v3 = vld [vmem:[%s889_s0 + $0x18] sm:$0xff]  ;;  %v84_v4 = vld [vmem:[%s889_s0 + $0x20] sm:$0xff]  ;;  %v748_v19 = vshrl.u32 %v137_v6, 7 }
   0x3   :  { %81 = vst [vmem:[#allocation0 + $0x20] sm:$0xff] %v80_v2  ;;  %v86_v5 = vld [vmem:[%s889_s0 + $0x28] sm:$0xff]  ;;  %83 = vst [vmem:[#allocation0 + $0x28] sm:$0xff] %v82_v3  ;;  %v88_v7 = vld [vmem:[%s889_s0 + $0x30] sm:$0xff] }
   0x4   :  { %85 = vst [vmem:[#allocation0 + $0x38] sm:$0xff] %v84_v4  ;;  %87 = vst [vmem:[#allocation0 + $0x40] sm:$0xff] %v86_v5  ;;  %v90_v8 = vld [vmem:[%s889_s0 + $0x38] sm:$0xff]  ;;  %v92_v9 = vld [vmem:[%s889_s0 + $0x40] sm:$0xff]  ;;  %vm139_vm0 = vcmp.lt.s32.totalorder %v748_v19, 5 }
   0x5   :  { %89 = vst [vmem:[#allocation0 + $0x50] sm:$0xff] %v88_v7  ;;  %91 = vst [vmem:[#allocation0 + $0x58] sm:$0xff] %v90_v8  ;;  %v94_v10 = vld [vmem:[%s889_s0 + $0x48] sm:$0xff]  ;;  %v96_v11 = vld [vmem:[%s889_s0 + $0x50] sm:$0xff] }
   0x6   :  { %93 = vst [vmem:[#allocation0 + $0x68] sm:$0xff] %v92_v9  ;;  %v98_v12 = vld [vmem:[%s889_s0 + $0x58] sm:$0xff]  ;;  %95 = vst [vmem:[#allocation0 + $0x70] sm:$0xff] %v94_v10  ;;  %v100_v13 = vld [vmem:[%s889_s0 + $0x60] sm:$0xff] }
   0x7   :  { %97 = vst [vmem:[#allocation0 + $0x80] sm:$0xff] %v96_v11  ;;  %99 = vst [vmem:[#allocation0 + $0x88] sm:$0xff] %v98_v12  ;;  %v102_v14 = vld [vmem:[%s889_s0 + $0x68] sm:$0xff]  ;;  %v104_v15 = vld [vmem:[%s889_s0 + $0x70] sm:$0xff] }
   0x8   :  { %101 = vst [vmem:[#allocation0 + $0x98] sm:$0xff] %v100_v13  ;;  %103 = vst [vmem:[#allocation0 + $0xa0] sm:$0xff] %v102_v14  ;;  %v106_v16 = vld [vmem:[%s889_s0 + $0x78] sm:$0xff]  ;;  %v108_v17 = vld [vmem:[%s889_s0 + $0x80] sm:$0xff] }
   0x9   :  { %105 = vst [vmem:[#allocation0 + $0xb0] sm:$0xff] %v104_v15  ;;  %v110_v18 = vld [vmem:[%s889_s0 + $0x88] sm:$0xff]  ;;  %107 = vst [vmem:[#allocation0 + $0xb8] sm:$0xff] %v106_v16  ;;  %v112_v20 = vld [vmem:[%s889_s0 + $0x90] sm:$0xff] }
   0xa   :  { %109 = vst [vmem:[#allocation0 + $0xc8] sm:$0xff] %v108_v17  ;;  %111 = vst [vmem:[#allocation0 + $0xd0] sm:$0xff] %v110_v18  ;;  %v114_v21 = vld [vmem:[%s889_s0 + $0x98] sm:$0xff]  ;;  %v116_v22 = vld [vmem:[%s889_s0 + $0xa0] sm:$0xff] }
   0xb   :  { %113 = vst [vmem:[#allocation0 + $0xe0] sm:$0xff] %v112_v20  ;;  %115 = vst [vmem:[#allocation0 + $0xe8] sm:$0xff] %v114_v21  ;;  %v118_v23 = vld [vmem:[%s889_s0 + $0xa8] sm:$0xff]  ;;  %v120_v24 = vld [vmem:[%s889_s0 + $0xb0] sm:$0xff] }
   0xc   :  { %117 = vst [vmem:[#allocation0 + $0xf8] sm:$0xff] %v116_v22  ;;  %v122_v25 = vld [vmem:[%s889_s0 + $0xb8] sm:$0xff]  ;;  %119 = vst [vmem:[#allocation0 + $0x100] sm:$0xff] %v118_v23  ;;  %v186_v35 = vld [vmem:[#allocation0 + $0x57] ss:$-1 sm:$0xff] }
   0xd   :  { %121 = vst [vmem:[#allocation0 + $0x110] sm:$0xff] %v120_v24  ;;  %123 = vst [vmem:[#allocation0 + $0x118] sm:$0xff] %v122_v25  ;;  %v214_v32 = vld [vmem:[#allocation0 + $0x3f] ss:$-1 sm:$0xff]  ;;  %v158_v33 = vld [vmem:[#allocation0 + $0x6f] ss:$-1 sm:$0xff] }
   0xe   :  { %v176_v34 = vld [vmem:[#allocation0 + $0x6f] ss:$-1 sm:$0xff]  ;;  %v130_v36 = vld [vmem:[#allocation0 + $0x87] ss:$-1 sm:$0xff]  ;;  %145 = vst [vmem:[#allocation1 + $0x8] sm:$0xff] %v144_v29  ;;  %173 = vst [vmem:[#allocation1 + $0x18] sm:$0xff] %v172_v30 }
   0xf   :  { %v135_v37 = vld [vmem:[#allocation0 + $0x8f] ss:$-1 sm:$0xff]  ;;  %v148_v38 = vld [vmem:[#allocation0 + $0x87] ss:$-1 sm:$0xff]  ;;  %201 = vst [vmem:[#allocation1 + $0x28] sm:$0xff] %v200_v31  ;;  %v131_v39 = vrot.slane %v130_v36, 3 }
  0x10   :  { %v136_v40 = vrot.slane %v135_v37, 3  ;;  %v149_v41 = vrot.slane %v148_v38, 3  ;;  %v159_v42 = vrot.slane %v158_v33, 3  ;;  %v163_v43 = vld [vmem:[#allocation0 + $0x77] ss:$-1 sm:$0xff]  ;;  %v177_v45 = vrot.slane %v176_v34, 3 }
  0x11   :  { %v164_v44 = vrot.slane %v163_v43, 3  ;;  %v187_v46 = vrot.slane %v186_v35, 3  ;;  %v191_v47 = vld [vmem:[#allocation0 + $0x5f] ss:$-1 sm:$0xff]  ;;  %v215_v48 = vrot.slane %v214_v32, 3  ;;  %132 = vst [vmem:[#allocation1] sm:$0xff] %v131_v39 }
  0x12   :  { %153 = vst.msk [vmem:[#allocation1 + $0x8] sm:$0xff] %vm139_vm0, %v149_v41  ;;  %160 = vst [vmem:[#allocation1 + $0x10] sm:$0xff] %v159_v42  ;;  %v192_v49 = vrot.slane %v191_v47, 3  ;;  %v204_v50 = vld [vmem:[#allocation0 + $0x57] ss:$-1 sm:$0xff] }
  0x13   :  { %v219_v51 = vld [vmem:[#allocation0 + $0x47] ss:$-1 sm:$0xff]  ;;  %140 = vst.msk [vmem:[#allocation1] sm:$0xff] %vm139_vm0, %v136_v40  ;;  %168 = vst.msk [vmem:[#allocation1 + $0x10] sm:$0xff] %vm139_vm0, %v164_v44  ;;  %v205_v52 = vrot.slane %v204_v50, 3 }
  0x14   :  { %181 = vst.msk [vmem:[#allocation1 + $0x18] sm:$0xff] %vm139_vm0, %v177_v45  ;;  %188 = vst [vmem:[#allocation1 + $0x20] sm:$0xff] %v187_v46  ;;  %v220_v53 = vrot.slane %v219_v51, 3  ;;  %v227_v54 = vld [vmem:[#allocation0 + $0x37] ss:$-1 sm:$0xff] }
  0x15   :  { %216 = vst [vmem:[#allocation1 + $0x30] sm:$0xff] %v215_v48  ;;  %v232_v55 = vld [vmem:[#allocation0 + $0x3f] ss:$-1 sm:$0xff]  ;;  %196 = vst.msk [vmem:[#allocation1 + $0x20] sm:$0xff] %vm139_vm0, %v192_v49  ;;  %v228_v56 = vrot.slane %v227_v54, 3 }
  0x16   :  { %v233_v57 = vrot.slane %v232_v55, 3  ;;  %v242_v58 = vld [vmem:[#allocation0 + $0x27] ss:$-1 sm:$0xff]  ;;  %v247_v59 = vld [vmem:[#allocation0 + $0x2f] ss:$-1 sm:$0xff]  ;;  %209 = vst.msk [vmem:[#allocation1 + $0x28] sm:$0xff] %vm139_vm0, %v205_v52 }
  0x17   :  { %224 = vst.msk [vmem:[#allocation1 + $0x30] sm:$0xff] %vm139_vm0, %v220_v53  ;;  %v243_v60 = vrot.slane %v242_v58, 3  ;;  %v248_v61 = vrot.slane %v247_v59, 3  ;;  %v255_v62 = vld [vmem:[#allocation0 + $0x1f] ss:$-1 sm:$0xff]  ;;  %229 = vst [vmem:[#allocation1 + $0x38] sm:$0xff] %v228_v56 }
  0x18   :  { %v260_v63 = vld [vmem:[#allocation0 + $0x27] ss:$-1 sm:$0xff]  ;;  %v256_v0 = vrot.slane %v255_v62, 3  ;;  %v269_v2 = vld [vmem:[#allocation0 + $0xf] ss:$-1 sm:$0xff]  ;;  %237 = vst.msk [vmem:[#allocation1 + $0x38] sm:$0xff] %vm139_vm0, %v233_v57 }
  0x19   :  { %v261_v1 = vrot.slane %v260_v63, 3  ;;  %v274_v3 = vld [vmem:[#allocation0 + $0x17] ss:$-1 sm:$0xff]  ;;  %244 = vst [vmem:[#allocation1 + $0x40] sm:$0xff] %v243_v60  ;;  %v270_v4 = vrot.slane %v269_v2, 3  ;;  %v536_v60 = vld [vmem:[#allocation1 + $0x8] sm:$0xff] }
  0x1a   :  { %v275_v5 = vrot.slane %v274_v3, 3  ;;  %v282_v6 = vld [vmem:[#allocation0 + $0x7] ss:$-1 sm:$0xff]  ;;  %v287_v7 = vld [vmem:[#allocation0 + $0xf] ss:$-1 sm:$0xff]  ;;  %252 = vst.msk [vmem:[#allocation1 + $0x40] sm:$0xff] %vm139_vm0, %v248_v61 }
  0x1b   :  { %257 = vst [vmem:[#allocation1 + $0x48] sm:$0xff] %v256_v0  ;;  %v283_v8 = vrot.slane %v282_v6, 3  ;;  %v288_v9 = vrot.slane %v287_v7, 3  ;;  %v297_v10 = vld [vmem:[#allocation0 + $0x117] ss:$-1 sm:$0xff]  ;;  %271 = vst [vmem:[#allocation1 + $0x50] sm:$0xff] %v270_v4 }
  0x1c   :  { %v302_v11 = vld [vmem:[#allocation0 + $0x11f] ss:$-1 sm:$0xff]  ;;  %265 = vst.msk [vmem:[#allocation1 + $0x48] sm:$0xff] %vm139_vm0, %v261_v1  ;;  %v298_v12 = vrot.slane %v297_v10, 3  ;;  %v310_v14 = vld [vmem:[#allocation0 + $0x10f] ss:$-1 sm:$0xff] }
  0x1d   :  { %v303_v13 = vrot.slane %v302_v11, 3  ;;  %v315_v15 = vld [vmem:[#allocation0 + $0x117] ss:$-1 sm:$0xff]  ;;  %279 = vst.msk [vmem:[#allocation1 + $0x50] sm:$0xff] %vm139_vm0, %v275_v5  ;;  %284 = vst [vmem:[#allocation1 + $0x58] sm:$0xff] %v283_v8  ;;  %v311_v16 = vrot.slane %v310_v14, 3 }
  0x1e   :  { %v316_v17 = vrot.slane %v315_v15, 3  ;;  %v325_v18 = vld [vmem:[#allocation0 + $0xff] ss:$-1 sm:$0xff]  ;;  %v330_v20 = vld [vmem:[#allocation0 + $0x107] ss:$-1 sm:$0xff]  ;;  %292 = vst.msk [vmem:[#allocation1 + $0x58] sm:$0xff] %vm139_vm0, %v288_v9 }
  0x1f   :  { %299 = vst [vmem:[#allocation1 + $0x60] sm:$0xff] %v298_v12  ;;  %v326_v21 = vrot.slane %v325_v18, 3  ;;  %v331_v22 = vrot.slane %v330_v20, 3  ;;  %v338_v23 = vld [vmem:[#allocation0 + $0xf7] ss:$-1 sm:$0xff]  ;;  %312 = vst [vmem:[#allocation1 + $0x68] sm:$0xff] %v311_v16 }
  0x20   :  { %v343_v24 = vld [vmem:[#allocation0 + $0xff] ss:$-1 sm:$0xff]  ;;  %307 = vst.msk [vmem:[#allocation1 + $0x60] sm:$0xff] %vm139_vm0, %v303_v13  ;;  %v339_v25 = vrot.slane %v338_v23, 3  ;;  %v353_v27 = vld [vmem:[#allocation0 + $0xe7] ss:$-1 sm:$0xff] }
  0x21   :  { %v344_v26 = vrot.slane %v343_v24, 3  ;;  %v358_v28 = vld [vmem:[#allocation0 + $0xef] ss:$-1 sm:$0xff]  ;;  %320 = vst.msk [vmem:[#allocation1 + $0x68] sm:$0xff] %vm139_vm0, %v316_v17  ;;  %327 = vst [vmem:[#allocation1 + $0x70] sm:$0xff] %v326_v21  ;;  %v354_v29 = vrot.slane %v353_v27, 3 }
  0x22   :  { %v359_v30 = vrot.slane %v358_v28, 3  ;;  %v366_v31 = vld [vmem:[#allocation0 + $0xdf] ss:$-1 sm:$0xff]  ;;  %v371_v32 = vld [vmem:[#allocation0 + $0xe7] ss:$-1 sm:$0xff]  ;;  %335 = vst.msk [vmem:[#allocation1 + $0x70] sm:$0xff] %vm139_vm0, %v331_v22 }
  0x23   :  { %340 = vst [vmem:[#allocation1 + $0x78] sm:$0xff] %v339_v25  ;;  %v367_v33 = vrot.slane %v366_v31, 3  ;;  %v372_v34 = vrot.slane %v371_v32, 3  ;;  %v381_v35 = vld [vmem:[#allocation0 + $0xcf] ss:$-1 sm:$0xff]  ;;  %355 = vst [vmem:[#allocation1 + $0x80] sm:$0xff] %v354_v29 }
  0x24   :  { %v386_v36 = vld [vmem:[#allocation0 + $0xd7] ss:$-1 sm:$0xff]  ;;  %348 = vst.msk [vmem:[#allocation1 + $0x78] sm:$0xff] %vm139_vm0, %v344_v26  ;;  %v382_v37 = vrot.slane %v381_v35, 3  ;;  %v394_v39 = vld [vmem:[#allocation0 + $0xc7] ss:$-1 sm:$0xff] }
  0x25   :  { %v387_v38 = vrot.slane %v386_v36, 3  ;;  %v399_v40 = vld [vmem:[#allocation0 + $0xcf] ss:$-1 sm:$0xff]  ;;  %363 = vst.msk [vmem:[#allocation1 + $0x80] sm:$0xff] %vm139_vm0, %v359_v30  ;;  %368 = vst [vmem:[#allocation1 + $0x88] sm:$0xff] %v367_v33  ;;  %v395_v41 = vrot.slane %v394_v39, 3 }
  0x26   :  { %v400_v42 = vrot.slane %v399_v40, 3  ;;  %v409_v43 = vld [vmem:[#allocation0 + $0xb7] ss:$-1 sm:$0xff]  ;;  %v414_v44 = vld [vmem:[#allocation0 + $0xbf] ss:$-1 sm:$0xff]  ;;  %376 = vst.msk [vmem:[#allocation1 + $0x88] sm:$0xff] %vm139_vm0, %v372_v34 }
  0x27   :  { %383 = vst [vmem:[#allocation1 + $0x90] sm:$0xff] %v382_v37  ;;  %v410_v45 = vrot.slane %v409_v43, 3  ;;  %v415_v46 = vrot.slane %v414_v44, 3  ;;  %v422_v47 = vld [vmem:[#allocation0 + $0xaf] ss:$-1 sm:$0xff]  ;;  %396 = vst [vmem:[#allocation1 + $0x98] sm:$0xff] %v395_v41 }
  0x28   :  { %v427_v48 = vld [vmem:[#allocation0 + $0xb7] ss:$-1 sm:$0xff]  ;;  %391 = vst.msk [vmem:[#allocation1 + $0x90] sm:$0xff] %vm139_vm0, %v387_v38  ;;  %v423_v49 = vrot.slane %v422_v47, 3  ;;  %v437_v51 = vld [vmem:[#allocation0 + $0x9f] ss:$-1 sm:$0xff] }
  0x29   :  { %v428_v50 = vrot.slane %v427_v48, 3  ;;  %v442_v52 = vld [vmem:[#allocation0 + $0xa7] ss:$-1 sm:$0xff]  ;;  %404 = vst.msk [vmem:[#allocation1 + $0x98] sm:$0xff] %vm139_vm0, %v400_v42  ;;  %411 = vst [vmem:[#allocation1 + $0xa0] sm:$0xff] %v410_v45  ;;  %v438_v53 = vrot.slane %v437_v51, 3 }
  0x2a   :  { %v443_v54 = vrot.slane %v442_v52, 3  ;;  %v450_v55 = vld [vmem:[#allocation0 + $0x97] ss:$-1 sm:$0xff]  ;;  %v455_v56 = vld [vmem:[#allocation0 + $0x9f] ss:$-1 sm:$0xff]  ;;  %419 = vst.msk [vmem:[#allocation1 + $0xa0] sm:$0xff] %vm139_vm0, %v415_v46 }
  0x2b   :  { %424 = vst [vmem:[#allocation1 + $0xa8] sm:$0xff] %v423_v49  ;;  %v451_v57 = vrot.slane %v450_v55, 3  ;;  %v456_v58 = vrot.slane %v455_v56, 3  ;;  %v534_v59 = vld [vmem:[#allocation1] sm:$0xff]  ;;  %v538_v61 = vld [vmem:[#allocation1 + $0x10] sm:$0xff]  ;;  %439 = vst [vmem:[#allocation1 + $0xb0] sm:$0xff] %v438_v53 }
  0x2c   :  { %432 = vst.msk [vmem:[#allocation1 + $0xa8] sm:$0xff] %vm139_vm0, %v428_v50  ;;  %535 = vst [vmem:[%s890_s1] sm:$0xff] %v534_v59  ;;  %v540_v62 = vld [vmem:[#allocation1 + $0x18] sm:$0xff]  ;;  %v542_v63 = vld [vmem:[#allocation1 + $0x20] sm:$0xff] }
  0x2d   :  { %537 = vst [vmem:[%s890_s1 + $0x8] sm:$0xff] %v536_v60  ;;  %539 = vst [vmem:[%s890_s1 + $0x10] sm:$0xff] %v538_v61  ;;  %v544_v0 = vld [vmem:[#allocation1 + $0x28] sm:$0xff]  ;;  %v546_v1 = vld [vmem:[#allocation1 + $0x30] sm:$0xff] }
  0x2e   :  { %447 = vst.msk [vmem:[#allocation1 + $0xb0] sm:$0xff] %vm139_vm0, %v443_v54  ;;  %452 = vst [vmem:[#allocation1 + $0xb8] sm:$0xff] %v451_v57  ;;  %v548_v2 = vld [vmem:[#allocation1 + $0x38] sm:$0xff]  ;;  %v550_v3 = vld [vmem:[#allocation1 + $0x40] sm:$0xff] }
  0x2f   :  { %541 = vst [vmem:[%s890_s1 + $0x18] sm:$0xff] %v540_v62  ;;  %543 = vst [vmem:[%s890_s1 + $0x20] sm:$0xff] %v542_v63  ;;  %v552_v19 = vld [vmem:[#allocation1 + $0x48] sm:$0xff]  ;;  %v554_v4 = vld [vmem:[#allocation1 + $0x50] sm:$0xff] }
  0x30   :  { %545 = vst [vmem:[%s890_s1 + $0x28] sm:$0xff] %v544_v0  ;;  %460 = vst.msk [vmem:[#allocation1 + $0xb8] sm:$0xff] %vm139_vm0, %v456_v58  ;;  %v556_v5 = vld [vmem:[#allocation1 + $0x58] sm:$0xff]  ;;  %v558_v6 = vld [vmem:[#allocation1 + $0x60] sm:$0xff] }
  0x31   :  { %547 = vst [vmem:[%s890_s1 + $0x30] sm:$0xff] %v546_v1  ;;  %549 = vst [vmem:[%s890_s1 + $0x38] sm:$0xff] %v548_v2  ;;  %v560_v7 = vld [vmem:[#allocation1 + $0x68] sm:$0xff]  ;;  %v562_v8 = vld [vmem:[#allocation1 + $0x70] sm:$0xff] }
  0x32   :  { %551 = vst [vmem:[%s890_s1 + $0x40] sm:$0xff] %v550_v3  ;;  %553 = vst [vmem:[%s890_s1 + $0x48] sm:$0xff] %v552_v19  ;;  %v564_v9 = vld [vmem:[#allocation1 + $0x78] sm:$0xff]  ;;  %v566_v10 = vld [vmem:[#allocation1 + $0x80] sm:$0xff] }
  0x33   :  { %555 = vst [vmem:[%s890_s1 + $0x50] sm:$0xff] %v554_v4  ;;  %557 = vst [vmem:[%s890_s1 + $0x58] sm:$0xff] %v556_v5  ;;  %v568_v11 = vld [vmem:[#allocation1 + $0x88] sm:$0xff]  ;;  %v570_v12 = vld [vmem:[#allocation1 + $0x90] sm:$0xff] }
  0x34   :  { %559 = vst [vmem:[%s890_s1 + $0x60] sm:$0xff] %v558_v6  ;;  %561 = vst [vmem:[%s890_s1 + $0x68] sm:$0xff] %v560_v7  ;;  %v572_v13 = vld [vmem:[#allocation1 + $0x98] sm:$0xff]  ;;  %v574_v14 = vld [vmem:[#allocation1 + $0xa0] sm:$0xff] }
  0x35   :  { %563 = vst [vmem:[%s890_s1 + $0x70] sm:$0xff] %v562_v8  ;;  %565 = vst [vmem:[%s890_s1 + $0x78] sm:$0xff] %v564_v9  ;;  %v576_v15 = vld [vmem:[#allocation1 + $0xa8] sm:$0xff]  ;;  %v578_v16 = vld [vmem:[#allocation1 + $0xb0] sm:$0xff] }
  0x36   :  { %567 = vst [vmem:[%s890_s1 + $0x80] sm:$0xff] %v566_v10  ;;  %569 = vst [vmem:[%s890_s1 + $0x88] sm:$0xff] %v568_v11 }
  0x37   :  { %571 = vst [vmem:[%s890_s1 + $0x90] sm:$0xff] %v570_v12  ;;  %573 = vst [vmem:[%s890_s1 + $0x98] sm:$0xff] %v572_v13  ;;  %v580_v17 = vld [vmem:[#allocation1 + $0xb8] sm:$0xff] }
  0x38   :  { %575 = vst [vmem:[%s890_s1 + $0xa0] sm:$0xff] %v574_v14  ;;  %577 = vst [vmem:[%s890_s1 + $0xa8] sm:$0xff] %v576_v15 }
  0x39   :  { %579 = vst [vmem:[%s890_s1 + $0xb0] sm:$0xff] %v578_v16  ;;  %581 = vst [vmem:[%s890_s1 + $0xb8] sm:$0xff] %v580_v17 }

// kernel: reverse.10
= control target key start
LH: loop header
LB: loop body
LE: loop exit
PB: predicated region body
PF: predicated region fallthrough
CT: control target
= control target key end

     0   :  { %v95_v12 = vld [vmem:[#allocation1 + $0x16] sm:$0x1]  ;;  %v105_v13 = vld [vmem:[#allocation1 + $0x14] sm:$0x1]  ;;  %v115_v14 = vld [vmem:[#allocation1 + $0x12] sm:$0x1]  ;;  %v213_v27 = vlaneseq  ;;  %s627_s0 = inlined_call_operand.vmem [shape: f32[2,64,1,6], index: 0, kind: input, shape index: {}]   ;;  %s628_s1 = inlined_call_operand.vmem [shape: f32[2,64,1,6], index: 1, kind: output, shape index: {}]  }
   0x1   :  { %v18_v0 = vld [vmem:[%s627_s0] sm:$0x1]  ;;  %v20_v1 = vld [vmem:[%s627_s0 + $0x1] sm:$0x1]  ;;  %v22_v2 = vld [vmem:[%s627_s0 + $0x2] sm:$0x1] }
   0x2   :  { %19 = vst [vmem:[#allocation1 + $0x1] sm:$0x1] %v18_v0  ;;  %21 = vst [vmem:[#allocation1 + $0x3] sm:$0x1] %v20_v1  ;;  %v24_v3 = vld [vmem:[%s627_s0 + $0x3] sm:$0x1] }
   0x3   :  { %23 = vst [vmem:[#allocation1 + $0x5] sm:$0x1] %v22_v2  ;;  %v26_v4 = vld [vmem:[%s627_s0 + $0x4] sm:$0x1]  ;;  %v28_v5 = vld [vmem:[%s627_s0 + $0x5] sm:$0x1] }
   0x4   :  { %25 = vst [vmem:[#allocation1 + $0x7] sm:$0x1] %v24_v3  ;;  %27 = vst [vmem:[#allocation1 + $0x9] sm:$0x1] %v26_v4  ;;  %v30_v6 = vld [vmem:[%s627_s0 + $0x6] sm:$0x1] }
   0x5   :  { %29 = vst [vmem:[#allocation1 + $0xb] sm:$0x1] %v28_v5  ;;  %v32_v7 = vld [vmem:[%s627_s0 + $0x7] sm:$0x1]  ;;  %v34_v8 = vld [vmem:[%s627_s0 + $0x8] sm:$0x1] }
   0x6   :  { %31 = vst [vmem:[#allocation1 + $0xd] sm:$0x1] %v30_v6  ;;  %33 = vst [vmem:[#allocation1 + $0xf] sm:$0x1] %v32_v7  ;;  %v36_v9 = vld [vmem:[%s627_s0 + $0x9] sm:$0x1] }
   0x7   :  { %35 = vst [vmem:[#allocation1 + $0x11] sm:$0x1] %v34_v8  ;;  %v38_v10 = vld [vmem:[%s627_s0 + $0xa] sm:$0x1]  ;;  %v40_v11 = vld [vmem:[%s627_s0 + $0xb] sm:$0x1] }
   0x8   :  { %37 = vst [vmem:[#allocation1 + $0x13] sm:$0x1] %v36_v9  ;;  %39 = vst [vmem:[#allocation1 + $0x15] sm:$0x1] %v38_v10  ;;  %v125_v15 = vld [vmem:[#allocation1 + $0x10] sm:$0x1] }
   0x9   :  { %41 = vst [vmem:[#allocation1 + $0x17] sm:$0x1] %v40_v11  ;;  %97 = vst [vmem:[#allocation0 + $0xb0] sm:$0x1] %v95_v12  ;;  %v135_v16 = vld [vmem:[#allocation1 + $0xe] sm:$0x1] }
   0xa   :  { %107 = vst [vmem:[#allocation0 + $0xa0] sm:$0x1] %v105_v13  ;;  %117 = vst [vmem:[#allocation0 + $0x90] sm:$0x1] %v115_v14  ;;  %v145_v17 = vld [vmem:[#allocation1 + $0xc] sm:$0x1] }
   0xb   :  { %127 = vst [vmem:[#allocation0 + $0x80] sm:$0x1] %v125_v15  ;;  %137 = vst [vmem:[#allocation0 + $0x70] sm:$0x1] %v135_v16  ;;  %v155_v18 = vld [vmem:[#allocation1 + $0xa] sm:$0x1] }
   0xc   :  { %147 = vst [vmem:[#allocation0 + $0x60] sm:$0x1] %v145_v17  ;;  %v165_v19 = vld [vmem:[#allocation1 + $0x8] sm:$0x1]  ;;  %v175_v20 = vld [vmem:[#allocation1 + $0x6] sm:$0x1] }
   0xd   :  { %157 = vst [vmem:[#allocation0 + $0x50] sm:$0x1] %v155_v18  ;;  %167 = vst [vmem:[#allocation0 + $0x40] sm:$0x1] %v165_v19  ;;  %v185_v21 = vld [vmem:[#allocation1 + $0x4] sm:$0x1] }
   0xe   :  { %177 = vst [vmem:[#allocation0 + $0x30] sm:$0x1] %v175_v20  ;;  %v195_v22 = vld [vmem:[#allocation1 + $0x2] sm:$0x1]  ;;  %v202_v23 = vld [vmem:[#allocation1] sm:$0x1] }
   0xf   :  { %v180_v24 = vld [vmem:[#allocation1 + $0x5] sm:$0x1]  ;;  %187 = vst [vmem:[#allocation0 + $0x20] sm:$0x1] %v185_v21  ;;  %v190_v25 = vld [vmem:[#allocation1 + $0x3] sm:$0x1] }
  0x10   :  { %197 = vst [vmem:[#allocation0 + $0x10] sm:$0x1] %v195_v22  ;;  %v199_v26 = vld [vmem:[#allocation1 + $0x1] sm:$0x1]  ;;  %203 = vst [vmem:[#allocation0] sm:$0x1] %v202_v23 }
  0x11   :  { %v150_v28 = vld [vmem:[#allocation1 + $0xb] sm:$0x1]  ;;  %v160_v29 = vld [vmem:[#allocation1 + $0x9] sm:$0x1]  ;;  %v170_v30 = vld [vmem:[#allocation1 + $0x7] sm:$0x1] }
  0x12   :  { %182 = vst [vmem:[#allocation0 + $0x28] sm:$0x1] %v180_v24  ;;  %192 = vst [vmem:[#allocation0 + $0x18] sm:$0x1] %v190_v25  ;;  %v120_v31 = vld [vmem:[#allocation1 + $0x11] sm:$0x1] }
  0x13   :  { %201 = vst [vmem:[#allocation0 + $0x8] sm:$0x1] %v199_v26  ;;  %v130_v32 = vld [vmem:[#allocation1 + $0xf] sm:$0x1]  ;;  %v140_v33 = vld [vmem:[#allocation1 + $0xd] sm:$0x1] }
  0x14   :  { %152 = vst [vmem:[#allocation0 + $0x58] sm:$0x1] %v150_v28  ;;  %162 = vst [vmem:[#allocation0 + $0x48] sm:$0x1] %v160_v29  ;;  %v90_v34 = vld [vmem:[#allocation1 + $0x17] sm:$0x1] }
  0x15   :  { %172 = vst [vmem:[#allocation0 + $0x38] sm:$0x1] %v170_v30  ;;  %v100_v35 = vld [vmem:[#allocation1 + $0x15] sm:$0x1]  ;;  %v110_v36 = vld [vmem:[#allocation1 + $0x13] sm:$0x1] }
  0x16   :  { %122 = vst [vmem:[#allocation0 + $0x88] sm:$0x1] %v120_v31  ;;  %132 = vst [vmem:[#allocation0 + $0x78] sm:$0x1] %v130_v32  ;;  %v594_v37 = vshrl.u32 %v213_v27, 7 }
  0x17   :  { %142 = vst [vmem:[#allocation0 + $0x68] sm:$0x1] %v140_v33  ;;  %92 = vst [vmem:[#allocation0 + $0xb8] sm:$0x1] %v90_v34  ;;  %v289_v38 = vld [vmem:[#allocation0 + $0xb7] ss:$-1 sm:$0xff] }
  0x18   :  { %102 = vst [vmem:[#allocation0 + $0xa8] sm:$0x1] %v100_v35  ;;  %112 = vst [vmem:[#allocation0 + $0x98] sm:$0x1] %v110_v36  ;;  %v303_v39 = vld [vmem:[#allocation0 + $0xa7] ss:$-1 sm:$0xff] }
  0x19   :  { %v290_v40 = vrot.slane %v289_v38, 7  ;;  %v304_v41 = vrot.slane %v303_v39, 7  ;;  %v317_v42 = vld [vmem:[#allocation0 + $0x97] ss:$-1 sm:$0xff]  ;;  %vm215_vm0 = vcmp.lt.s32.totalorder %v594_v37, 1 }
  0x1a   :  { %v206_v43 = vld [vmem:[#allocation0 + $0x57] ss:$-1 sm:$0xff]  ;;  %v220_v44 = vld [vmem:[#allocation0 + $0x47] ss:$-1 sm:$0xff]  ;;  %v318_v45 = vrot.slane %v317_v42, 7 }
  0x1b   :  { %v207_v46 = vrot.slane %v206_v43, 7  ;;  %v221_v47 = vrot.slane %v220_v44, 7  ;;  %v234_v48 = vld [vmem:[#allocation0 + $0x37] ss:$-1 sm:$0xff]  ;;  %v248_v49 = vld [vmem:[#allocation0 + $0x27] ss:$-1 sm:$0xff] }
  0x1c   :  { %291 = vst [vmem:[#allocation2 + $0x30] sm:$0xff] %v290_v40  ;;  %305 = vst [vmem:[#allocation2 + $0x38] sm:$0xff] %v304_v41  ;;  %v235_v50 = vrot.slane %v234_v48, 7  ;;  %v249_v51 = vrot.slane %v248_v49, 7  ;;  %v253_v52 = vld [vmem:[#allocation0 + $0x2f] ss:$-1 sm:$0xff] }
  0x1d   :  { %v262_v53 = vld [vmem:[#allocation0 + $0x17] ss:$-1 sm:$0xff]  ;;  %319 = vst [vmem:[#allocation2 + $0x40] sm:$0xff] %v318_v45  ;;  %v331_v54 = vld [vmem:[#allocation0 + $0x87] ss:$-1 sm:$0xff]  ;;  %208 = vst [vmem:[#allocation2] sm:$0xff] %v207_v46 }
  0x1e   :  { %v211_v55 = vld [vmem:[#allocation0 + $0x5f] ss:$-1 sm:$0xff]  ;;  %222 = vst [vmem:[#allocation2 + $0x8] sm:$0xff] %v221_v47  ;;  %v225_v56 = vld [vmem:[#allocation0 + $0x4f] ss:$-1 sm:$0xff]  ;;  %236 = vst [vmem:[#allocation2 + $0x10] sm:$0xff] %v235_v50 }
  0x1f   :  { %v239_v57 = vld [vmem:[#allocation0 + $0x3f] ss:$-1 sm:$0xff]  ;;  %v212_v58 = vrot.slane %v211_v55, 7  ;;  %v226_v59 = vrot.slane %v225_v56, 7  ;;  %250 = vst [vmem:[#allocation2 + $0x18] sm:$0xff] %v249_v51  ;;  %v254_v61 = vrot.slane %v253_v52, 7 }
  0x20   :  { %v240_v60 = vrot.slane %v239_v57, 7  ;;  %v267_v62 = vld [vmem:[#allocation0 + $0x1f] ss:$-1 sm:$0xff]  ;;  %v263_v63 = vrot.slane %v262_v53, 7  ;;  %v275_v1 = vld [vmem:[#allocation0 + $0x7] ss:$-1 sm:$0xff] }
  0x21   :  { %v268_v0 = vrot.slane %v267_v62, 7  ;;  %v280_v2 = vld [vmem:[#allocation0 + $0xf] ss:$-1 sm:$0xff]  ;;  %216 = vst.msk [vmem:[#allocation2] sm:$0xff] %vm215_vm0, %v212_v58  ;;  %230 = vst.msk [vmem:[#allocation2 + $0x8] sm:$0xff] %vm215_vm0, %v226_v59  ;;  %v276_v3 = vrot.slane %v275_v1, 7 }
  0x22   :  { %244 = vst.msk [vmem:[#allocation2 + $0x10] sm:$0xff] %vm215_vm0, %v240_v60  ;;  %258 = vst.msk [vmem:[#allocation2 + $0x18] sm:$0xff] %vm215_vm0, %v254_v61  ;;  %v281_v4 = vrot.slane %v280_v2, 7  ;;  %v294_v5 = vld [vmem:[#allocation0 + $0xbf] ss:$-1 sm:$0xff]  ;;  %v332_v10 = vrot.slane %v331_v54, 7 }
  0x23   :  { %v308_v6 = vld [vmem:[#allocation0 + $0xaf] ss:$-1 sm:$0xff]  ;;  %264 = vst [vmem:[#allocation2 + $0x20] sm:$0xff] %v263_v63  ;;  %v295_v7 = vrot.slane %v294_v5, 7  ;;  %v322_v9 = vld [vmem:[#allocation0 + $0x9f] ss:$-1 sm:$0xff] }
  0x24   :  { %v309_v8 = vrot.slane %v308_v6, 7  ;;  %272 = vst.msk [vmem:[#allocation2 + $0x20] sm:$0xff] %vm215_vm0, %v268_v0  ;;  %277 = vst [vmem:[#allocation2 + $0x28] sm:$0xff] %v276_v3  ;;  %v323_v11 = vrot.slane %v322_v9, 7  ;;  %v336_v12 = vld [vmem:[#allocation0 + $0x8f] ss:$-1 sm:$0xff] }
  0x25   :  { %v345_v13 = vld [vmem:[#allocation0 + $0x77] ss:$-1 sm:$0xff]  ;;  %285 = vst.msk [vmem:[#allocation2 + $0x28] sm:$0xff] %vm215_vm0, %v281_v4  ;;  %299 = vst.msk [vmem:[#allocation2 + $0x30] sm:$0xff] %vm215_vm0, %v295_v7  ;;  %v337_v14 = vrot.slane %v336_v12, 7 }
  0x26   :  { %313 = vst.msk [vmem:[#allocation2 + $0x38] sm:$0xff] %vm215_vm0, %v309_v8  ;;  %333 = vst [vmem:[#allocation2 + $0x48] sm:$0xff] %v332_v10  ;;  %v346_v15 = vrot.slane %v345_v13, 7  ;;  %v350_v16 = vld [vmem:[#allocation0 + $0x7f] ss:$-1 sm:$0xff] }
  0x27   :  { %v359_v17 = vld [vmem:[#allocation0 + $0x67] ss:$-1 sm:$0xff]  ;;  %327 = vst.msk [vmem:[#allocation2 + $0x40] sm:$0xff] %vm215_vm0, %v323_v11  ;;  %v351_v18 = vrot.slane %v350_v16, 7  ;;  %v364_v20 = vld [vmem:[#allocation0 + $0x6f] ss:$-1 sm:$0xff] }
  0x28   :  { %v360_v19 = vrot.slane %v359_v17, 7  ;;  %341 = vst.msk [vmem:[#allocation2 + $0x48] sm:$0xff] %vm215_vm0, %v337_v14  ;;  %347 = vst [vmem:[#allocation2 + $0x50] sm:$0xff] %v346_v15  ;;  %v365_v21 = vrot.slane %v364_v20, 7  ;;  %v373_v22 = vld [vmem:[#allocation2] sm:$0x1] }
  0x29   :  { %355 = vst.msk [vmem:[#allocation2 + $0x50] sm:$0xff] %vm215_vm0, %v351_v18  ;;  %v377_v23 = vld [vmem:[#allocation2 + $0x8] sm:$0x1]  ;;  %v382_v24 = vld [vmem:[#allocation2 + $0x10] sm:$0x1] }
  0x2a   :  { %361 = vst [vmem:[#allocation2 + $0x58] sm:$0xff] %v360_v19  ;;  %375 = vst [vmem:[#allocation3] sm:$0x1] %v373_v22  ;;  %v388_v25 = vld [vmem:[#allocation2 + $0x18] sm:$0x1] }
  0x2b   :  { %369 = vst.msk [vmem:[#allocation2 + $0x58] sm:$0xff] %vm215_vm0, %v365_v21  ;;  %380 = vst [vmem:[#allocation3 + $0x1] sm:$0x1] %v377_v23  ;;  %v394_v26 = vld [vmem:[#allocation2 + $0x20] sm:$0x1] }
  0x2c   :  { %386 = vst [vmem:[#allocation3 + $0x2] sm:$0x1] %v382_v24  ;;  %392 = vst [vmem:[#allocation3 + $0x3] sm:$0x1] %v388_v25  ;;  %v400_v27 = vld [vmem:[#allocation2 + $0x28] sm:$0x1] }
  0x2d   :  { %398 = vst [vmem:[#allocation3 + $0x4] sm:$0x1] %v394_v26  ;;  %v406_v28 = vld [vmem:[#allocation2 + $0x30] sm:$0x1]  ;;  %v412_v29 = vld [vmem:[#allocation2 + $0x38] sm:$0x1] }
  0x2e   :  { %404 = vst [vmem:[#allocation3 + $0x5] sm:$0x1] %v400_v27  ;;  %410 = vst [vmem:[#allocation3 + $0x6] sm:$0x1] %v406_v28  ;;  %v418_v30 = vld [vmem:[#allocation2 + $0x40] sm:$0x1] }
  0x2f   :  { %416 = vst [vmem:[#allocation3 + $0x7] sm:$0x1] %v412_v29  ;;  %422 = vst [vmem:[#allocation3 + $0x8] sm:$0x1] %v418_v30  ;;  %v424_v31 = vld [vmem:[#allocation2 + $0x48] sm:$0x1] }
  0x30   :  { %428 = vst [vmem:[#allocation3 + $0x9] sm:$0x1] %v424_v31  ;;  %v430_v32 = vld [vmem:[#allocation2 + $0x50] sm:$0x1] }
  0x31   :  { %434 = vst [vmem:[#allocation3 + $0xa] sm:$0x1] %v430_v32 }
  0x32   :  { %v436_v33 = vld [vmem:[#allocation2 + $0x58] sm:$0x1] }
  0x33   :  { %440 = vst [vmem:[#allocation3 + $0xb] sm:$0x1] %v436_v33 }
  0x36   :  { %v455_v34 = vld [vmem:[#allocation3] sm:$0xff] }
  0x37   :  { %456 = vst [vmem:[%s628_s1] sm:$0xff] %v455_v34 }
  0x3a   :  { %v466_v35 = vld [vmem:[#allocation3 + $0x8] sm:$0xf] }
  0x3b   :  { %547 = vst [vmem:[%s628_s1 + $0x8] sm:$0xf] %v466_v35 }

// kernel: spectral_cnn_forward.4
= control target key start
LH: loop header
LB: loop body
LE: loop exit
PB: predicated region body
PF: predicated region fallthrough
CT: control target
= control target key end

     0   :  { %s885_s18 = smov 0   ;;  %s1109_s0 = inlined_call_operand.vmem [shape: f32[2,32,1,112], index: 0, kind: input, shape index: {}]   ;;  %s1110_s1 = inlined_call_operand.vmem [shape: f32[2,32,1,112], index: 1, kind: input, shape index: {}]   ;;  %s1111_s2 = inlined_call_operand.vmem [shape: f32[32,64,112], index: 2, kind: input, shape index: {}]   ;;  %s1112_s3 = inlined_call_operand.vmem [shape: f32[32,64,112], index: 3, kind: input, shape index: {}]   ;;  %s1113_s4 = inlined_call_operand.vmem [shape: f32[2,64,112], index: 4, kind: output, shape index: {0}]   ;;  %s1114_s5 = inlined_call_operand.vmem [shape: f32[2,64,112], index: 5, kind: output, shape index: {1}]  }
   0x1 LB: > { %s549_s19 = sadd.s32 4294967295, %s785_s18   ;;  %p553_p0 = scmp.ge.s32.totalorder %s785_s18, 1  ;;  %s785_s18 = sphi %s885_s18, %s16_s18  }
   0x2   : > { %p198_p1 = scmp.lt.s32.totalorder %s785_s18, 3 }
   0x4   : > { %p199_p2 = pnand %p553_p0, %p198_p1 }
   0x5   : > { %p234_p3 = scmp.lt.s32.totalorder (!%p199_p2), %s549_s19, 1  ;;  %v913_v0 = vmov (!%p199_p2), 0.0   ;;  %v915_v1 = vmov (!%p199_p2), 0.0   ;;  %v917_v2 = vmov (!%p199_p2), 0.0   ;;  %v919_v3 = vmov (!%p199_p2), 0.0   ;;  %s945_s9 = smov (!%p199_p2), 0  }
   0x6   : > { %202 = sbr.rel (%p199_p2) target bundleno = 41 (0x29), region = 36  ;;  %v921_v4 = vmov (!%p199_p2), 0.0   ;;  %v923_v5 = vmov (!%p199_p2), 0.0   ;;  %v925_v6 = vmov (!%p199_p2), 0.0   ;;  %v927_v7 = vmov (!%p199_p2), 0.0  }
   0x7   : > { %v929_v8 = vmov (!%p199_p2), 0.0   ;;  %v931_v9 = vmov (!%p199_p2), 0.0   ;;  %v933_v10 = vmov (!%p199_p2), 0.0   ;;  %v935_v11 = vmov (!%p199_p2), 0.0  }
   0x8   : > { %v937_v12 = vmov (!%p199_p2), 0.0   ;;  %v939_v13 = vmov (!%p199_p2), 0.0   ;;  %v941_v14 = vmov (!%p199_p2), 0.0   ;;  %v943_v15 = vmov (!%p199_p2), 0.0  }
   0xd   : > { %s1133_s19 = smov (!%p234_p3, %s549_s19), 1 }
   0xe   : > { %s554_s20 = sshll.u32 %s1133_s19, 5  ;;  %s565_s21 = sshll.u32 %s1133_s19, 6 }
   0xf   : > { %s896_s24 = scalar_lea.vmem %s1109_s0, %s554_s20  ;;  %s901_s27 = scalar_lea.vmem %s1110_s1, %s554_s20 }
  0x10   : > { %s906_s30 = scalar_lea.vmem %s1113_s4, %s565_s21  ;;  %s911_s8 = scalar_lea.vmem %s1114_s5, %s565_s21 }
  0x11 LB: >> { %s274_s10 = scalar_lea.vmem %s896_s24, %s853_s9  ;;  %s560_s11 = sshll.u32 %s853_s9, 6  ;;  %s853_s9 = sphi %s945_s9, %s257_s9   ;;  %v849_v15 = vphi %v943_v15, %v1131_v15   ;;  %v845_v14 = vphi %v941_v14, %v1130_v14   ;;  %v841_v13 = vphi %v939_v13, %v1129_v13   ;;  %v837_v12 = vphi %v937_v12, %v1128_v12   ;;  %v833_v11 = vphi %v935_v11, %v1127_v11   ;;  %v829_v10 = vphi %v933_v10, %v1126_v10   ;;  %v825_v9 = vphi %v931_v9, %v1125_v9   ;;  %v821_v8 = vphi %v929_v8, %v1124_v8   ;;  %v817_v7 = vphi %v927_v7, %v1123_v7   ;;  %v813_v6 = vphi %v925_v6, %v1122_v6   ;;  %v809_v5 = vphi %v923_v5, %v1121_v5   ;;  %v805_v4 = vphi %v921_v4, %v1120_v4   ;;  %v801_v3 = vphi %v919_v3, %v1119_v3   ;;  %v797_v2 = vphi %v917_v2, %v1118_v2   ;;  %v793_v1 = vphi %v915_v1, %v1117_v1   ;;  %v789_v0 = vphi %v913_v0, %v1116_v0  }
  0x12   : >> { %v561_v16 = vld [vmem:[%s274_s10] ss:$0 sm:$0xff]  ;;  %s279_s14 = scalar_lea.vmem %s1111_s2, %s560_s11  ;;  %s276_s15 = scalar_lea.vmem %s901_s27, %s853_s9 }
  0x13   : >> { %v988_v17 = vld [vmem:[%s279_s14] sm:$0xff]  ;;  %v990_v18 = vld [vmem:[%s279_s14 + $0x8] sm:$0xff]  ;;  %v992_v19 = vld [vmem:[%s279_s14 + $0x10] sm:$0xff]  ;;  %s288_s19 = scalar_lea.vmem %s1112_s3, %s560_s11  ;;  %s257_s9 = sadd.s32 1, %s853_s9  }
  0x14   : >> { %v996_v20 = vld [vmem:[%s279_s14 + $0x18] sm:$0xff]  ;;  %v998_v21 = vld [vmem:[%s279_s14 + $0x20] sm:$0xff]  ;;  %v1000_v22 = vld [vmem:[%s279_s14 + $0x28] sm:$0xff]  ;;  %v303_v25 = vmul.f32 %v561_v16, %v988_v17  ;;  %v304_v26 = vmul.f32 %v561_v16, %v990_v18  ;;  %v305_v27 = vmul.f32 %v561_v16, %v992_v19  ;;  %p1034_p4 = scmp.ge.s32.totalorder %s257_s9, 32  }
  0x15   : >> { %v1002_v23 = vld [vmem:[%s279_s14 + $0x30] sm:$0xff]  ;;  %v1004_v24 = vld [vmem:[%s279_s14 + $0x38] sm:$0xff]  ;;  %v306_v28 = vmul.f32 %v561_v16, %v996_v20  ;;  %v562_v29 = vld [vmem:[%s276_s15] ss:$0 sm:$0xff]  ;;  %v307_v30 = vmul.f32 %v561_v16, %v998_v21  ;;  %v308_v31 = vmul.f32 %v561_v16, %v1000_v22  ;;  %vm373_vm0 = vcmask (%p1034_p4), 916480  }
  0x16   : >> { %v309_v32 = vmul.f32 %v561_v16, %v1002_v23  ;;  %v310_v33 = vmul.f32 %v561_v16, %v1004_v24  ;;  %v289_v34 = vld [vmem:[%s288_s19] sm:$0xff]  ;;  %v290_v35 = vld [vmem:[%s288_s19 + $0x8] sm:$0xff]  ;;  %v311_v36 = vadd.f32 %v849_v15, %v303_v25  ;;  %v312_v37 = vadd.f32 %v845_v14, %v304_v26  ;;  %v291_v40 = vld [vmem:[%s288_s19 + $0x10] sm:$0xff] }
  0x17   : >> { %v313_v38 = vadd.f32 %v841_v13, %v305_v27  ;;  %v314_v39 = vadd.f32 %v837_v12, %v306_v28  ;;  %v292_v41 = vld [vmem:[%s288_s19 + $0x18] sm:$0xff]  ;;  %v293_v42 = vld [vmem:[%s288_s19 + $0x20] sm:$0xff]  ;;  %v315_v43 = vadd.f32 %v833_v11, %v307_v30  ;;  %v316_v44 = vadd.f32 %v829_v10, %v308_v31  ;;  %v294_v47 = vld [vmem:[%s288_s19 + $0x28] sm:$0xff] }
  0x18   : >> { %v317_v45 = vadd.f32 %v825_v9, %v309_v32  ;;  %v318_v46 = vadd.f32 %v821_v8, %v310_v33  ;;  %v295_v48 = vld [vmem:[%s288_s19 + $0x30] sm:$0xff]  ;;  %v296_v49 = vld [vmem:[%s288_s19 + $0x38] sm:$0xff]  ;;  %v325_v50 = vmul.f32 %v562_v29, %v289_v34  ;;  %v326_v51 = vmul.f32 %v562_v29, %v290_v35 }
  0x19   : >> { %v327_v52 = vmul.f32 %v562_v29, %v291_v40  ;;  %v328_v53 = vmul.f32 %v562_v29, %v292_v41  ;;  %v329_v54 = vmul.f32 %v562_v29, %v293_v42  ;;  %v330_v55 = vmul.f32 %v562_v29, %v294_v47 }
  0x1a   : >> { %v331_v56 = vmul.f32 %v562_v29, %v295_v48  ;;  %v332_v57 = vmul.f32 %v562_v29, %v296_v49  ;;  %v333_v58 = vsub.f32 %v311_v36, %v325_v50   ;;  %v334_v59 = vsub.f32 %v312_v37, %v326_v51  }
  0x1b   : >> { %v335_v60 = vsub.f32 %v313_v38, %v327_v52   ;;  %v336_v61 = vsub.f32 %v314_v39, %v328_v53   ;;  %v337_v62 = vsub.f32 %v315_v43, %v329_v54   ;;  %v338_v63 = vsub.f32 %v316_v44, %v330_v55  }
  0x1c   : >> { %v339_v25 = vsub.f32 %v317_v45, %v331_v56   ;;  %v340_v26 = vsub.f32 %v318_v46, %v332_v57   ;;  %v341_v8 = vmul.f32 %v561_v16, %v289_v34  ;;  %v342_v9 = vmul.f32 %v561_v16, %v290_v35  ;;  %374 = vst.msk [vmem:[%s906_s30] sm:$0xff] (%p1034_p4), %vm373_vm0, %v333_v58 }
  0x1d   : >> { %v343_v10 = vmul.f32 %v561_v16, %v291_v40  ;;  %v344_v11 = vmul.f32 %v561_v16, %v292_v41  ;;  %v345_v12 = vmul.f32 %v561_v16, %v293_v42  ;;  %v346_v13 = vmul.f32 %v561_v16, %v294_v47  ;;  %375 = vst.msk [vmem:[%s906_s30 + $0x8] sm:$0xff] (%p1034_p4), %vm373_vm0, %v334_v59 }
  0x1e   : >> { %v347_v14 = vmul.f32 %v561_v16, %v295_v48  ;;  %v348_v15 = vmul.f32 %v561_v16, %v296_v49  ;;  %v349_v27 = vadd.f32 %v817_v7, %v341_v8  ;;  %v350_v28 = vadd.f32 %v813_v6, %v342_v9  ;;  %376 = vst.msk [vmem:[%s906_s30 + $0x10] sm:$0xff] (%p1034_p4), %vm373_vm0, %v335_v60 }
  0x1f   : >> { %v351_v30 = vadd.f32 %v809_v5, %v343_v10  ;;  %v352_v31 = vadd.f32 %v805_v4, %v344_v11  ;;  %v353_v32 = vadd.f32 %v801_v3, %v345_v12  ;;  %v354_v33 = vadd.f32 %v797_v2, %v346_v13  ;;  %377 = vst.msk [vmem:[%s906_s30 + $0x18] sm:$0xff] (%p1034_p4), %vm373_vm0, %v336_v61 }
  0x20   : >> { %v355_v34 = vadd.f32 %v793_v1, %v347_v14  ;;  %v356_v35 = vadd.f32 %v789_v0, %v348_v15  ;;  %v357_v36 = vmul.f32 %v562_v29, %v988_v17  ;;  %v358_v16 = vmul.f32 %v562_v29, %v990_v18  ;;  %378 = vst.msk [vmem:[%s906_s30 + $0x20] sm:$0xff] (%p1034_p4), %vm373_vm0, %v337_v62 }
  0x21   : >> { %v359_v7 = vmul.f32 %v562_v29, %v992_v19  ;;  %v360_v6 = vmul.f32 %v562_v29, %v996_v20  ;;  %v361_v5 = vmul.f32 %v562_v29, %v998_v21  ;;  %v362_v4 = vmul.f32 %v562_v29, %v1000_v22  ;;  %379 = vst.msk [vmem:[%s906_s30 + $0x28] sm:$0xff] (%p1034_p4), %vm373_vm0, %v338_v63 }
  0x22   : >> { %v363_v3 = vmul.f32 %v562_v29, %v1002_v23  ;;  %v364_v2 = vmul.f32 %v562_v29, %v1004_v24  ;;  %v365_v37 = vadd.f32 %v357_v36, %v349_v27   ;;  %v366_v38 = vadd.f32 %v358_v16, %v350_v28   ;;  %256 = sbr.rel (!%p1034_p4) target bundleno = 17 (0x11), region = 92  ;;  %380 = vst.msk [vmem:[%s906_s30 + $0x30] sm:$0xff] (%p1034_p4), %vm373_vm0, %v339_v25 }
  0x23   : >> { %v367_v39 = vadd.f32 %v359_v7, %v351_v30   ;;  %v368_v40 = vadd.f32 %v360_v6, %v352_v31   ;;  %v369_v41 = vadd.f32 %v361_v5, %v353_v32   ;;  %v370_v17 = vadd.f32 %v362_v4, %v354_v33   ;;  %381 = vst.msk [vmem:[%s906_s30 + $0x38] sm:$0xff] (%p1034_p4), %vm373_vm0, %v340_v26 }
  0x24   : >> { %v371_v42 = vadd.f32 %v363_v3, %v355_v34   ;;  %v372_v18 = vadd.f32 %v364_v2, %v356_v35   ;;  %v1122_v6 = vmov %v366_v38  ;;  %v1123_v7 = vmov %v365_v37  ;;  %382 = vst.msk [vmem:[%s911_s8] sm:$0xff] (%p1034_p4), %vm373_vm0, %v365_v37  ;;  %383 = vst.msk [vmem:[%s911_s8 + $0x8] sm:$0xff] (%p1034_p4), %vm373_vm0, %v366_v38 }
  0x25   : >> { %v1118_v2 = vmov %v370_v17  ;;  %v1119_v3 = vmov %v369_v41  ;;  %v1120_v4 = vmov %v368_v40  ;;  %v1121_v5 = vmov %v367_v39  ;;  %384 = vst.msk [vmem:[%s911_s8 + $0x10] sm:$0xff] (%p1034_p4), %vm373_vm0, %v367_v39  ;;  %385 = vst.msk [vmem:[%s911_s8 + $0x18] sm:$0xff] (%p1034_p4), %vm373_vm0, %v368_v40 }
  0x26   : >> { %v1116_v0 = vmov %v372_v18  ;;  %v1117_v1 = vmov %v371_v42  ;;  %v1124_v8 = vmov %v340_v26  ;;  %v1125_v9 = vmov %v339_v25  ;;  %386 = vst.msk [vmem:[%s911_s8 + $0x20] sm:$0xff] (%p1034_p4), %vm373_vm0, %v369_v41  ;;  %387 = vst.msk [vmem:[%s911_s8 + $0x28] sm:$0xff] (%p1034_p4), %vm373_vm0, %v370_v17 }
  0x27   : >> { %v1126_v10 = vmov %v338_v63  ;;  %v1127_v11 = vmov %v337_v62  ;;  %v1128_v12 = vmov %v336_v61  ;;  %v1129_v13 = vmov %v335_v60  ;;  %388 = vst.msk [vmem:[%s911_s8 + $0x30] sm:$0xff] (%p1034_p4), %vm373_vm0, %v371_v42  ;;  %389 = vst.msk [vmem:[%s911_s8 + $0x38] sm:$0xff] (%p1034_p4), %vm373_vm0, %v372_v18 }
  0x28   : >> { %v1130_v14 = vmov %v334_v59  ;;  %v1131_v15 = vmov %v333_v58 }
  0x29 PF: > { %s16_s18 = sadd.s32 1, %s785_s18  }
  0x2a   : > { %p13_p5 = scmp.ge.s32.totalorder %s16_s18, 4  }
  0x2c   :  { %15 = sbr.rel (!%p13_p5) target bundleno = 1 (0x1), region = 103 }

// kernel: spectral_cnn_forward.5
= control target key start
LH: loop header
LB: loop body
LE: loop exit
PB: predicated region body
PF: predicated region fallthrough
CT: control target
= control target key end

     0   :  { %v40_v18 = vlaneseq  ;;  %v3414_v43 = vmov 1983009808   ;;  %s4218_s0 = inlined_call_operand.vmem [shape: f32[2,3136], index: 0, kind: input, shape index: {}]   ;;  %s4219_s1 = inlined_call_operand.vmem [shape: f32[1,3136], index: 1, kind: input, shape index: {}]   ;;  %s4220_s2 = inlined_call_operand.vmem [shape: bf16[3136,128], index: 2, kind: input, shape index: {}]   ;;  %s4221_s3 = inlined_call_operand.vmem [shape: f32[1,128], index: 3, kind: input, shape index: {}]   ;;  %s4222_s4 = inlined_call_operand.vmem [shape: bf16[128,10], index: 4, kind: input, shape index: {}]   ;;  %s4223_s5 = inlined_call_operand.vmem [shape: f32[1,10], index: 5, kind: input, shape index: {}]   ;;  %s4224_s6 = inlined_call_operand.hbm [shape: f32[2,10], index: 6, kind: output, shape index: {}]  }
   0x1   :  { %v3186_v0 = vld [vmem:[%s4220_s2 + $0x40] sm:$0xff]   ;;  %v3190_v4 = vld [vmem:[%s4220_s2 + $0x48] sm:$0xff]   ;;  %v3194_v8 = vld [vmem:[%s4220_s2 + $0x50] sm:$0xff]   ;;  %v143_v44 = vunpack.c.l.s4 %v3414_v43 }
   0x2   :  { %v3187_v1 = vld [vmem:[%s4220_s2] sm:$0xff]   ;;  %2872 = vmatprep.subr.bf16.mxu0 %v3186_v0  ;;  %v3191_v5 = vld [vmem:[%s4220_s2 + $0x8] sm:$0xff]   ;;  %v3195_v9 = vld [vmem:[%s4220_s2 + $0x10] sm:$0xff]   ;;  %v41_v23 = vshrl.u32 %v40_v18, 7 }
   0x3   :  { %v3188_v2 = vld [vmem:[%s4220_s2 + $0xc0] sm:$0xff]   ;;  %2873 = vmatpush3.bf16.msra.mxu0 %v3187_v1  ;;  %v3192_v6 = vld [vmem:[%s4220_s2 + $0xc8] sm:$0xff]   ;;  %v3196_v10 = vld [vmem:[%s4220_s2 + $0xd0] sm:$0xff]   ;;  %v144_v48 = vunpack.c.0.s8 %v143_v44 }
   0x4   :  { %v3189_v3 = vld [vmem:[%s4220_s2 + $0x80] sm:$0xff]   ;;  %2894 = vmatprep.subr.bf16.mxu1 %v3188_v2  ;;  %2874 = vmatprep.subr.bf16.mxu0 %v3190_v4  ;;  %v3193_v7 = vld [vmem:[%s4220_s2 + $0x88] sm:$0xff]   ;;  %v3197_v11 = vld [vmem:[%s4220_s2 + $0x90] sm:$0xff]   ;;  %v3531_v28 = vsub.s32 0, %v41_v23  ;;  %v3536_v30 = vsub.s32 1, %v41_v23  ;;  %v3541_v32 = vsub.s32 2, %v41_v23 }
   0x5   :  { %2895 = vmatpush3.bf16.msra.mxu1 %v3189_v3  ;;  %v3198_v12 = vld [vmem:[%s4220_s2 + $0x58] sm:$0xff]   ;;  %v3202_v16 = vld [vmem:[%s4220_s2 + $0x60] sm:$0xff]   ;;  %v3206_v21 = vld [vmem:[%s4220_s2 + $0x68] sm:$0xff]   ;;  %v3546_v34 = vsub.s32 3, %v41_v23  ;;  %v3570_v50 = vsub.s32 %v144_v48, %v41_v23  ;;  %v3577_v56 = vsub.s32 4, %v41_v23  ;;  %v3579_v57 = vsub.s32 5, %v41_v23 }
   0x6   :  { %2896 = vmatprep.subr.bf16.mxu1 %v3192_v6  ;;  %v3199_v13 = vld [vmem:[%s4220_s2 + $0x18] sm:$0xff]   ;;  %v3203_v17 = vld [vmem:[%s4220_s2 + $0x20] sm:$0xff]   ;;  %v3207_v22 = vld [vmem:[%s4220_s2 + $0x28] sm:$0xff]   ;;  %v3581_v58 = vsub.s32 6, %v41_v23  ;;  %v3583_v59 = vsub.s32 7, %v41_v23 }
   0x7   :  { %2875 = vmatpush3.bf16.msra.mxu0 %v3191_v5  ;;  %v3200_v14 = vld [vmem:[%s4220_s2 + $0xd8] sm:$0xff]   ;;  %v3204_v19 = vld [vmem:[%s4220_s2 + $0xe0] sm:$0xff]   ;;  %v3208_v24 = vld [vmem:[%s4220_s2 + $0xe8] sm:$0xff]  }
   0x8   :  { %2876 = vmatprep.subr.bf16.mxu0 %v3194_v8  ;;  %v3201_v15 = vld [vmem:[%s4220_s2 + $0x98] sm:$0xff]   ;;  %v3205_v20 = vld [vmem:[%s4220_s2 + $0xa0] sm:$0xff]   ;;  %v3209_v25 = vld [vmem:[%s4220_s2 + $0xa8] sm:$0xff]  }
   0x9   :  { %2897 = vmatpush3.bf16.msra.mxu1 %v3193_v7  ;;  %v3210_v26 = vld [vmem:[%s4220_s2 + $0x70] sm:$0xff]   ;;  %v3214_v33 = vld [vmem:[%s4220_s2 + $0x78] sm:$0xff]   ;;  %v32_v37 = vld [vmem:[%s4219_s1] sm:$0xff] }
   0xa   :  { %2898 = vmatprep.subr.bf16.mxu1 %v3196_v10  ;;  %v3211_v27 = vld [vmem:[%s4220_s2 + $0x30] sm:$0xff]   ;;  %v3215_v35 = vld [vmem:[%s4220_s2 + $0x38] sm:$0xff]   ;;  %v43_v38 = vrot.slane %v32_v37, %v3531_v28  ;;  %v47_v39 = vrot.slane %v32_v37, %v3536_v30  ;;  %v51_v40 = vrot.slane %v32_v37, %v3541_v32  ;;  %v55_v41 = vrot.slane %v32_v37, %v3546_v34  ;;  %v3218_v45 = vld [vmem:[%s4220_s2 + $0x140] sm:$0xff]  }
   0xb   :  { %2877 = vmatpush3.bf16.msra.mxu0 %v3195_v9  ;;  %v3212_v29 = vld [vmem:[%s4220_s2 + $0xf0] sm:$0xff]   ;;  %v3216_v36 = vld [vmem:[%s4220_s2 + $0xf8] sm:$0xff]   ;;  %v3220_v49 = vld [vmem:[%s4220_s2 + $0x1c0] sm:$0xff]   ;;  %v59_v63 = vrot.slane %v32_v37, %v3577_v56  ;;  %v63_v0 = vrot.slane %v32_v37, %v3579_v57  ;;  %v67_v1 = vrot.slane %v32_v37, %v3581_v58  ;;  %v71_v2 = vrot.slane %v32_v37, %v3583_v59 }
   0xc   :  { %2878 = vmatprep.subr.bf16.mxu0 %v3198_v12  ;;  %v3213_v31 = vld [vmem:[%s4220_s2 + $0xb0] sm:$0xff]   ;;  %v3217_v42 = vld [vmem:[%s4220_s2 + $0xb8] sm:$0xff]   ;;  %v140_v46 = vcombine.low %v43_v38, %v47_v39  ;;  %v141_v47 = vcombine.low %v51_v40, %v55_v41  ;;  %v25_v53 = vld [vmem:[%s4218_s0] sm:$0xff] }
   0xd   :  { %2899 = vmatpush3.bf16.msra.mxu1 %v3197_v11  ;;  %v3219_v6 = vld [vmem:[%s4220_s2 + $0x100] sm:$0xff]   ;;  %v3222_v11 = vld [vmem:[%s4220_s2 + $0x148] sm:$0xff]   ;;  %v157_v12 = vcombine.low %v59_v63, %v63_v0  ;;  %v3226_v18 = vld [vmem:[%s4220_s2 + $0x150] sm:$0xff]  }
   0xe   :  { %2900 = vmatprep.subr.bf16.mxu1 %v3200_v14  ;;  %v148_v51 = vrot.slane %v140_v46, %v3570_v50  ;;  %v155_v52 = vrot.slane %v141_v47, %v3570_v50  ;;  %v3221_v9 = vld [vmem:[%s4220_s2 + $0x180] sm:$0xff]   ;;  %v3229_v23 = vld [vmem:[%s4220_s2 + $0x190] sm:$0xff]   ;;  %v3238_v40 = vld [vmem:[%s4220_s2 + $0x168] sm:$0xff]  }
   0xf   :  { %2879 = vmatpush3.bf16.msra.mxu0 %v3199_v13  ;;  %v158_v13 = vcombine.low %v67_v1, %v71_v2  ;;  %v3236_v37 = vld [vmem:[%s4220_s2 + $0x1e0] sm:$0xff]   ;;  %v3239_v43 = vld [vmem:[%s4220_s2 + $0x128] sm:$0xff]   ;;  %v3242_v48 = vld [vmem:[%s4220_s2 + $0x170] sm:$0xff]  }
  0x10   :  { %2880 = vmatprep.subr.bf16.mxu0 %v3202_v16  ;;  %v156_v54 = vcombine.low %v148_v51, %v155_v52  ;;  %v3224_v16 = vld [vmem:[%s4220_s2 + $0x1c8] sm:$0xff]   ;;  %v3237_v39 = vld [vmem:[%s4220_s2 + $0x1a0] sm:$0xff]   ;;  %v3243_v52 = vld [vmem:[%s4220_s2 + $0x130] sm:$0xff]  }
  0x11   :  { %2901 = vmatpush3.bf16.msra.mxu1 %v3201_v15  ;;  %v3223_v15 = vld [vmem:[%s4220_s2 + $0x108] sm:$0xff]   ;;  %v3249_v63 = vld [vmem:[%s4220_s2 + $0x1b8] sm:$0xff]   ;;  %v3250_v0 = vld [vmem:[%s4220_s2 + $0x240] sm:$0xff]  }
  0x12   :  { %2902 = vmatprep.subr.bf16.mxu1 %v3204_v19  ;;  %v256_v55 = vadd.f32 %v156_v54, %v25_v53  ;;  %v165_v19 = vrot.slane %v157_v12, %v3570_v50  ;;  %v3240_v44 = vld [vmem:[%s4220_s2 + $0x1e8] sm:$0xff]   ;;  %v3244_v53 = vld [vmem:[%s4220_s2 + $0x1f0] sm:$0xff]   ;;  %v3251_v1 = vld [vmem:[%s4220_s2 + $0x200] sm:$0xff]  }
  0x13   :  { %2881 = vmatpush3.bf16.msra.mxu0 %v3203_v17  ;;  %v3225_v17 = vld [vmem:[%s4220_s2 + $0x188] sm:$0xff]   ;;  %v3260_v12 = vld [vmem:[%s4220_s2 + $0x2d0] sm:$0xff]  }
  0x14   :  { %2882 = vmatprep.subr.bf16.mxu0 %v3206_v21  ;;  %v263_v60 = vmax.f32 %v256_v55, 0.0  ;;  %v3227_v21 = vld [vmem:[%s4220_s2 + $0x110] sm:$0xff]   ;;  %v3241_v47 = vld [vmem:[%s4220_s2 + $0x1a8] sm:$0xff]  }
  0x15   :  { %2903 = vmatpush3.bf16.msra.mxu1 %v3205_v20  ;;  %v172_v20 = vrot.slane %v158_v13, %v3570_v50  ;;  %v3245_v55 = vld [vmem:[%s4220_s2 + $0x1b0] sm:$0xff]  }
  0x16   :  { %2904 = vmatprep.subr.bf16.mxu1 %v3208_v24  ;;  %v284_v61 = vrot.slane %v263_v60, %v3570_v50  ;;  %v277_v62 = vcombine.high %v263_v60, %v263_v60  ;;  %v3230_v24 = vld [vmem:[%s4220_s2 + $0x158] sm:$0xff]   ;;  %v3261_v13 = vld [vmem:[%s4220_s2 + $0x290] sm:$0xff]  }
  0x17   :  { %2883 = vmatpush3.bf16.msra.mxu0 %v3207_v22  ;;  %v3228_v22 = vld [vmem:[%s4220_s2 + $0x1d0] sm:$0xff]   ;;  %v3246_v60 = vld [vmem:[%s4220_s2 + $0x178] sm:$0xff]  }
  0x18   :  { %2884 = vmatprep.subr.bf16.mxu0 %v3210_v26  ;;  %v292_v3 = vcombine.high %v284_v61, %v284_v61  ;;  %v291_v4 = vrot.slane %v277_v62, %v3570_v50  ;;  %v411_v5 = vpack.c.bf16 %v284_v61, %v284_v61  ;;  %v3231_v26 = vld [vmem:[%s4220_s2 + $0x118] sm:$0xff]  }
  0x19   :  { %2905 = vmatpush3.bf16.msra.mxu1 %v3209_v25  ;;  %v173_v25 = vcombine.low %v165_v19, %v172_v20  ;;  %v3247_v61 = vld [vmem:[%s4220_s2 + $0x138] sm:$0xff]   ;;  %v3742_v19 = vld [vmem:[%s4219_s1 + $0x8] sm:$0xff]  ;;  %v3267_v20 = vld [vmem:[%s4220_s2 + $0x220] sm:$0xff]  }
  0x1a   :  { %2906 = vmatprep.subr.bf16.mxu1 %v3212_v29  ;;  %v412_v7 = vpack.c.bf16 %v292_v3, %v292_v3  ;;  %v293_v8 = vcombine.high %v291_v4, %v291_v4  ;;  %v413_v10 = vpack.c.bf16 %v291_v4, %v291_v4  ;;  %v3233_v29 = vld [vmem:[%s4220_s2 + $0x198] sm:$0xff]   ;;  %v3252_v3 = vld [vmem:[%s4220_s2 + $0x2c0] sm:$0xff]  }
  0x1b   :  { %2885 = vmatpush3.bf16.msra.mxu0 %v3211_v27  ;;  %v3232_v27 = vld [vmem:[%s4220_s2 + $0x1d8] sm:$0xff]   ;;  %v3253_v4 = vld [vmem:[%s4220_s2 + $0x280] sm:$0xff]  }
  0x1c   :  { %2886 = vmatprep.subr.bf16.mxu0 %v3214_v33  ;;  %2047 = vmatprep.mubr.bf16.mxu0 %v412_v7  ;;  %v414_v14 = vpack.c.bf16 %v293_v8, %v293_v8  ;;  %v3234_v33 = vld [vmem:[%s4220_s2 + $0x160] sm:$0xff]   ;;  %v3248_v62 = vld [vmem:[%s4220_s2 + $0x1f8] sm:$0xff]   ;;  %v3255_v7 = vld [vmem:[%s4220_s2 + $0x208] sm:$0xff]  }
  0x1d   :  { %2907 = vmatpush3.bf16.msra.mxu1 %v3213_v31  ;;  %v26_v31 = vld [vmem:[%s4218_s0 + $0x8] sm:$0xff] }
  0x1e   :  { %2908 = vmatprep.subr.bf16.mxu1 %v3216_v36  ;;  %2087 = vmatprep.mubr.bf16.mxu1 %v414_v14  ;;  %v3235_v36 = vld [vmem:[%s4220_s2 + $0x120] sm:$0xff]   ;;  %v3256_v8 = vld [vmem:[%s4220_s2 + $0x2c8] sm:$0xff]   ;;  %v3262_v14 = vld [vmem:[%s4220_s2 + $0x258] sm:$0xff]  }
  0x1f   :  { %2887 = vmatpush3.bf16.msra.mxu0 %v3215_v35  ;;  %v257_v35 = vadd.f32 %v173_v25, %v26_v31  ;;  %v3268_v25 = vld [vmem:[%s4220_s2 + $0x2e0] sm:$0xff]   ;;  %v3270_v31 = vld [vmem:[%s4220_s2 + $0x268] sm:$0xff]  }
  0x20   :  { %2916 = vmatprep.subr.bf16.mxu0 %v3218_v45 }
  0x21   :  { %2909 = vmatpush3.bf16.msra.mxu1 %v3217_v42  ;;  %v264_v38 = vmax.f32 %v257_v35, 0.0  ;;  %v3272_v35 = vld [vmem:[%s4220_s2 + $0x2e8] sm:$0xff]  }
  0x22   :  { %2938 = vmatprep.subr.bf16.mxu1 %v3220_v49  ;;  %2048 = vmatmul.mubr.bf16.vlgmr.msra.gmra.mrb[0].mxu0 %v411_v5 }
  0x23   :  { %2917 = vmatpush3.bf16.msra.mxu0 %v3219_v6  ;;  %v301_v41 = vrot.slane %v264_v38, %v3570_v50  ;;  %v294_v42 = vcombine.high %v264_v38, %v264_v38  ;;  %v3254_v6 = vld [vmem:[%s4220_s2 + $0x248] sm:$0xff]   ;;  %v27_v38 = vld [vmem:[%s4218_s0 + $0x10] sm:$0xff] }
  0x24   :  { %2088 = vmatmul.mubr.bf16.vlgmr.msra.gmra.mrb[0].mxu1 %v413_v10  ;;  %2918 = vmatprep.subr.bf16.mxu0 %v3222_v11  ;;  %v3258_v10 = vld [vmem:[%s4220_s2 + $0x250] sm:$0xff]  }
  0x25   :  { %2939 = vmatpush3.bf16.msra.mxu1 %v3221_v9  ;;  %v309_v45 = vcombine.high %v301_v41, %v301_v41  ;;  %v308_v46 = vrot.slane %v294_v42, %v3570_v50  ;;  %v415_v2 = vpack.c.bf16 %v301_v41, %v301_v41  ;;  %v3257_v9 = vld [vmem:[%s4220_s2 + $0x288] sm:$0xff]   ;;  %v3259_v11 = vld [vmem:[%s4220_s2 + $0x210] sm:$0xff]  }
  0x26   :  { %2940 = vmatprep.subr.bf16.mxu1 %v3224_v16  ;;  %v3264_v16 = vld [vmem:[%s4220_s2 + $0x2d8] sm:$0xff]   ;;  %v3274_v41 = vld [vmem:[%s4220_s2 + $0x270] sm:$0xff]  }
  0x27   :  { %2919 = vmatpush3.bf16.msra.mxu0 %v3223_v15  ;;  %v416_v49 = vpack.c.bf16 %v309_v45, %v309_v45  ;;  %v310_v51 = vcombine.high %v308_v46, %v308_v46  ;;  %v417_v5 = vpack.c.bf16 %v308_v46, %v308_v46  ;;  %v3263_v15 = vld [vmem:[%s4220_s2 + $0x218] sm:$0xff]   ;;  %v3275_v42 = vld [vmem:[%s4220_s2 + $0x230] sm:$0xff]  }
  0x28   :  { %2920 = vmatprep.subr.bf16.mxu0 %v3226_v18  ;;  %v3266_v18 = vld [vmem:[%s4220_s2 + $0x260] sm:$0xff]   ;;  %v3277_v45 = vld [vmem:[%s4220_s2 + $0x2b0] sm:$0xff]  }
  0x29   :  { %2941 = vmatpush3.bf16.msra.mxu1 %v3225_v17  ;;  %2127 = vmatprep.mubr.bf16.mxu0 %v416_v49  ;;  %v418_v54 = vpack.c.bf16 %v310_v51, %v310_v51  ;;  %v3265_v17 = vld [vmem:[%s4220_s2 + $0x298] sm:$0xff]  }
  0x2a   :  { %2942 = vmatprep.subr.bf16.mxu1 %v3228_v22  ;;  %v79_v22 = vrot.slane %v3742_v19, %v3536_v30 }
  0x2b   :  { %2921 = vmatpush3.bf16.msra.mxu0 %v3227_v21  ;;  %2167 = vmatprep.mubr.bf16.mxu1 %v418_v54  ;;  %v75_v21 = vrot.slane %v3742_v19, %v3531_v28  ;;  %v3281_v54 = vld [vmem:[%s4220_s2 + $0x2b8] sm:$0xff]  }
  0x2c   :  { %2922 = vmatprep.subr.bf16.mxu0 %v3230_v24  ;;  %v87_v24 = vrot.slane %v3742_v19, %v3546_v34 }
  0x2d   :  { %2943 = vmatpush3.bf16.msra.mxu1 %v3229_v23  ;;  %v83_v23 = vrot.slane %v3742_v19, %v3541_v32 }
  0x2e   :  { %2944 = vmatprep.subr.bf16.mxu1 %v3232_v27  ;;  %v174_v27 = vcombine.low %v75_v21, %v79_v22  ;;  %v3294_v21 = vld [vmem:[%s4220_s2 + $0x358] sm:$0xff]  }
  0x2f   :  { %2923 = vmatpush3.bf16.msra.mxu0 %v3231_v26  ;;  %v3269_v26 = vld [vmem:[%s4220_s2 + $0x2a0] sm:$0xff]   ;;  %v3295_v22 = vld [vmem:[%s4220_s2 + $0x318] sm:$0xff]  }
  0x30   :  { %2924 = vmatprep.subr.bf16.mxu0 %v3234_v33  ;;  %v3271_v33 = vld [vmem:[%s4220_s2 + $0x228] sm:$0xff]  }
  0x31   :  { %2945 = vmatpush3.bf16.msra.mxu1 %v3233_v29  ;;  %v175_v29 = vcombine.low %v83_v23, %v87_v24  ;;  %v3296_v24 = vld [vmem:[%s4220_s2 + $0x3d8] sm:$0xff]  }
  0x32   :  { %2946 = vmatprep.subr.bf16.mxu1 %v3236_v37 }
  0x33   :  { %2925 = vmatpush3.bf16.msra.mxu0 %v3235_v36  ;;  %v182_v36 = vrot.slane %v174_v27, %v3570_v50  ;;  %v189_v37 = vrot.slane %v175_v29, %v3570_v50  ;;  %v28_v27 = vld [vmem:[%s4218_s0 + $0x18] sm:$0xff]  ;;  %v3299_v29 = vld [vmem:[%s4220_s2 + $0x320] sm:$0xff]  }
  0x34   :  { %2926 = vmatprep.subr.bf16.mxu0 %v3238_v40 }
  0x35   :  { %2947 = vmatpush3.bf16.msra.mxu1 %v3237_v39  ;;  %v3273_v39 = vld [vmem:[%s4220_s2 + $0x2a8] sm:$0xff]   ;;  %v190_v40 = vcombine.low %v182_v36, %v189_v37 }
  0x36   :  { %2948 = vmatprep.subr.bf16.mxu1 %v3240_v44  ;;  %v3276_v44 = vld [vmem:[%s4220_s2 + $0x2f0] sm:$0xff]   ;;  %v3302_v37 = vld [vmem:[%s4220_s2 + $0x368] sm:$0xff]  }
  0x37   :  { %2927 = vmatpush3.bf16.msra.mxu0 %v3239_v43  ;;  %v258_v43 = vadd.f32 %v190_v40, %v27_v38  ;;  %v3303_v38 = vld [vmem:[%s4220_s2 + $0x328] sm:$0xff]  }
  0x38   :  { %2928 = vmatprep.subr.bf16.mxu0 %v3242_v48  ;;  %v3279_v48 = vld [vmem:[%s4220_s2 + $0x238] sm:$0xff]  }
  0x39   :  { %2949 = vmatpush3.bf16.msra.mxu1 %v3241_v47  ;;  %v265_v46 = vmax.f32 %v258_v43, 0.0  ;;  %v3278_v47 = vld [vmem:[%s4220_s2 + $0x278] sm:$0xff]  }
  0x3a   :  { %2950 = vmatprep.subr.bf16.mxu1 %v3244_v53 }
  0x3b   :  { %2929 = vmatpush3.bf16.msra.mxu0 %v3243_v52  ;;  %v318_v49 = vrot.slane %v265_v46, %v3570_v50  ;;  %v311_v51 = vcombine.high %v265_v46, %v265_v46  ;;  %v3280_v52 = vld [vmem:[%s4220_s2 + $0x2f8] sm:$0xff]   ;;  %v3307_v46 = vld [vmem:[%s4220_s2 + $0x330] sm:$0xff]  }
  0x3c   :  { %2930 = vmatprep.subr.bf16.mxu0 %v3246_v60  ;;  %v3282_v60 = vld [vmem:[%s4220_s2 + $0x340] sm:$0xff]  }
  0x3d   :  { %2951 = vmatpush3.bf16.msra.mxu1 %v3245_v55  ;;  %v326_v53 = vcombine.high %v318_v49, %v318_v49  ;;  %v325_v55 = vrot.slane %v311_v51, %v3570_v50  ;;  %v3309_v51 = vld [vmem:[%s4220_s2 + $0x3b0] sm:$0xff]  }
  0x3e   :  { %2952 = vmatprep.subr.bf16.mxu1 %v3248_v62  ;;  %v95_v62 = vrot.slane %v3742_v19, %v3579_v57 }
  0x3f   :  { %2931 = vmatpush3.bf16.msra.mxu0 %v3247_v61  ;;  %v91_v61 = vrot.slane %v3742_v19, %v3577_v56 }
  0x40   :  { %2960 = vmatprep.subr.bf16.mxu0 %v3250_v0  ;;  %v327_v0 = vcombine.high %v325_v55, %v325_v55 }
  0x41   :  { %2953 = vmatpush3.bf16.msra.mxu1 %v3249_v63  ;;  %v420_v63 = vpack.c.bf16 %v326_v53, %v326_v53  ;;  %v3310_v53 = vld [vmem:[%s4220_s2 + $0x378] sm:$0xff]  }
  0x42   :  { %2128 = vmatmul.mubr.bf16.vlgmr.msra.gmra.mrb[4].mxu0 %v415_v2  ;;  %2982 = vmatprep.subr.bf16.mxu1 %v3252_v3  ;;  %v99_v2 = vrot.slane %v3742_v19, %v3581_v58  ;;  %v103_v3 = vrot.slane %v3742_v19, %v3583_v59  ;;  %v3292_v19 = vld [vmem:[%s4220_s2 + $0x3d0] sm:$0xff]  }
  0x43   :  { %2961 = vmatpush3.bf16.msra.mxu0 %v3251_v1  ;;  %v3283_v1 = vld [vmem:[%s4220_s2 + $0x300] sm:$0xff]   ;;  %2207 = vmatprep.mubr.bf16.mxu0 %v420_v63 }
  0x44   :  { %2168 = vmatmul.mubr.bf16.vlgmr.msra.gmra.mrb[4].mxu1 %v417_v5  ;;  %2962 = vmatprep.subr.bf16.mxu0 %v3254_v6  ;;  %v3284_v5 = vld [vmem:[%s4220_s2 + $0x3c0] sm:$0xff]   ;;  %v422_v6 = vpack.c.bf16 %v327_v0, %v327_v0 }
  0x45   :  { %2983 = vmatpush3.bf16.msra.mxu1 %v3253_v4  ;;  %v419_v4 = vpack.c.bf16 %v318_v49, %v318_v49  ;;  %v3308_v49 = vld [vmem:[%s4220_s2 + $0x3f0] sm:$0xff]   ;;  %v3316_v0 = vld [vmem:[%s4220_s2 + $0x4c0] sm:$0xff]  }
  0x46   :  { %2984 = vmatprep.subr.bf16.mxu1 %v3256_v8  ;;  %v421_v8 = vpack.c.bf16 %v325_v55, %v325_v55  ;;  %2247 = vmatprep.mubr.bf16.mxu1 %v422_v6  ;;  %v3312_v55 = vld [vmem:[%s4220_s2 + $0x3f8] sm:$0xff]   ;;  %v3321_v6 = vld [vmem:[%s4220_s2 + $0x488] sm:$0xff]  }
  0x47   :  { %2963 = vmatpush3.bf16.msra.mxu0 %v3255_v7  ;;  %v3285_v7 = vld [vmem:[%s4220_s2 + $0x380] sm:$0xff]  }
  0x48   :  { %2964 = vmatprep.subr.bf16.mxu0 %v3258_v10  ;;  %v3287_v10 = vld [vmem:[%s4220_s2 + $0x308] sm:$0xff]  }
  0x49   :  { %2985 = vmatpush3.bf16.msra.mxu1 %v3257_v9  ;;  %v3286_v9 = vld [vmem:[%s4220_s2 + $0x348] sm:$0xff]  }
  0x4a   :  { %2986 = vmatprep.subr.bf16.mxu1 %v3260_v12  ;;  %v192_v12 = vcombine.low %v99_v2, %v103_v3  ;;  %v3318_v3 = vld [vmem:[%s4220_s2 + $0x448] sm:$0xff]  }
  0x4b   :  { %2965 = vmatpush3.bf16.msra.mxu0 %v3259_v11  ;;  %v191_v11 = vcombine.low %v91_v61, %v95_v62  ;;  %v3314_v61 = vld [vmem:[%s4220_s2 + $0x440] sm:$0xff]  }
  0x4c   :  { %2966 = vmatprep.subr.bf16.mxu0 %v3262_v14  ;;  %v3289_v14 = vld [vmem:[%s4220_s2 + $0x388] sm:$0xff]   ;;  %v3315_v62 = vld [vmem:[%s4220_s2 + $0x400] sm:$0xff]  }
  0x4d   :  { %2987 = vmatpush3.bf16.msra.mxu1 %v3261_v13  ;;  %v3288_v13 = vld [vmem:[%s4220_s2 + $0x3c8] sm:$0xff]  }
  0x4e   :  { %2988 = vmatprep.subr.bf16.mxu1 %v3264_v16  ;;  %v3291_v16 = vld [vmem:[%s4220_s2 + $0x310] sm:$0xff]  }
  0x4f   :  { %2967 = vmatpush3.bf16.msra.mxu0 %v3263_v15  ;;  %v3290_v15 = vld [vmem:[%s4220_s2 + $0x350] sm:$0xff]  }
  0x50   :  { %2968 = vmatprep.subr.bf16.mxu0 %v3266_v18  ;;  %v206_v18 = vrot.slane %v192_v12, %v3570_v50  ;;  %v3327_v12 = vld [vmem:[%s4220_s2 + $0x418] sm:$0xff]  }
  0x51   :  { %2989 = vmatpush3.bf16.msra.mxu1 %v3265_v17  ;;  %v199_v17 = vrot.slane %v191_v11, %v3570_v50  ;;  %v3326_v11 = vld [vmem:[%s4220_s2 + $0x458] sm:$0xff]  }
  0x52   :  { %2990 = vmatprep.subr.bf16.mxu1 %v3268_v25  ;;  %v3297_v25 = vld [vmem:[%s4220_s2 + $0x398] sm:$0xff]  }
  0x53   :  { %2969 = vmatpush3.bf16.msra.mxu0 %v3267_v20  ;;  %v3293_v20 = vld [vmem:[%s4220_s2 + $0x390] sm:$0xff]   ;;  %v207_v23 = vcombine.low %v199_v17, %v206_v18  ;;  %v3332_v18 = vld [vmem:[%s4220_s2 + $0x4e0] sm:$0xff]  }
  0x54   :  { %2970 = vmatprep.subr.bf16.mxu0 %v3270_v31  ;;  %v3972_v17 = vld [vmem:[%s4219_s1 + $0x10] sm:$0xff] }
  0x55   :  { %2991 = vmatpush3.bf16.msra.mxu1 %v3269_v26  ;;  %v3298_v26 = vld [vmem:[%s4220_s2 + $0x360] sm:$0xff]   ;;  %v259_v31 = vadd.f32 %v207_v23, %v28_v27 }
  0x56   :  { %2992 = vmatprep.subr.bf16.mxu1 %v3272_v35  ;;  %v3301_v35 = vld [vmem:[%s4220_s2 + $0x3a0] sm:$0xff]  }
  0x57   :  { %2971 = vmatpush3.bf16.msra.mxu0 %v3271_v33  ;;  %v3300_v33 = vld [vmem:[%s4220_s2 + $0x3e0] sm:$0xff]   ;;  %v266_v36 = vmax.f32 %v259_v31, 0.0 }
  0x58   :  { %2972 = vmatprep.subr.bf16.mxu0 %v3274_v41  ;;  %v3304_v41 = vld [vmem:[%s4220_s2 + $0x3e8] sm:$0xff]   ;;  %v3333_v23 = vld [vmem:[%s4220_s2 + $0x4a0] sm:$0xff]  }
  0x59   :  { %2993 = vmatpush3.bf16.msra.mxu1 %v3273_v39  ;;  %v335_v39 = vrot.slane %v266_v36, %v3570_v50  ;;  %v328_v40 = vcombine.high %v266_v36, %v266_v36  ;;  %v29_v27 = vld [vmem:[%s4218_s0 + $0x20] sm:$0xff] }
  0x5a   :  { %2994 = vmatprep.subr.bf16.mxu1 %v3276_v44 }
  0x5b   :  { %2973 = vmatpush3.bf16.msra.mxu0 %v3275_v42  ;;  %v3305_v42 = vld [vmem:[%s4220_s2 + $0x3a8] sm:$0xff]   ;;  %v343_v43 = vcombine.high %v335_v39, %v335_v39  ;;  %v342_v44 = vrot.slane %v328_v40, %v3570_v50  ;;  %v423_v63 = vpack.c.bf16 %v335_v39, %v335_v39  ;;  %v3341_v40 = vld [vmem:[%s4220_s2 + $0x4b0] sm:$0xff]  }
  0x5c   :  { %2974 = vmatprep.subr.bf16.mxu0 %v3278_v47 }
  0x5d   :  { %2995 = vmatpush3.bf16.msra.mxu1 %v3277_v45  ;;  %v3306_v45 = vld [vmem:[%s4220_s2 + $0x370] sm:$0xff]   ;;  %v424_v47 = vpack.c.bf16 %v343_v43, %v343_v43  ;;  %v425_v2 = vpack.c.bf16 %v342_v44, %v342_v44 }
  0x5e   :  { %2996 = vmatprep.subr.bf16.mxu1 %v3280_v52 }
  0x5f   :  { %2975 = vmatpush3.bf16.msra.mxu0 %v3279_v48  ;;  %v344_v48 = vcombine.high %v342_v44, %v342_v44  ;;  %v3343_v44 = vld [vmem:[%s4220_s2 + $0x438] sm:$0xff]  }
  0x60   :  { %3004 = vmatprep.subr.bf16.mxu0 %v3282_v60  ;;  %v3313_v60 = vld [vmem:[%s4220_s2 + $0x3b8] sm:$0xff]  }
  0x61   :  { %2997 = vmatpush3.bf16.msra.mxu1 %v3281_v54  ;;  %v426_v52 = vpack.c.bf16 %v344_v48, %v344_v48  ;;  %v3311_v54 = vld [vmem:[%s4220_s2 + $0x338] sm:$0xff]  }
  0x62   :  { %2208 = vmatmul.mubr.bf16.vlgmr.msra.gmra.mrb[8].mxu0 %v419_v4  ;;  %3026 = vmatprep.subr.bf16.mxu1 %v3284_v5  ;;  %v3319_v4 = vld [vmem:[%s4220_s2 + $0x408] sm:$0xff]   ;;  %v3345_v48 = vld [vmem:[%s4220_s2 + $0x4b8] sm:$0xff]  }
  0x63   :  { %3005 = vmatpush3.bf16.msra.mxu0 %v3283_v1  ;;  %2287 = vmatprep.mubr.bf16.mxu0 %v424_v47  ;;  %v3317_v1 = vld [vmem:[%s4220_s2 + $0x480] sm:$0xff]   ;;  %v3320_v5 = vld [vmem:[%s4220_s2 + $0x4c8] sm:$0xff]  }
  0x64   :  { %2248 = vmatmul.mubr.bf16.vlgmr.msra.gmra.mrb[8].mxu1 %v421_v8  ;;  %3006 = vmatprep.subr.bf16.mxu0 %v3286_v9  ;;  %v3323_v8 = vld [vmem:[%s4220_s2 + $0x410] sm:$0xff]  }
  0x65   :  { %3027 = vmatpush3.bf16.msra.mxu1 %v3285_v7  ;;  %2327 = vmatprep.mubr.bf16.mxu1 %v426_v52  ;;  %v3322_v7 = vld [vmem:[%s4220_s2 + $0x450] sm:$0xff]   ;;  %v131_v52 = vrot.slane %v3972_v17, %v3581_v58 }
  0x66   :  { %3028 = vmatprep.subr.bf16.mxu1 %v3288_v13  ;;  %v3324_v9 = vld [vmem:[%s4220_s2 + $0x4d0] sm:$0xff]   ;;  %v3328_v13 = vld [vmem:[%s4220_s2 + $0x4d8] sm:$0xff]  }
  0x67   :  { %3007 = vmatpush3.bf16.msra.mxu0 %v3287_v10  ;;  %v3325_v10 = vld [vmem:[%s4220_s2 + $0x490] sm:$0xff]  }
  0x68   :  { %3008 = vmatprep.subr.bf16.mxu0 %v3290_v15  ;;  %v3330_v15 = vld [vmem:[%s4220_s2 + $0x460] sm:$0xff]  }
  0x69   :  { %3029 = vmatpush3.bf16.msra.mxu1 %v3289_v14  ;;  %v3329_v14 = vld [vmem:[%s4220_s2 + $0x498] sm:$0xff]  }
  0x6a   :  { %3030 = vmatprep.subr.bf16.mxu1 %v3292_v19  ;;  %v107_v19 = vrot.slane %v3972_v17, %v3531_v28 }
  0x6b   :  { %3009 = vmatpush3.bf16.msra.mxu0 %v3291_v16  ;;  %v3331_v16 = vld [vmem:[%s4220_s2 + $0x420] sm:$0xff]  }
  0x6c   :  { %3010 = vmatprep.subr.bf16.mxu0 %v3294_v21  ;;  %v115_v21 = vrot.slane %v3972_v17, %v3541_v32  ;;  %v3336_v32 = vld [vmem:[%s4220_s2 + $0x4e8] sm:$0xff]  }
  0x6d   :  { %3031 = vmatpush3.bf16.msra.mxu1 %v3293_v20  ;;  %v111_v20 = vrot.slane %v3972_v17, %v3536_v30  ;;  %v3335_v30 = vld [vmem:[%s4220_s2 + $0x428] sm:$0xff]  }
  0x6e   :  { %3032 = vmatprep.subr.bf16.mxu1 %v3296_v24  ;;  %v3334_v24 = vld [vmem:[%s4220_s2 + $0x468] sm:$0xff]  }
  0x6f   :  { %3011 = vmatpush3.bf16.msra.mxu0 %v3295_v22  ;;  %v119_v22 = vrot.slane %v3972_v17, %v3546_v34  ;;  %v208_v28 = vcombine.low %v107_v19, %v111_v20  ;;  %v3363_v19 = vld [vmem:[%s4220_s2 + $0x520] sm:$0xff]   ;;  %v3366_v20 = vld [vmem:[%s4220_s2 + $0x568] sm:$0xff]  }
  0x70   :  { %3012 = vmatprep.subr.bf16.mxu0 %v3298_v26 }
  0x71   :  { %3033 = vmatpush3.bf16.msra.mxu1 %v3297_v25  ;;  %v209_v25 = vcombine.low %v115_v21, %v119_v22  ;;  %v216_v34 = vrot.slane %v208_v28, %v3570_v50  ;;  %v3365_v22 = vld [vmem:[%s4220_s2 + $0x5a0] sm:$0xff]  }
  0x72   :  { %3034 = vmatprep.subr.bf16.mxu1 %v3300_v33  ;;  %v3337_v33 = vld [vmem:[%s4220_s2 + $0x4a8] sm:$0xff]  }
  0x73   :  { %3013 = vmatpush3.bf16.msra.mxu0 %v3299_v29  ;;  %v223_v26 = vrot.slane %v209_v25, %v3570_v50  ;;  %v3338_v29 = vld [vmem:[%s4220_s2 + $0x470] sm:$0xff]   ;;  %v3367_v25 = vld [vmem:[%s4220_s2 + $0x528] sm:$0xff]  }
  0x74   :  { %3014 = vmatprep.subr.bf16.mxu0 %v3302_v37  ;;  %v3339_v37 = vld [vmem:[%s4220_s2 + $0x430] sm:$0xff]  }
  0x75   :  { %3035 = vmatpush3.bf16.msra.mxu1 %v3301_v35  ;;  %v224_v31 = vcombine.low %v216_v34, %v223_v26  ;;  %v3340_v35 = vld [vmem:[%s4220_s2 + $0x4f0] sm:$0xff]  }
  0x76   :  { %3036 = vmatprep.subr.bf16.mxu1 %v3304_v41  ;;  %v3344_v41 = vld [vmem:[%s4220_s2 + $0x4f8] sm:$0xff]   ;;  %v3372_v34 = vld [vmem:[%s4220_s2 + $0x5f0] sm:$0xff]  }
  0x77   :  { %3015 = vmatpush3.bf16.msra.mxu0 %v3303_v38  ;;  %v260_v36 = vadd.f32 %v224_v31, %v29_v27  ;;  %v3342_v38 = vld [vmem:[%s4220_s2 + $0x478] sm:$0xff]  }
  0x78   :  { %3016 = vmatprep.subr.bf16.mxu0 %v3306_v45 }
  0x79   :  { %3037 = vmatpush3.bf16.msra.mxu1 %v3305_v42  ;;  %v267_v39 = vmax.f32 %v260_v36, 0.0  ;;  %v3374_v36 = vld [vmem:[%s4220_s2 + $0x578] sm:$0xff]  }
  0x7a   :  { %3038 = vmatprep.subr.bf16.mxu1 %v3308_v49  ;;  %v123_v49 = vrot.slane %v3972_v17, %v3577_v56  ;;  %v3348_v56 = vld [vmem:[%s4220_s2 + $0x5c0] sm:$0xff]  }
  0x7b   :  { %3017 = vmatpush3.bf16.msra.mxu0 %v3307_v46  ;;  %v352_v42 = vrot.slane %v267_v39, %v3570_v50  ;;  %v345_v43 = vcombine.high %v267_v39, %v267_v39  ;;  %v3346_v46 = vld [vmem:[%s4220_s2 + $0x540] sm:$0xff]  }
  0x7c   :  { %3018 = vmatprep.subr.bf16.mxu0 %v3310_v53 }
  0x7d   :  { %3039 = vmatpush3.bf16.msra.mxu1 %v3309_v51  ;;  %v360_v45 = vcombine.high %v352_v42, %v352_v42  ;;  %v359_v47 = vrot.slane %v345_v43, %v3570_v50  ;;  %v127_v51 = vrot.slane %v3972_v17, %v3579_v57 }
  0x7e   :  { %3040 = vmatprep.subr.bf16.mxu1 %v3312_v55 }
  0x7f   :  { %3019 = vmatpush3.bf16.msra.mxu0 %v3311_v54  ;;  %v428_v53 = vpack.c.bf16 %v360_v45, %v360_v45  ;;  %v427_v54 = vpack.c.bf16 %v352_v42, %v352_v42  ;;  %v361_v55 = vcombine.high %v359_v47, %v359_v47  ;;  %v429_v58 = vpack.c.bf16 %v359_v47, %v359_v47 }
  0x80   :  { %3048 = vmatprep.subr.bf16.mxu0 %v3314_v61  ;;  %v135_v61 = vrot.slane %v3972_v17, %v3583_v59  ;;  %v3352_v59 = vld [vmem:[%s4220_s2 + $0x5c8] sm:$0xff]   ;;  %v3364_v17 = vld [vmem:[%s4220_s2 + $0x5e0] sm:$0xff]  }
  0x81   :  { %3041 = vmatpush3.bf16.msra.mxu1 %v3313_v60  ;;  %v3347_v60 = vld [vmem:[%s4220_s2 + $0x500] sm:$0xff]   ;;  %v430_v57 = vpack.c.bf16 %v361_v55, %v361_v55 }
  0x82   :  { %2288 = vmatmul.mubr.bf16.vlgmr.msra.gmra.mrb[12].mxu0 %v423_v63  ;;  %3070 = vmatprep.subr.bf16.mxu1 %v3316_v0  ;;  %v3349_v63 = vld [vmem:[%s4220_s2 + $0x580] sm:$0xff]   ;;  %v225_v0 = vcombine.low %v123_v49, %v127_v51 }
  0x83   :  { %3049 = vmatpush3.bf16.msra.mxu0 %v3315_v62  ;;  %2367 = vmatprep.mubr.bf16.mxu0 %v428_v53  ;;  %v3350_v62 = vld [vmem:[%s4220_s2 + $0x548] sm:$0xff]  }
  0x84   :  { %2328 = vmatmul.mubr.bf16.vlgmr.msra.gmra.mrb[12].mxu1 %v425_v2  ;;  %3050 = vmatprep.subr.bf16.mxu0 %v3318_v3  ;;  %v3351_v2 = vld [vmem:[%s4220_s2 + $0x508] sm:$0xff]   ;;  %v3354_v3 = vld [vmem:[%s4220_s2 + $0x550] sm:$0xff]  }
  0x85   :  { %3071 = vmatpush3.bf16.msra.mxu1 %v3317_v1  ;;  %2407 = vmatprep.mubr.bf16.mxu1 %v430_v57  ;;  %v226_v1 = vcombine.low %v131_v52, %v135_v61 }
  0x86   :  { %3072 = vmatprep.subr.bf16.mxu1 %v3320_v5  ;;  %v3356_v5 = vld [vmem:[%s4220_s2 + $0x5d0] sm:$0xff]  }
  0x87   :  { %3051 = vmatpush3.bf16.msra.mxu0 %v3319_v4  ;;  %v3353_v4 = vld [vmem:[%s4220_s2 + $0x588] sm:$0xff]  }
  0x88   :  { %3052 = vmatprep.subr.bf16.mxu0 %v3322_v7  ;;  %v240_v7 = vrot.slane %v226_v1, %v3570_v50 }
  0x89   :  { %3073 = vmatpush3.bf16.msra.mxu1 %v3321_v6  ;;  %v233_v6 = vrot.slane %v225_v0, %v3570_v50 }
  0x8a   :  { %3074 = vmatprep.subr.bf16.mxu1 %v3324_v9  ;;  %v3358_v9 = vld [vmem:[%s4220_s2 + $0x558] sm:$0xff]  }
  0x8b   :  { %3053 = vmatpush3.bf16.msra.mxu0 %v3323_v8  ;;  %v3355_v8 = vld [vmem:[%s4220_s2 + $0x510] sm:$0xff]  }
  0x8c   :  { %3054 = vmatprep.subr.bf16.mxu0 %v3326_v11  ;;  %v3360_v11 = vld [vmem:[%s4220_s2 + $0x5d8] sm:$0xff]  }
  0x8d   :  { %3075 = vmatpush3.bf16.msra.mxu1 %v3325_v10  ;;  %v3357_v10 = vld [vmem:[%s4220_s2 + $0x590] sm:$0xff]  }
  0x8e   :  { %3076 = vmatprep.subr.bf16.mxu1 %v3328_v13  ;;  %v3359_v13 = vld [vmem:[%s4220_s2 + $0x518] sm:$0xff]  }
  0x8f   :  { %3055 = vmatpush3.bf16.msra.mxu0 %v3327_v12  ;;  %v241_v12 = vcombine.low %v233_v6, %v240_v7 }
  0x90   :  { %3056 = vmatprep.subr.bf16.mxu0 %v3330_v15  ;;  %v3361_v15 = vld [vmem:[%s4220_s2 + $0x598] sm:$0xff]  }
  0x91   :  { %3077 = vmatpush3.bf16.msra.mxu1 %v3329_v14  ;;  %v3362_v14 = vld [vmem:[%s4220_s2 + $0x560] sm:$0xff]  }
  0x92   :  { %3078 = vmatprep.subr.bf16.mxu1 %v3332_v18 }
  0x93   :  { %3057 = vmatpush3.bf16.msra.mxu0 %v3331_v16  ;;  %v30_v16 = vld [vmem:[%s4218_s0 + $0x28] sm:$0xff] }
  0x94   :  { %3058 = vmatprep.subr.bf16.mxu0 %v3334_v24  ;;  %v261_v18 = vadd.f32 %v241_v12, %v30_v16 }
  0x95   :  { %3079 = vmatpush3.bf16.msra.mxu1 %v3333_v23  ;;  %v3368_v23 = vld [vmem:[%s4220_s2 + $0x5e8] sm:$0xff]  }
  0x96   :  { %3080 = vmatprep.subr.bf16.mxu1 %v3336_v32  ;;  %v268_v21 = vmax.f32 %v261_v18, 0.0  ;;  %v3370_v32 = vld [vmem:[%s4220_s2 + $0x570] sm:$0xff]  }
  0x97   :  { %3059 = vmatpush3.bf16.msra.mxu0 %v3335_v30  ;;  %v3369_v30 = vld [vmem:[%s4220_s2 + $0x5a8] sm:$0xff]  }
  0x98   :  { %3060 = vmatprep.subr.bf16.mxu0 %v3338_v29  ;;  %v369_v24 = vrot.slane %v268_v21, %v3570_v50  ;;  %v362_v28 = vcombine.high %v268_v21, %v268_v21  ;;  %v3371_v29 = vld [vmem:[%s4220_s2 + $0x530] sm:$0xff]  }
  0x99   :  { %3081 = vmatpush3.bf16.msra.mxu1 %v3337_v33 }
  0x9a   :  { %3082 = vmatprep.subr.bf16.mxu1 %v3340_v35  ;;  %v377_v26 = vcombine.high %v369_v24, %v369_v24  ;;  %v376_v27 = vrot.slane %v362_v28, %v3570_v50  ;;  %v3373_v35 = vld [vmem:[%s4220_s2 + $0x5b0] sm:$0xff]  }
  0x9b   :  { %3061 = vmatpush3.bf16.msra.mxu0 %v3339_v37 }
  0x9c   :  { %3062 = vmatprep.subr.bf16.mxu0 %v3342_v38  ;;  %v432_v31 = vpack.c.bf16 %v377_v26, %v377_v26  ;;  %v378_v33 = vcombine.high %v376_v27, %v376_v27 }
  0x9d   :  { %3083 = vmatpush3.bf16.msra.mxu1 %v3341_v40 }
  0x9e   :  { %3084 = vmatprep.subr.bf16.mxu1 %v3344_v41  ;;  %v434_v37 = vpack.c.bf16 %v378_v33, %v378_v33 }
  0x9f   :  { %3063 = vmatpush3.bf16.msra.mxu0 %v3343_v44 }
  0xa0   :  { %3092 = vmatprep.subr.bf16.mxu0 %v3346_v46 }
  0xa1   :  { %3085 = vmatpush3.bf16.msra.mxu1 %v3345_v48 }
  0xa2   :  { %2368 = vmatmul.mubr.bf16.vlgmr.msra.gmra.mrb[16].mxu0 %v427_v54  ;;  %3114 = vmatprep.subr.bf16.mxu1 %v3348_v56 }
  0xa3   :  { %3093 = vmatpush3.bf16.msra.mxu0 %v3347_v60  ;;  %2447 = vmatprep.mubr.bf16.mxu0 %v432_v31 }
  0xa4   :  { %2408 = vmatmul.mubr.bf16.vlgmr.msra.gmra.mrb[16].mxu1 %v429_v58  ;;  %3094 = vmatprep.subr.bf16.mxu0 %v3350_v62 }
  0xa5   :  { %3115 = vmatpush3.bf16.msra.mxu1 %v3349_v63 }
  0xa6   :  { %3116 = vmatprep.subr.bf16.mxu1 %v3352_v59 }
  0xa7   :  { %3095 = vmatpush3.bf16.msra.mxu0 %v3351_v2 }
  0xa8   :  { %3096 = vmatprep.subr.bf16.mxu0 %v3354_v3 }
  0xa9   :  { %3117 = vmatpush3.bf16.msra.mxu1 %v3353_v4 }
  0xaa   :  { %3118 = vmatprep.subr.bf16.mxu1 %v3356_v5 }
  0xab   :  { %3097 = vmatpush3.bf16.msra.mxu0 %v3355_v8 }
  0xac   :  { %3098 = vmatprep.subr.bf16.mxu0 %v3358_v9 }
  0xad   :  { %3119 = vmatpush3.bf16.msra.mxu1 %v3357_v10 }
  0xae   :  { %3120 = vmatprep.subr.bf16.mxu1 %v3360_v11 }
  0xaf   :  { %3099 = vmatpush3.bf16.msra.mxu0 %v3359_v13 }
  0xb0   :  { %3100 = vmatprep.subr.bf16.mxu0 %v3362_v14 }
  0xb1   :  { %3121 = vmatpush3.bf16.msra.mxu1 %v3361_v15 }
  0xb2   :  { %3122 = vmatprep.subr.bf16.mxu1 %v3364_v17 }
  0xb3   :  { %3101 = vmatpush3.bf16.msra.mxu0 %v3363_v19 }
  0xb4   :  { %3102 = vmatprep.subr.bf16.mxu0 %v3366_v20 }
  0xb5   :  { %3123 = vmatpush3.bf16.msra.mxu1 %v3365_v22 }
  0xb6   :  { %3124 = vmatprep.subr.bf16.mxu1 %v3368_v23 }
  0xb7   :  { %3103 = vmatpush3.bf16.msra.mxu0 %v3367_v25 }
  0xb8   :  { %3104 = vmatprep.subr.bf16.mxu0 %v3370_v32 }
  0xb9   :  { %3125 = vmatpush3.bf16.msra.mxu1 %v3369_v30 }
  0xba   :  { %11 = vsyncpa [#allocation3], 0  ;;  %3126 = vmatprep.subr.bf16.mxu1 %v3372_v34  ;;  %v3376_v38 = vld [vmem:[%s4220_s2 + $0x5f8] sm:$0xff]   ;;  %2487 = vmatprep.mubr.bf16.mxu1 %v434_v37  ;;  %v431_v42 = vpack.c.bf16 %v369_v24, %v369_v24  ;;  %v3378_v44 = vld [vmem:[%s4220_s2 + $0x600] sm:$0xff]   ;;  %v3415_v46 = vmov 0.0   ;;  %v433_v47 = vpack.c.bf16 %v376_v27, %v376_v27  ;;  %vm3416_vm0 = vmmov 0  }
  0xbb   :  { %3105 = vmatpush3.bf16.msra.mxu0 %v3371_v29  ;;  %v3375_v39 = vld [vmem:[%s4220_s2 + $0x538] sm:$0xff]   ;;  %v31_v45 = vld [vmem:[%s4218_s0 + $0x30] sm:$0x3]  ;;  %v3379_v49 = vld [vmem:[%s4220_s2 + $0x608] sm:$0xff]   ;;  %vm2011_vm1 = vcmask 523264   ;;  %s3417_s18 = smov [#allocation2]  }
  0xbc   :  { %v2664_v40 = vld [vmem:[%s4219_s1 + $0x18] ss:$0 sm:$0xff]  ;;  %3106 = vmatprep.subr.bf16.mxu0 %v3374_v36  ;;  %v3380_v52 = vld [vmem:[%s4220_s2 + $0x610] sm:$0xff]   ;;  %v2665_v61 = vld [vmem:[%s4221_s3] ss:$0 sm:$0xff]  ;;  %s2656_s19 = sshll.u32 %s3417_s18, 4  ;;  %s2657_s19 = int_to_ptr.vmem [resolvable:$true] %s2656_s19 }
  0xbd   :  { %3127 = vmatpush3.bf16.msra.mxu1 %v3373_v35  ;;  %v3377_v41 = vld [vmem:[%s4220_s2 + $0x5b8] sm:$0xff]   ;;  %v248_v43 = vrot.slane %v2664_v40, %v3570_v50  ;;  %v3382_v4 = vld [vmem:[%s4222_s4] sm:$0xff]   ;;  %v3383_v5 = vld [vmem:[%s4222_s4 + $0x8] sm:$0xff]   ;;  %vm2648_vm2 = vcmask 74752   ;;  %s3390_s20 = scalar_lea.vmem %s2657_s19, 32  ;;  %p3395_p1 = scmp.lt.s32.totalorder %s2657_s19, %s2657_s19 }
  0xbe   :  { %3128 = vmatprep.subr.bf16.mxu1 %v3376_v38  ;;  %v3381_v54 = vld [vmem:[%s4220_s2 + $0x618] sm:$0xff]   ;;  %v3384_v6 = vld [vmem:[%s4222_s4 + $0x10] sm:$0xff]   ;;  %v3386_v18 = vld [vmem:[%s4222_s4 + $0x20] sm:$0xff]   ;;  %p3391_p0 = scmp.ne.s32.totalorder %s2657_s19, %s3390_s20  ;;  %p3396_p2 = scmp.lt.s32.totalorder %s3390_s20, %s3390_s20 }
  0xbf   :  { %3107 = vmatpush3.bf16.msra.mxu0 %v3375_v39  ;;  %v262_v48 = vadd.f32 %v248_v43, %v31_v45  ;;  %v3385_v12 = vld [vmem:[%s4222_s4 + $0x18] sm:$0xff]   ;;  %v3387_v21 = vld [vmem:[%s4222_s4 + $0x28] sm:$0xff]   ;;  %v3388_v22 = vld [vmem:[%s4222_s4 + $0x30] sm:$0xff]  }
  0xc0   :  { %3150 = vmatprep.subr.bf16.mxu0 %v3415_v46  ;;  %v3389_v23 = vld [vmem:[%s4222_s4 + $0x38] sm:$0xff]   ;;  %p3397_p3 = por %p3396_p2, %p3395_p1 }
  0xc1   :  { %3129 = vmatpush3.bf16.msra.mxu1 %v3377_v41  ;;  %v269_v51 = vmax.f32 %v262_v48, 0.0 }
  0xc2   :  { %2448 = vmatmul.mubr.bf16.vlgmr.msra.gmra.mrb[20].mxu0 %v431_v42  ;;  %3162 = vmatprep.subr.bf16.mxu1 %v3415_v46  ;;  %p3398_p4 = pnand %p3397_p3, %p3391_p0 }
  0xc3   :  { %3151 = vmatpush3.bf16.msra.mxu0 %v3378_v44  ;;  %3158 = vmatprep.mubr.msk.bf16.mxu0 %vm3416_vm0, %v3415_v46  ;;  %v385_v53 = vrot.slane %v269_v51, %v3570_v50 }
  0xc4   :  { %2488 = vmatmul.mubr.bf16.vlgmr.msra.gmra.mrb[20].mxu1 %v433_v47  ;;  %3152 = vmatprep.subr.bf16.mxu0 %v3415_v46 }
  0xc5   :  { %3178 = vmatprep.mubr.msk.bf16.mxu1 %vm3416_vm0, %v3415_v46  ;;  %v435_v55 = vpack.c.bf16 %v385_v53, %v385_v53  ;;  %3163 = vmatpush3.bf16.msra.mxu1 %v3382_v4 }
  0xc6   :  { %3164 = vmatprep.subr.bf16.mxu1 %v3415_v46 }
  0xc7   :  { %3153 = vmatpush3.bf16.msra.mxu0 %v3379_v49 }
  0xc8   :  { %3154 = vmatprep.subr.bf16.mxu0 %v3415_v46 }
  0xc9   :  { %3165 = vmatpush3.bf16.msra.mxu1 %v3383_v5 }
  0xca   :  { %3166 = vmatprep.subr.bf16.mxu1 %v3415_v46 }
  0xcb   :  { %3155 = vmatpush3.bf16.msra.mxu0 %v3380_v52 }
  0xcc   :  { %3156 = vmatprep.subr.bf16.mxu0 %v3415_v46 }
  0xcd   :  { %3167 = vmatpush3.bf16.msra.mxu1 %v3384_v6 }
  0xce   :  { %3168 = vmatprep.subr.bf16.mxu1 %v3415_v46 }
  0xcf   :  { %3157 = vmatpush3.bf16.msra.mxu0 %v3381_v54 }
  0xd1   :  { %3169 = vmatpush3.bf16.msra.mxu1 %v3385_v12 }
  0xd2   :  { %3159 = vmatmul.mubr.msk.bf16.vlgmr.msra.gmra.mrb[24].mxu0 %vm2011_vm1, %v435_v55  ;;  %3170 = vmatprep.subr.bf16.mxu1 %v3415_v46 }
  0xd5   :  { %3171 = vmatpush3.bf16.msra.mxu1 %v3386_v18 }
  0xd6   :  { %3172 = vmatprep.subr.bf16.mxu1 %v3415_v46 }
  0xd9   :  { %3173 = vmatpush3.bf16.msra.mxu1 %v3387_v21 }
  0xda   :  { %3174 = vmatprep.subr.bf16.mxu1 %v3415_v46 }
  0xdd   :  { %3175 = vmatpush3.bf16.msra.mxu1 %v3388_v22 }
  0xde   :  { %3176 = vmatprep.subr.bf16.mxu1 %v3415_v46 }
  0xe1   :  { %3177 = vmatpush3.bf16.msra.mxu1 %v3389_v23 }
  0xf5   :  { %v2888_v60 = vpop.f32.mrb[0].mxu0 }
  0xf6   :  { %v2889_v56 = vpop.f32.mrb[1].mxu0 }
  0xf7   :  { %v2890_v57 = vadd.f32 %v2889_v56, %v2888_v60  ;;  %v2891_v58 = vpop.f32.mrb[2].mxu0  ;;  %v2910_v50 = vpop.f32.mrb[0].mxu1 }
  0xf8   :  { %v2892_v62 = vpop.f32.mrb[3].mxu0  ;;  %v2911_v63 = vpop.f32.mrb[1].mxu1 }
  0xf9   :  { %v2050_v59 = vadd.f32 %v2890_v57, %v2665_v61  ;;  %v2912_v0 = vadd.f32 %v2911_v63, %v2910_v50  ;;  %v2913_v1 = vpop.f32.mrb[2].mxu1 }
  0xfa   :  { %v2914_v2 = vpop.f32.mrb[3].mxu1 }
  0xfb   :  { %v2090_v3 = vadd.f32 %v2912_v0, %v2050_v59 }
 0x115   :  { %v2932_v7 = vpop.f32.mrb[4].mxu0 }
 0x116   :  { %v2933_v8 = vpop.f32.mrb[5].mxu0 }
 0x117   :  { %v2934_v9 = vadd.f32 %v2933_v8, %v2932_v7  ;;  %v2935_v10 = vpop.f32.mrb[6].mxu0  ;;  %v2954_v11 = vpop.f32.mrb[4].mxu1 }
 0x118   :  { %v2936_v13 = vpop.f32.mrb[7].mxu0  ;;  %v2955_v14 = vpop.f32.mrb[5].mxu1 }
 0x119   :  { %v2130_v15 = vadd.f32 %v2934_v9, %v2090_v3  ;;  %v2956_v16 = vadd.f32 %v2955_v14, %v2954_v11  ;;  %v2957_v17 = vpop.f32.mrb[6].mxu1 }
 0x11a   :  { %v2958_v19 = vpop.f32.mrb[7].mxu1 }
 0x11b   :  { %v2170_v20 = vadd.f32 %v2956_v16, %v2130_v15  ;;  %v2863_v15 = vld [vmem:[%s4223_s5] ss:$0 sm:$0xff] }
 0x135   :  { %v2976_v24 = vpop.f32.mrb[8].mxu0 }
 0x136   :  { %v2977_v28 = vpop.f32.mrb[9].mxu0 }
 0x137   :  { %v2978_v25 = vadd.f32 %v2977_v28, %v2976_v24  ;;  %v2979_v30 = vpop.f32.mrb[10].mxu0  ;;  %v2998_v32 = vpop.f32.mrb[8].mxu1 }
 0x138   :  { %v2980_v34 = vpop.f32.mrb[11].mxu0  ;;  %v2999_v26 = vpop.f32.mrb[9].mxu1 }
 0x139   :  { %v2210_v27 = vadd.f32 %v2978_v25, %v2170_v20  ;;  %v3000_v29 = vadd.f32 %v2999_v26, %v2998_v32  ;;  %v3001_v31 = vpop.f32.mrb[10].mxu1 }
 0x13a   :  { %v3002_v33 = vpop.f32.mrb[11].mxu1 }
 0x13b   :  { %v2250_v35 = vadd.f32 %v3000_v29, %v2210_v27 }
 0x155   :  { %v3020_v36 = vpop.f32.mrb[12].mxu0 }
 0x156   :  { %v3021_v37 = vpop.f32.mrb[13].mxu0 }
 0x157   :  { %v3022_v38 = vadd.f32 %v3021_v37, %v3020_v36  ;;  %v3023_v39 = vpop.f32.mrb[14].mxu0  ;;  %v3042_v40 = vpop.f32.mrb[12].mxu1 }
 0x158   :  { %v3024_v41 = vpop.f32.mrb[15].mxu0  ;;  %v3043_v42 = vpop.f32.mrb[13].mxu1 }
 0x159   :  { %v2290_v43 = vadd.f32 %v3022_v38, %v2250_v35  ;;  %v3044_v44 = vadd.f32 %v3043_v42, %v3042_v40  ;;  %v3045_v45 = vpop.f32.mrb[14].mxu1 }
 0x15a   :  { %v3046_v46 = vpop.f32.mrb[15].mxu1 }
 0x15b   :  { %v2330_v47 = vadd.f32 %v3044_v44, %v2290_v43 }
 0x175   :  { %v3064_v48 = vpop.f32.mrb[16].mxu0 }
 0x176   :  { %v3065_v49 = vpop.f32.mrb[17].mxu0 }
 0x177   :  { %v3066_v51 = vadd.f32 %v3065_v49, %v3064_v48  ;;  %v3067_v52 = vpop.f32.mrb[18].mxu0  ;;  %v3086_v53 = vpop.f32.mrb[16].mxu1 }
 0x178   :  { %v3068_v54 = vpop.f32.mrb[19].mxu0  ;;  %v3087_v55 = vpop.f32.mrb[17].mxu1 }
 0x179   :  { %v2370_v60 = vadd.f32 %v3066_v51, %v2330_v47  ;;  %v3088_v61 = vadd.f32 %v3087_v55, %v3086_v53  ;;  %v3089_v56 = vpop.f32.mrb[18].mxu1 }
 0x17a   :  { %v3090_v57 = vpop.f32.mrb[19].mxu1 }
 0x17b   :  { %v2410_v58 = vadd.f32 %v3088_v61, %v2370_v60 }
 0x195   :  { %v3108_v50 = vpop.f32.mrb[20].mxu0 }
 0x196   :  { %v3109_v62 = vpop.f32.mrb[21].mxu0 }
 0x197   :  { %v3110_v63 = vadd.f32 %v3109_v62, %v3108_v50  ;;  %v3111_v59 = vpop.f32.mrb[22].mxu0  ;;  %v3130_v0 = vpop.f32.mrb[20].mxu1 }
 0x198   :  { %v3112_v1 = vpop.f32.mrb[23].mxu0  ;;  %v3131_v2 = vpop.f32.mrb[21].mxu1 }
 0x199   :  { %v2450_v3 = vadd.f32 %v3110_v63, %v2410_v58  ;;  %v3132_v4 = vadd.f32 %v3131_v2, %v3130_v0  ;;  %v3133_v5 = vpop.f32.mrb[22].mxu1 }
 0x19a   :  { %v3134_v6 = vpop.f32.mrb[23].mxu1 }
 0x19b   :  { %v2490_v7 = vadd.f32 %v3132_v4, %v2450_v3 }
 0x1a5   :  { %v2529_v8 = vpop.f32.mrb[24].mxu0 }
 0x1a6   :  { %v2530_v9 = vadd.f32 %v2529_v8, %v2490_v7  ;;  %v3160_v10 = vpop.f32.mrb[25].mxu0 }
 0x1a7   :  { %v2532_v11 = vpop.f32.mrb[26].mxu0 }
 0x1a8   :  { %v2535_v12 = vmax.f32 %v2530_v9, 0.0  ;;  %v3161_v13 = vpop.f32.mrb[27].mxu0 }
 0x1aa   :  { %v2536_v14 = vpack.c.bf16 %v2535_v12, %v2535_v12 }
 0x1ac   :  { %3179 = vmatmul.mubr.bf16.vlgmr.msra.gmra.mrb[24].mxu1 %v2536_v14 }
 0x27f   :  { %v2642_v16 = vpop.f32.mrb[24].mxu1 }
 0x280   :  { %v2643_v17 = vadd.f32 %v2863_v15, %v2642_v16  ;;  %v3180_v18 = vpop.f32.mrb[25].mxu1 }
 0x281   :  { %v2645_v19 = vpop.f32.mrb[26].mxu1 }
 0x282   :  { %v3181_v20 = vpop.f32.mrb[27].mxu1  ;;  %2649 = vst.msk [vmem:[#allocation2] sm:$0x3] %vm2648_vm2, %v2643_v17 }
 0x283   :  { %3401 = shalt.err (!%p3398_p4)
}
 0x284   :  { %s3402_s5 = scalar_lea.hbm %s4224_s6, 32 }
 0x285   :  { %p3403_p5 = scmp.ne.s32.totalorder %s4224_s6, %s3402_s5  ;;  %p3406_p6 = scmp.lt.u32.totalorder %s3402_s5, %s4224_s6 }
 0x287   :  { %p3408_p7 = pnand %p3406_p6, %p3403_p5 }
 0x289   :  { %3411 = shalt.err (!%p3408_p7)
}
 0x28a   :  { %2659 = dma.vmem_to_hbm [thread:$0]  %s2657_s19, 32, %s4224_s6, [#allocation3]  }
 0x28b   :  { %3412 = dma.done.wait [#allocation3], 32  }
 0x28c   :  { %3413 = vsyncadd [#allocation3], 4294967264 }
 0x28d   :  { %2663 = vsyncpa [#allocation3], 1 }

</bundles_post_ra>
